<compile_context>
chip_gen: v6e
topology: v6e:2x2x1
jax: 0.10.0
libtpu: 0.0.40
codegen_flags: <defaults>
</compile_context>

<pallas_src>
import jax
import jax.numpy as jnp
from jax.experimental import pallas as pl
from jax.experimental.pallas import tpu as pltpu

D_COMMON = 400
D_EVENT = 400
D_KEY = 400
D_IN = D_COMMON + D_EVENT + D_KEY   # 1200
D_HID = 600
D_OUT = 400
D_HID_PAD = 640                     # 600 -> next multiple of 128
D_OUT_PAD = 512                     # 400 -> next multiple of 128 (lane-dense output)
LEAKY_SLOPE = 0.2


def _round_up(x, m):
    return (x + m - 1) // m * m


def _encoder_kernel(a_ref, e_ref, k_ref,
                    w1a_ref, w1e_ref, w1k_ref, b1_ref,
                    w2_ref, b2_ref,
                    out_ref):
    # fc1 over the (virtually) concatenated input: 3 partial MXU matmuls, f32 accumulation.
    h = jnp.dot(a_ref[...], w1a_ref[...], preferred_element_type=jnp.float32)
    h = h + jnp.dot(e_ref[...], w1e_ref[...], preferred_element_type=jnp.float32)
    h = h + jnp.dot(k_ref[...], w1k_ref[...], preferred_element_type=jnp.float32)
    h = h + b1_ref[...]                        # single broadcast bias add (f32)
    h = jnp.where(h > 0, h, LEAKY_SLOPE * h)   # LeakyReLU(0.2) on the VPU
    # fc2: cast the activation back to the matmul dtype so the MXU runs at bf16 rate.
    out = jnp.dot(h.astype(w2_ref.dtype), w2_ref[...],
                  preferred_element_type=jnp.float32)
    out_ref[...] = (out + b2_ref[...]).astype(out_ref.dtype)


def user_total_encoder(user_common_emb, user_event_emb, user_key_entity_emb,
                       w1, b1, w2, b2, *, bm=256, matmul_dtype=jnp.bfloat16):
    """UserTotalEncoder forward.

    w1: [1200, 600], b1: [600], w2: [600, 400], b2: [400]
    (weights are stored [in_features, out_features], i.e. transposed vs nn.Linear).
    Returns f32 [B, 400].
    """
    B = user_common_emb.shape[0]

    # ---- parameter prep (done once, outside the kernel) ----------------------
    # Split fc1 weight along its input axis (folds the concat away), pad the
    # hidden dim 600->640 and output dim 400->512 with zeros. Exact: zero hidden
    # columns give zero activations which meet zero-padded rows of w2; padded
    # output columns are sliced off below.
    pad_h = D_HID_PAD - D_HID
    pad_o = D_OUT_PAD - D_OUT
    w1a = jnp.pad(w1[:D_COMMON], ((0, 0), (0, pad_h))).astype(matmul_dtype)
    w1e = jnp.pad(w1[D_COMMON:D_COMMON + D_EVENT], ((0, 0), (0, pad_h))).astype(matmul_dtype)
    w1k = jnp.pad(w1[D_COMMON + D_EVENT:], ((0, 0), (0, pad_h))).astype(matmul_dtype)
    b1p = jnp.pad(b1, ((0, pad_h),)).reshape(1, D_HID_PAD).astype(jnp.float32)
    w2p = jnp.pad(w2, ((0, pad_h), (0, pad_o))).astype(matmul_dtype)
    b2p = jnp.pad(b2, ((0, pad_o),)).reshape(1, D_OUT_PAD).astype(jnp.float32)

    # ---- batch tiling / padding ----------------------------------------------
    # Keep the MXU fed with up to `bm` rows per step; for small batches shrink the
    # tile instead of padding wastefully, and pad the batch to a tile multiple.
    bm_eff = min(bm, _round_up(B, 8))
    B_pad = _round_up(B, bm_eff)
    pad_b = B_pad - B

    a = user_common_emb.astype(matmul_dtype)
    e = user_event_emb.astype(matmul_dtype)
    k = user_key_entity_emb.astype(matmul_dtype)
    if pad_b:
        a = jnp.pad(a, ((0, pad_b), (0, 0)))
        e = jnp.pad(e, ((0, pad_b), (0, 0)))
        k = jnp.pad(k, ((0, pad_b), (0, 0)))

    grid = (B_pad // bm_eff,)
    full = lambda i: (0, 0)
    batch_tile = lambda i: (i, 0)

    out = pl.pallas_call(
        _encoder_kernel,
        out_shape=jax.ShapeDtypeStruct((B_pad, D_OUT_PAD), jnp.float32),
        grid_spec=pltpu.PrefetchScalarGridSpec(
            num_scalar_prefetch=0,
            grid=grid,
            in_specs=[
                pl.BlockSpec((bm_eff, D_COMMON), batch_tile),
                pl.BlockSpec((bm_eff, D_EVENT), batch_tile),
                pl.BlockSpec((bm_eff, D_KEY), batch_tile),
                pl.BlockSpec((D_COMMON, D_HID_PAD), full),   # weights: constant block
                pl.BlockSpec((D_EVENT, D_HID_PAD), full),    # index -> DMA'd once,
                pl.BlockSpec((D_KEY, D_HID_PAD), full),      # stay resident in VMEM
                pl.BlockSpec((1, D_HID_PAD), full),
                pl.BlockSpec((D_HID_PAD, D_OUT_PAD), full),
                pl.BlockSpec((1, D_OUT_PAD), full),
            ],
            out_specs=pl.BlockSpec((bm_eff, D_OUT_PAD), batch_tile),
        ),
        compiler_params=pltpu.CompilerParams(
            dimension_semantics=("parallel",),
        ),
    )(a, e, k, w1a, w1e, w1k, b1p, w2p, b2p)

    return out[:B, :D_OUT]


def _reference(a, e, k, w1, b1, w2, b2, matmul_dtype=jnp.bfloat16):
    """Matched-precision reference: bf16 operands, f32 accumulation."""
    x = jnp.concatenate([a, e, k], axis=-1).astype(matmul_dtype)
    h = jnp.dot(x, w1.astype(matmul_dtype), preferred_element_type=jnp.float32) + b1
    h = jnp.where(h > 0, h, LEAKY_SLOPE * h)
    return jnp.dot(h.astype(matmul_dtype), w2.astype(matmul_dtype),
                   preferred_element_type=jnp.float32) + b2


if __name__ == "__main__":
    key = jax.random.PRNGKey(0)
    k_a, k_e, k_k, k_w1, k_b1, k_w2, k_b2 = jax.random.split(key, 7)

    B = 50  # small, non-multiple-of-8 batch to exercise the padding path

    a = jax.random.normal(k_a, (B, D_COMMON), dtype=jnp.float32)
    e = jax.random.normal(k_e, (B, D_EVENT), dtype=jnp.float32)
    kk = jax.random.normal(k_k, (B, D_KEY), dtype=jnp.float32)

    # Deterministic synthetic parameters (nn.Linear-style uniform init),
    # stored as [in_features, out_features].
    lim1 = 1.0 / jnp.sqrt(jnp.float32(D_IN))
    lim2 = 1.0 / jnp.sqrt(jnp.float32(D_HID))
    w1 = jax.random.uniform(k_w1, (D_IN, D_HID), minval=-lim1, maxval=lim1, dtype=jnp.float32)
    b1 = jax.random.uniform(k_b1, (D_HID,), minval=-lim1, maxval=lim1, dtype=jnp.float32)
    w2 = jax.random.uniform(k_w2, (D_HID, D_OUT), minval=-lim2, maxval=lim2, dtype=jnp.float32)
    b2 = jax.random.uniform(k_b2, (D_OUT,), minval=-lim2, maxval=lim2, dtype=jnp.float32)

    out = user_total_encoder(a, e, kk, w1, b1, w2, b2)
    out = jax.block_until_ready(out)

    ref = _reference(a, e, kk, w1, b1, w2, b2)
    assert out.shape == (B, D_OUT), out.shape
    assert jnp.allclose(out, ref, atol=1e-2, rtol=1e-2), "mismatch vs matched-precision reference"

    # Sanity check against the pure-f32 reference (bf16 quantization error only).
    x_f32 = jnp.concatenate([a, e, kk], axis=-1)
    h_f32 = x_f32 @ w1 + b1
    h_f32 = jnp.where(h_f32 > 0, h_f32, LEAKY_SLOPE * h_f32)
    ref_f32 = h_f32 @ w2 + b2
    assert jnp.max(jnp.abs(out - ref_f32)) < 5e-2, "bf16 error larger than expected"

    print("KERNEL_OK")
</pallas_src>

<mosaic_0001>
module attributes {stable_mosaic.version = 11 : i64} {
  func.func @_encoder_kernel(%arg0: i32, %arg1: memref<56x400xbf16, #tpu.memory_space<vmem>>, %arg2: memref<56x400xbf16, #tpu.memory_space<vmem>>, %arg3: memref<56x400xbf16, #tpu.memory_space<vmem>>, %arg4: memref<400x640xbf16, #tpu.memory_space<vmem>>, %arg5: memref<400x640xbf16, #tpu.memory_space<vmem>>, %arg6: memref<400x640xbf16, #tpu.memory_space<vmem>>, %arg7: memref<1x640xf32, #tpu.memory_space<vmem>>, %arg8: memref<640x512xbf16, #tpu.memory_space<vmem>>, %arg9: memref<1x512xf32, #tpu.memory_space<vmem>>, %arg10: memref<56x512xf32, #tpu.memory_space<vmem>>) attributes {dimension_semantics = [#tpu.dimension_semantics<parallel>], iteration_bounds = array<i64: 1>, scalar_prefetch = 0 : i64, scratch_operands = 0 : i64, tpu.core_type = #tpu.core_type<tc>, window_params = [{transform_indices = @transform_0, window_bounds = array<i64: 56, 400>}, {transform_indices = @transform_1, window_bounds = array<i64: 56, 400>}, {transform_indices = @transform_2, window_bounds = array<i64: 56, 400>}, {pipeline_mode = #tpu.pipeline_mode<synchronous>, transform_indices = @transform_3, window_bounds = array<i64: 400, 640>}, {pipeline_mode = #tpu.pipeline_mode<synchronous>, transform_indices = @transform_4, window_bounds = array<i64: 400, 640>}, {pipeline_mode = #tpu.pipeline_mode<synchronous>, transform_indices = @transform_5, window_bounds = array<i64: 400, 640>}, {pipeline_mode = #tpu.pipeline_mode<synchronous>, transform_indices = @transform_6, window_bounds = array<i64: 1, 640>}, {pipeline_mode = #tpu.pipeline_mode<synchronous>, transform_indices = @transform_7, window_bounds = array<i64: 640, 512>}, {pipeline_mode = #tpu.pipeline_mode<synchronous>, transform_indices = @transform_8, window_bounds = array<i64: 1, 512>}, {transform_indices = @transform_9, window_bounds = array<i64: 56, 512>}]} {
    %c0 = arith.constant 0 : index
    %c0_0 = arith.constant 0 : index
    %0 = vector.load %arg1[%c0, %c0_0] : memref<56x400xbf16, #tpu.memory_space<vmem>>, vector<56x400xbf16>
    %c0_1 = arith.constant 0 : index
    %c0_2 = arith.constant 0 : index
    %1 = vector.load %arg4[%c0_1, %c0_2] : memref<400x640xbf16, #tpu.memory_space<vmem>>, vector<400x640xbf16>
    %cst = arith.constant dense<0.000000e+00> : vector<56x640xf32>
    %2 = tpu.matmul %0, %1, %cst {dimension_numbers = #tpu.dot_dimension_numbers<[1], [0], [0], [1], [0, 0, 1, 1], [], []>} : vector<56x400xbf16>, vector<400x640xbf16>, vector<56x640xf32> -> vector<56x640xf32>
    %c0_3 = arith.constant 0 : index
    %c0_4 = arith.constant 0 : index
    %3 = vector.load %arg2[%c0_3, %c0_4] : memref<56x400xbf16, #tpu.memory_space<vmem>>, vector<56x400xbf16>
    %c0_5 = arith.constant 0 : index
    %c0_6 = arith.constant 0 : index
    %4 = vector.load %arg5[%c0_5, %c0_6] : memref<400x640xbf16, #tpu.memory_space<vmem>>, vector<400x640xbf16>
    %cst_7 = arith.constant dense<0.000000e+00> : vector<56x640xf32>
    %5 = tpu.matmul %3, %4, %cst_7 {dimension_numbers = #tpu.dot_dimension_numbers<[1], [0], [0], [1], [0, 0, 1, 1], [], []>} : vector<56x400xbf16>, vector<400x640xbf16>, vector<56x640xf32> -> vector<56x640xf32>
    %6 = arith.addf %2, %5 : vector<56x640xf32>
    %c0_8 = arith.constant 0 : index
    %c0_9 = arith.constant 0 : index
    %7 = vector.load %arg3[%c0_8, %c0_9] : memref<56x400xbf16, #tpu.memory_space<vmem>>, vector<56x400xbf16>
    %c0_10 = arith.constant 0 : index
    %c0_11 = arith.constant 0 : index
    %8 = vector.load %arg6[%c0_10, %c0_11] : memref<400x640xbf16, #tpu.memory_space<vmem>>, vector<400x640xbf16>
    %cst_12 = arith.constant dense<0.000000e+00> : vector<56x640xf32>
    %9 = tpu.matmul %7, %8, %cst_12 {dimension_numbers = #tpu.dot_dimension_numbers<[1], [0], [0], [1], [0, 0, 1, 1], [], []>} : vector<56x400xbf16>, vector<400x640xbf16>, vector<56x640xf32> -> vector<56x640xf32>
    %10 = arith.addf %6, %9 : vector<56x640xf32>
    %c0_13 = arith.constant 0 : index
    %c0_14 = arith.constant 0 : index
    %11 = vector.load %arg7[%c0_13, %c0_14] : memref<1x640xf32, #tpu.memory_space<vmem>>, vector<1x640xf32>
    %12 = vector.broadcast %11 : vector<1x640xf32> to vector<56x640xf32>
    %13 = arith.addf %10, %12 : vector<56x640xf32>
    %cst_15 = arith.constant 0.000000e+00 : f32
    %14 = vector.broadcast %cst_15 : f32 to vector<56x640xf32>
    %15 = arith.cmpf ogt, %13, %14 : vector<56x640xf32>
    %cst_16 = arith.constant 2.000000e-01 : f32
    %16 = vector.broadcast %cst_16 : f32 to vector<56x640xf32>
    %17 = arith.mulf %16, %13 : vector<56x640xf32>
    %18 = arith.select %15, %13, %17 : vector<56x640xi1>, vector<56x640xf32>
    %19 = arith.truncf %18 : vector<56x640xf32> to vector<56x640xbf16>
    %c0_17 = arith.constant 0 : index
    %c0_18 = arith.constant 0 : index
    %20 = vector.load %arg8[%c0_17, %c0_18] : memref<640x512xbf16, #tpu.memory_space<vmem>>, vector<640x512xbf16>
    %cst_19 = arith.constant dense<0.000000e+00> : vector<56x512xf32>
    %21 = tpu.matmul %19, %20, %cst_19 {dimension_numbers = #tpu.dot_dimension_numbers<[1], [0], [0], [1], [0, 0, 1, 1], [], []>} : vector<56x640xbf16>, vector<640x512xbf16>, vector<56x512xf32> -> vector<56x512xf32>
    %c0_20 = arith.constant 0 : index
    %c0_21 = arith.constant 0 : index
    %22 = vector.load %arg9[%c0_20, %c0_21] : memref<1x512xf32, #tpu.memory_space<vmem>>, vector<1x512xf32>
    %23 = vector.broadcast %22 : vector<1x512xf32> to vector<56x512xf32>
    %24 = arith.addf %21, %23 : vector<56x512xf32>
    %c0_22 = arith.constant 0 : index
    %c0_23 = arith.constant 0 : index
    %25 = vector.load %arg10[%c0_22, %c0_23] : memref<56x512xf32, #tpu.memory_space<vmem>>, vector<56x512xf32>
    tpu.vector_store %arg10[%c0_22, %c0_23], %24 {strides = array<i32>} : memref<56x512xf32, #tpu.memory_space<vmem>>, vector<56x512xf32>,
    return
  }
  func.func @transform_0(%arg0: i32) -> (i32, i32) {
    %c0_i32 = arith.constant 0 : i32
    %c0_i32_0 = arith.constant 0 : i32
    return %arg0, %c0_i32 : i32, i32
  }
  func.func @transform_1(%arg0: i32) -> (i32, i32) {
    %c0_i32 = arith.constant 0 : i32
    %c0_i32_0 = arith.constant 0 : i32
    return %arg0, %c0_i32 : i32, i32
  }
  func.func @transform_2(%arg0: i32) -> (i32, i32) {
    %c0_i32 = arith.constant 0 : i32
    %c0_i32_0 = arith.constant 0 : i32
    return %arg0, %c0_i32 : i32, i32
  }
  func.func @transform_3(%arg0: i32) -> (i32, i32) {
    %c0_i32 = arith.constant 0 : i32
    %c0_i32_0 = arith.constant 0 : i32
    %c0_i32_1 = arith.constant 0 : i32
    return %c0_i32, %c0_i32_0 : i32, i32
  }
  func.func @transform_4(%arg0: i32) -> (i32, i32) {
    %c0_i32 = arith.constant 0 : i32
    %c0_i32_0 = arith.constant 0 : i32
    %c0_i32_1 = arith.constant 0 : i32
    return %c0_i32, %c0_i32_0 : i32, i32
  }
  func.func @transform_5(%arg0: i32) -> (i32, i32) {
    %c0_i32 = arith.constant 0 : i32
    %c0_i32_0 = arith.constant 0 : i32
    %c0_i32_1 = arith.constant 0 : i32
    return %c0_i32, %c0_i32_0 : i32, i32
  }
  func.func @transform_6(%arg0: i32) -> (i32, i32) {
    %c0_i32 = arith.constant 0 : i32
    %c0_i32_0 = arith.constant 0 : i32
    %c0_i32_1 = arith.constant 0 : i32
    return %c0_i32, %c0_i32_0 : i32, i32
  }
  func.func @transform_7(%arg0: i32) -> (i32, i32) {
    %c0_i32 = arith.constant 0 : i32
    %c0_i32_0 = arith.constant 0 : i32
    %c0_i32_1 = arith.constant 0 : i32
    return %c0_i32, %c0_i32_0 : i32, i32
  }
  func.func @transform_8(%arg0: i32) -> (i32, i32) {
    %c0_i32 = arith.constant 0 : i32
    %c0_i32_0 = arith.constant 0 : i32
    %c0_i32_1 = arith.constant 0 : i32
    return %c0_i32, %c0_i32_0 : i32, i32
  }
  func.func @transform_9(%arg0: i32) -> (i32, i32) {
    %c0_i32 = arith.constant 0 : i32
    %c0_i32_0 = arith.constant 0 : i32
    return %arg0, %c0_i32 : i32, i32
  }
}

</mosaic_0001>

<bundles_post_ra>
// kernel: tpu_custom_call.1
= control target key start
LH: loop header
LB: loop body
LE: loop exit
PB: predicated region body
PF: predicated region fallthrough
CT: control target
= control target key end

     0   :  { %14 = vsyncpa [#allocation3], 0  ;;  %s8463_s0 = inlined_call_operand.hbm [shape: bf16[56,400], index: 0, kind: input, shape index: {}]   ;;  %s8464_s1 = inlined_call_operand.hbm [shape: bf16[56,400], index: 1, kind: input, shape index: {}]   ;;  %s8465_s2 = inlined_call_operand.hbm [shape: bf16[56,400], index: 2, kind: input, shape index: {}]   ;;  %s8466_s3 = inlined_call_operand.hbm [shape: bf16[400,640], index: 3, kind: input, shape index: {}]   ;;  %s8467_s4 = inlined_call_operand.hbm [shape: bf16[400,640], index: 4, kind: input, shape index: {}]   ;;  %s8468_s5 = inlined_call_operand.hbm [shape: bf16[400,640], index: 5, kind: input, shape index: {}]   ;;  %s8469_s6 = inlined_call_operand.vmem [shape: f32[1,640], index: 6, kind: input, shape index: {}]   ;;  %s8470_s7 = inlined_call_operand.hbm [shape: bf16[640,512], index: 7, kind: input, shape index: {}]   ;;  %s8471_s8 = inlined_call_operand.vmem [shape: f32[1,512], index: 8, kind: input, shape index: {}]   ;;  %s8472_s9 = inlined_call_operand.hbm [shape: f32[56,512], index: 9, kind: output, shape index: {}]  }
   0x1   :  { %15 = vsyncpa [#allocation6], 0 }
   0x2   :  { %16 = vsyncpa [#allocation9], 0 }
   0x3   :  { %17 = vsyncpa [#allocation12], 0 }
   0x4   :  { %18 = vsyncpa [#allocation4], 0  ;;  %s7490_s30 = smov [#allocation5]   ;;  %s7491_s11 = smov [#allocation8]  }
   0x5   :  { %s36_s10 = sshll.u32 %s7490_s30, 4  ;;  %s60_s12 = sshll.u32 %s7491_s11, 4  ;;  %s37_s10 = int_to_ptr.vmem [resolvable:$true] %s36_s10  ;;  %s61_s12 = int_to_ptr.vmem [resolvable:$true] %s60_s12 }
   0x6   :  { %s7328_s13 = scalar_lea.vmem %s37_s10, 1792  ;;  %p7333_p1 = scmp.lt.s32.totalorder %s37_s10, %s37_s10 }
   0x7   :  { %p7329_p0 = scmp.ne.s32.totalorder %s37_s10, %s7328_s13  ;;  %p7334_p2 = scmp.lt.s32.totalorder %s7328_s13, %s7328_s13 }
   0x9   :  { %p7335_p3 = por %p7334_p2, %p7333_p1 }
   0xb   :  { %p7336_p4 = pnand %p7335_p3, %p7329_p0 }
   0xd   :  { %7339 = shalt.err (!%p7336_p4)
}
   0xe   :  { %s7492_s14 = smov 256   ;;  %s7493_s15 = smov 16  }
   0xf   :  { %42 = dma.hbm_to_vmem [thread:$0]  %s8464_s1, 1792, %s37_s10, [#allocation6], %s7492_s14, %s7492_s14, %s7493_s15  }
  0x10   :  { %s7348_s18 = scalar_lea.vmem %s61_s12, 16000  ;;  %p7353_p6 = scmp.lt.s32.totalorder %s61_s12, %s61_s12 }
  0x11   :  { %p7349_p5 = scmp.ne.s32.totalorder %s61_s12, %s7348_s18  ;;  %p7354_p7 = scmp.lt.s32.totalorder %s7348_s18, %s7348_s18 }
  0x13   :  { %p7355_p8 = por %p7354_p7, %p7353_p6 }
  0x15   :  { %p7356_p9 = pnand %p7355_p8, %p7349_p5 }
  0x17   :  { %7359 = shalt.err (!%p7356_p9)
}
  0x18   :  { %s7494_s19 = smov 320   ;;  %s7495_s20 = smov 20  }
  0x19   :  { %66 = dma.hbm_to_vmem [thread:$0]  %s8466_s3, 16000, %s61_s12, [#allocation9], %s7494_s19, %s7494_s19, %s7495_s20  }
  0x1a   :  { %s7496_s23 = smov [#allocation11]   ;;  %s7497_s25 = smov [#allocation2]  }
  0x1b   :  { %s84_s24 = sshll.u32 %s7496_s23, 4  ;;  %s24_s1 = sshll.u32 %s7497_s25, 4  ;;  %s85_s24 = int_to_ptr.vmem [resolvable:$true] %s84_s24  ;;  %s25_s1 = int_to_ptr.vmem [resolvable:$true] %s24_s1 }
  0x1c   :  { %s7368_s26 = scalar_lea.vmem %s85_s24, 16000  ;;  %p7373_p11 = scmp.lt.s32.totalorder %s85_s24, %s85_s24 }
  0x1d   :  { %p7369_p10 = scmp.ne.s32.totalorder %s85_s24, %s7368_s26  ;;  %p7374_p12 = scmp.lt.s32.totalorder %s7368_s26, %s7368_s26 }
  0x1f   :  { %p7375_p13 = por %p7374_p12, %p7373_p11 }
  0x21   :  { %p7376_p0 = pnand %p7375_p13, %p7369_p10 }
  0x23   :  { %7379 = shalt.err (!%p7376_p0)
}
  0x24   :  { %90 = dma.hbm_to_vmem [thread:$0]  %s8468_s5, 16000, %s85_s24, [#allocation12], %s7494_s19, %s7494_s19, %s7495_s20  }
  0x25   :  { %s7388_s3 = scalar_lea.vmem %s25_s1, 1792  ;;  %p7393_p2 = scmp.lt.s32.totalorder %s25_s1, %s25_s1 }
  0x26   :  { %p7389_p1 = scmp.ne.s32.totalorder %s25_s1, %s7388_s3  ;;  %p7394_p3 = scmp.lt.s32.totalorder %s7388_s3, %s7388_s3 }
  0x28   :  { %p7395_p4 = por %p7394_p3, %p7393_p2 }
  0x2a   :  { %p7396_p5 = pnand %p7395_p4, %p7389_p1 }
  0x2c   :  { %7399 = shalt.err (!%p7396_p5)
}
  0x2d   :  { %30 = dma.hbm_to_vmem [thread:$0]  %s8463_s0, 1792, %s25_s1, [#allocation3], %s7492_s14, %s7492_s14, %s7493_s15  }
  0x2e   :  { %s7498_s10 = smov [#allocation7]   ;;  %s7499_s12 = smov [#allocation10]  }
  0x2f   :  { %s48_s11 = sshll.u32 %s7498_s10, 4  ;;  %s72_s13 = sshll.u32 %s7499_s12, 4  ;;  %s49_s11 = int_to_ptr.vmem [resolvable:$true] %s48_s11  ;;  %s73_s13 = int_to_ptr.vmem [resolvable:$true] %s72_s13 }
  0x30   :  { %s7408_s5 = scalar_lea.vmem %s49_s11, 1792  ;;  %p7413_p7 = scmp.lt.s32.totalorder %s49_s11, %s49_s11 }
  0x31   :  { %p7409_p6 = scmp.ne.s32.totalorder %s49_s11, %s7408_s5  ;;  %p7414_p8 = scmp.lt.s32.totalorder %s7408_s5, %s7408_s5 }
  0x33   :  { %p7415_p9 = por %p7414_p8, %p7413_p7 }
  0x35   :  { %p7416_p10 = pnand %p7415_p9, %p7409_p6 }
  0x37   :  { %7419 = shalt.err (!%p7416_p10)
}
  0x38   :  { %54 = dma.hbm_to_vmem [thread:$0]  %s8465_s2, 1792, %s49_s11, [#allocation6], %s7492_s14, %s7492_s14, %s7493_s15  }
  0x39   :  { %s7428_s0 = scalar_lea.vmem %s73_s13, 16000  ;;  %p7433_p12 = scmp.lt.s32.totalorder %s73_s13, %s73_s13 }
  0x3a   :  { %p7429_p11 = scmp.ne.s32.totalorder %s73_s13, %s7428_s0  ;;  %p7434_p13 = scmp.lt.s32.totalorder %s7428_s0, %s7428_s0 }
  0x3c   :  { %p7435_p0 = por %p7434_p13, %p7433_p12 }
  0x3e   :  { %p7436_p1 = pnand %p7435_p0, %p7429_p11 }
  0x40   :  { %7439 = shalt.err (!%p7436_p1)
}
  0x41   :  { %78 = dma.hbm_to_vmem [thread:$0]  %s8467_s4, 16000, %s73_s13, [#allocation9], %s7494_s19, %s7494_s19, %s7495_s20  }
  0x42   :  { %s7500_s22 = smov [#allocation13]  }
  0x43   :  { %s98_s23 = sshll.u32 %s7500_s22, 4  ;;  %s99_s23 = int_to_ptr.vmem [resolvable:$true] %s98_s23 }
  0x44   :  { %s7448_s24 = scalar_lea.vmem %s99_s23, 20480  ;;  %p7453_p3 = scmp.lt.s32.totalorder %s99_s23, %s99_s23 }
  0x45   :  { %p7449_p2 = scmp.ne.s32.totalorder %s99_s23, %s7448_s24  ;;  %p7454_p4 = scmp.lt.s32.totalorder %s7448_s24, %s7448_s24 }
  0x47   :  { %p7455_p5 = por %p7454_p4, %p7453_p3 }
  0x49   :  { %p7456_p6 = pnand %p7455_p5, %p7449_p2 }
  0x4b   :  { %7459 = shalt.err (!%p7456_p6)
}
  0x4c   :  { %104 = dma.hbm_to_vmem [thread:$0]  %s8470_s7, 20480, %s99_s23, [#allocation12], %s7492_s14, %s7492_s14, %s7493_s15  }
  0x4d   :  { %7480 = dma.done.wait [#allocation3], 1792  }
  0x4e   :  { %7481 = vsyncadd [#allocation3], 4294965504 }
  0x4f   :  { %7482 = dma.done.wait [#allocation6], 3584  }
  0x50   :  { %7483 = vsyncadd [#allocation6], 4294963712 }
  0x51   :  { %7484 = dma.done.wait [#allocation9], 32000  }
  0x52   :  { %7485 = vsyncadd [#allocation9], 4294935296 }
  0x53   :  { %7486 = dma.done.wait [#allocation12], 36480  }
  0x54   :  { %7487 = vsyncadd [#allocation12], 4294930816  ;;  %v6486_v0 = vld [vmem:[#allocation10 + $0x11c] ss:$20 sps:$4 sm:$0xff]   ;;  %v6490_v2 = vld [vmem:[#allocation10 + $0x118] ss:$20 sps:$4 sm:$0xff]  }
  0x55   :  { %v6488_v1 = vld [vmem:[#allocation10 + $0x39c] ss:$20 sps:$4 sm:$0xff]   ;;  %1190 = vmatprep.subr.bf16.mxu0 %v6486_v0  ;;  %v6491_v3 = vld [vmem:[#allocation10 + $0x398] ss:$20 sps:$4 sm:$0xff]   ;;  %v6492_v4 = vld [vmem:[#allocation10 + $0xf4] ss:$20 sps:$4 sm:$0xff]  }
  0x56   :  { %1261 = vmatprep.subr.bf16.mxu1 %v6488_v1  ;;  %1191 = vmatpush1.bf16.msra.mxu0 %v6490_v2  ;;  %v6494_v5 = vld [vmem:[#allocation10 + $0x374] ss:$20 sps:$4 sm:$0xff]   ;;  %v6496_v6 = vld [vmem:[#allocation10 + $0xf0] ss:$20 sps:$4 sm:$0xff]   ;;  %v6498_v8 = vld [vmem:[#allocation10 + $0xcc] ss:$20 sps:$4 sm:$0xff]  }
  0x57   :  { %1262 = vmatpush1.bf16.msra.mxu1 %v6491_v3  ;;  %1192 = vmatprep.subr.bf16.mxu0 %v6492_v4  ;;  %v6497_v7 = vld [vmem:[#allocation10 + $0x370] ss:$20 sps:$4 sm:$0xff]   ;;  %v6500_v9 = vld [vmem:[#allocation10 + $0x34c] ss:$20 sps:$4 sm:$0xff]   ;;  %v6502_v10 = vld [vmem:[#allocation10 + $0xc8] ss:$20 sps:$4 sm:$0xff]  }
  0x58   :  { %1263 = vmatprep.subr.bf16.mxu1 %v6494_v5  ;;  %v6503_v11 = vld [vmem:[#allocation10 + $0x348] ss:$20 sps:$4 sm:$0xff]   ;;  %v6504_v12 = vld [vmem:[#allocation10 + $0xa4] ss:$20 sps:$4 sm:$0xff]   ;;  %v6508_v14 = vld [vmem:[#allocation10 + $0xa0] ss:$20 sps:$4 sm:$0xff]  }
  0x59   :  { %v6506_v13 = vld [vmem:[#allocation10 + $0x324] ss:$20 sps:$4 sm:$0xff]   ;;  %v6509_v15 = vld [vmem:[#allocation10 + $0x320] ss:$20 sps:$4 sm:$0xff]   ;;  %v6510_v16 = vld [vmem:[#allocation10 + $0x7c] ss:$20 sps:$4 sm:$0xff]  }
  0x5a   :  { %1193 = vmatpush1.bf16.msra.mxu0 %v6496_v6  ;;  %v6512_v17 = vld [vmem:[#allocation10 + $0x2fc] ss:$20 sps:$4 sm:$0xff]   ;;  %v6514_v18 = vld [vmem:[#allocation10 + $0x78] ss:$20 sps:$4 sm:$0xff]   ;;  %v6516_v20 = vld [vmem:[#allocation10 + $0x54] ss:$20 sps:$4 sm:$0xff]  }
  0x5b   :  { %1264 = vmatpush1.bf16.msra.mxu1 %v6497_v7  ;;  %1194 = vmatprep.subr.bf16.mxu0 %v6498_v8  ;;  %v6515_v19 = vld [vmem:[#allocation10 + $0x2f8] ss:$20 sps:$4 sm:$0xff]   ;;  %v6518_v21 = vld [vmem:[#allocation10 + $0x2d4] ss:$20 sps:$4 sm:$0xff]   ;;  %v6520_v22 = vld [vmem:[#allocation10 + $0x50] ss:$20 sps:$4 sm:$0xff]  }
  0x5c   :  { %1265 = vmatprep.subr.bf16.mxu1 %v6500_v9  ;;  %v6521_v23 = vld [vmem:[#allocation10 + $0x2d0] ss:$20 sps:$4 sm:$0xff]   ;;  %v6522_v24 = vld [vmem:[#allocation10 + $0x2c] ss:$20 sps:$4 sm:$0xff]   ;;  %vm1177_vm0 = vcmask 130048  }
  0x5d   :  { %v6524_v25 = vld [vmem:[#allocation10 + $0x2ac] ss:$20 sps:$4 sm:$0xff]   ;;  %v6526_v26 = vld [vmem:[#allocation10 + $0x28] ss:$20 sps:$4 sm:$0xff]   ;;  %v6528_v28 = vld [vmem:[#allocation10 + $0x4] ss:$20 sps:$4 sm:$0xff]  }
  0x5e   :  { %1195 = vmatpush1.bf16.msra.mxu0 %v6502_v10  ;;  %v6527_v27 = vld [vmem:[#allocation10 + $0x2a8] ss:$20 sps:$4 sm:$0xff]   ;;  %v7597_v29 = vld [vmem:[#allocation5 + $0xc] ss:$16 sps:$4 sm:$0xff]   ;;  %v6538_v35 = vld [vmem:[#allocation10 + $0x258] ss:$20 sps:$4 sm:$0xff]  }
  0x5f   :  { %1266 = vmatpush1.bf16.msra.mxu1 %v6503_v11  ;;  %1196 = vmatprep.subr.bf16.mxu0 %v6504_v12  ;;  %v6530_v30 = vld [vmem:[#allocation10 + $0x284] ss:$20 sps:$4 sm:$0xff]   ;;  %v6532_v31 = vld [vmem:[#allocation10] ss:$20 sps:$4 sm:$0xff]   ;;  %v6534_v33 = vld [vmem:[#allocation10 + $0x25c] ss:$20 sps:$4 sm:$0xff]  }
  0x60   :  { %1267 = vmatprep.subr.bf16.mxu1 %v6506_v13  ;;  %5873 = vmatprep.mubr.msk.bf16.mxu1 %vm1177_vm0, %v7597_v29  ;;  %v6533_v32 = vld [vmem:[#allocation10 + $0x280] ss:$20 sps:$4 sm:$0xff]   ;;  %v6536_v34 = vld [vmem:[#allocation10 + $0x3c4] ss:$20 sps:$4 sm:$0xff]   ;;  %v6553_v43 = vld [vmem:[#allocation10 + $0xfc] ss:$20 sps:$4 sm:$0xff]  }
  0x61   :  { %v6539_v36 = vld [vmem:[#allocation10 + $0x3c0] ss:$20 sps:$4 sm:$0xff]   ;;  %v6547_v38 = vld [vmem:[#allocation10 + $0x124] ss:$20 sps:$4 sm:$0xff]   ;;  %v6554_v45 = vld [vmem:[#allocation10 + $0x208] ss:$20 sps:$4 sm:$0xff]  }
  0x62   :  { %1197 = vmatpush1.bf16.msra.mxu0 %v6508_v14  ;;  %v6542_v37 = vld [vmem:[#allocation10 + $0x234] ss:$20 sps:$4 sm:$0xff]   ;;  %v7601_v39 = vld [vmem:[#allocation5 + $0x8] ss:$16 sps:$4 sm:$0xff]   ;;  %v6551_v44 = vld [vmem:[#allocation10 + $0xf8] ss:$20 sps:$4 sm:$0xff]  }
  0x63   :  { %1268 = vmatpush1.bf16.msra.mxu1 %v6509_v15  ;;  %1198 = vmatprep.subr.bf16.mxu0 %v6510_v16  ;;  %v6545_v40 = vld [vmem:[#allocation10 + $0x120] ss:$20 sps:$4 sm:$0xff]   ;;  %v6548_v41 = vld [vmem:[#allocation10 + $0x230] ss:$20 sps:$4 sm:$0xff]   ;;  %v7604_v51 = vld [vmem:[#allocation5 + $0x4] ss:$16 sps:$4 sm:$0xff]  }
  0x64   :  { %1269 = vmatprep.subr.bf16.mxu1 %v6512_v17  ;;  %v6549_v42 = vld [vmem:[#allocation10 + $0x20c] ss:$20 sps:$4 sm:$0xff]   ;;  %v6555_v46 = vld [vmem:[#allocation10 + $0x1e4] ss:$20 sps:$4 sm:$0xff]   ;;  %v6559_v47 = vld [vmem:[#allocation10 + $0xd4] ss:$20 sps:$4 sm:$0xff]   ;;  %1222 = vmatprep.mubr.bf16.mxu0 %v7604_v51 }
  0x65   :  { %v6557_v48 = vld [vmem:[#allocation10 + $0xd0] ss:$20 sps:$4 sm:$0xff]   ;;  %v6560_v49 = vld [vmem:[#allocation10 + $0x1e0] ss:$20 sps:$4 sm:$0xff]   ;;  %v6563_v53 = vld [vmem:[#allocation10 + $0xa8] ss:$20 sps:$4 sm:$0xff]  }
  0x66   :  { %1199 = vmatpush1.bf16.msra.mxu0 %v6514_v18  ;;  %v6561_v50 = vld [vmem:[#allocation10 + $0x1bc] ss:$20 sps:$4 sm:$0xff]   ;;  %v6565_v52 = vld [vmem:[#allocation10 + $0xac] ss:$20 sps:$4 sm:$0xff]   ;;  %v6567_v55 = vld [vmem:[#allocation10 + $0x194] ss:$20 sps:$4 sm:$0xff]  }
  0x67   :  { %1270 = vmatpush1.bf16.msra.mxu1 %v6515_v19  ;;  %1200 = vmatprep.subr.bf16.mxu0 %v6516_v20  ;;  %v6566_v54 = vld [vmem:[#allocation10 + $0x1b8] ss:$20 sps:$4 sm:$0xff]   ;;  %v6569_v57 = vld [vmem:[#allocation10 + $0x80] ss:$20 sps:$4 sm:$0xff]   ;;  %v6572_v58 = vld [vmem:[#allocation10 + $0x190] ss:$20 sps:$4 sm:$0xff]  }
  0x68   :  { %1271 = vmatprep.subr.bf16.mxu1 %v6518_v21  ;;  %v6571_v56 = vld [vmem:[#allocation10 + $0x84] ss:$20 sps:$4 sm:$0xff]   ;;  %v6573_v60 = vld [vmem:[#allocation10 + $0x16c] ss:$20 sps:$4 sm:$0xff]   ;;  %v6577_v62 = vld [vmem:[#allocation10 + $0x5c] ss:$20 sps:$4 sm:$0xff]  }
  0x69   :  { %v7607_v59 = vld [vmem:[#allocation5 + $0x2c] ss:$16 sps:$4 sm:$0xff]   ;;  %v7609_v61 = vld [vmem:[#allocation5 + $0x28] ss:$16 sps:$4 sm:$0xff]   ;;  %v6575_v63 = vld [vmem:[#allocation10 + $0x58] ss:$20 sps:$4 sm:$0xff]  }
  0x6a   :  { %1201 = vmatpush1.bf16.msra.mxu0 %v6520_v22  ;;  %v6578_v0 = vld [vmem:[#allocation10 + $0x168] ss:$20 sps:$4 sm:$0xff]   ;;  %v6579_v1 = vld [vmem:[#allocation10 + $0x144] ss:$20 sps:$4 sm:$0xff]   ;;  %v6584_v4 = vld [vmem:[#allocation10 + $0x140] ss:$20 sps:$4 sm:$0xff]  }
  0x6b   :  { %1272 = vmatpush1.bf16.msra.mxu1 %v6521_v23  ;;  %1202 = vmatprep.subr.bf16.mxu0 %v6522_v24  ;;  %v6583_v2 = vld [vmem:[#allocation10 + $0x34] ss:$20 sps:$4 sm:$0xff]   ;;  %v6581_v3 = vld [vmem:[#allocation10 + $0x30] ss:$20 sps:$4 sm:$0xff]   ;;  %v6590_v6 = vld [vmem:[#allocation10 + $0xc] ss:$20 sps:$4 sm:$0xff]  }
  0x6c   :  { %1273 = vmatprep.subr.bf16.mxu1 %v6524_v25  ;;  %v7614_v5 = vld [vmem:[#allocation5 + $0x4c] ss:$16 sps:$4 sm:$0xff]   ;;  %v7616_v7 = vld [vmem:[#allocation5 + $0x48] ss:$16 sps:$4 sm:$0xff]   ;;  %v7618_v9 = vld [vmem:[#allocation5] ss:$16 sps:$4 sm:$0xff]  }
  0x6d   :  { %v6593_v8 = vld [vmem:[#allocation10 + $0x3a4] ss:$20 sps:$4 sm:$0xff]   ;;  %v6588_v10 = vld [vmem:[#allocation10 + $0x8] ss:$20 sps:$4 sm:$0xff]   ;;  %v6591_v11 = vld [vmem:[#allocation10 + $0x3a0] ss:$20 sps:$4 sm:$0xff]  }
  0x6e   :  { %1203 = vmatpush1.bf16.msra.mxu0 %v6526_v26  ;;  %v6596_v12 = vld [vmem:[#allocation10 + $0x264] ss:$20 sps:$4 sm:$0xff]   ;;  %v6599_v13 = vld [vmem:[#allocation10 + $0x37c] ss:$20 sps:$4 sm:$0xff]   ;;  %v6594_v16 = vld [vmem:[#allocation10 + $0x260] ss:$20 sps:$4 sm:$0xff]  }
  0x6f   :  { %1274 = vmatpush1.bf16.msra.mxu1 %v6527_v27  ;;  %1204 = vmatprep.subr.bf16.mxu0 %v6528_v28  ;;  %v7623_v14 = vld [vmem:[#allocation5 + $0x24] ss:$16 sps:$4 sm:$0xff]   ;;  %v306_v15 = vld [vmem:[#allocation5 + $0x68] sm:$0xff]  ;;  %v6611_v21 = vld [vmem:[#allocation10 + $0x354] ss:$20 sps:$4 sm:$0xff]  }
  0x70   :  { %1275 = vmatprep.subr.bf16.mxu1 %v6530_v30  ;;  %v7626_v17 = vcombine.high %v306_v15, %v306_v15  ;;  %v7628_v18 = vcombine.low %v306_v15, %v306_v15  ;;  %v6597_v19 = vld [vmem:[#allocation10 + $0x378] ss:$20 sps:$4 sm:$0xff]   ;;  %v6608_v20 = vld [vmem:[#allocation10 + $0x23c] ss:$20 sps:$4 sm:$0xff]   ;;  %v6614_v25 = vld [vmem:[#allocation10 + $0x214] ss:$20 sps:$4 sm:$0xff]  }
  0x71   :  { %v7633_v22 = vld [vmem:[#allocation5 + $0x20] ss:$16 sps:$4 sm:$0xff]   ;;  %v6609_v24 = vld [vmem:[#allocation10 + $0x350] ss:$20 sps:$4 sm:$0xff]   ;;  %v6617_v26 = vld [vmem:[#allocation10 + $0x32c] ss:$20 sps:$4 sm:$0xff]  }
  0x72   :  { %1205 = vmatpush1.bf16.msra.mxu0 %v6532_v31  ;;  %v6606_v23 = vld [vmem:[#allocation10 + $0x238] ss:$20 sps:$4 sm:$0xff]   ;;  %v6612_v27 = vld [vmem:[#allocation10 + $0x210] ss:$20 sps:$4 sm:$0xff]   ;;  %v6615_v30 = vld [vmem:[#allocation10 + $0x328] ss:$20 sps:$4 sm:$0xff]  }
  0x73   :  { %1276 = vmatpush1.bf16.msra.mxu1 %v6533_v32  ;;  %1206 = vmatprep.subr.bf16.mxu0 %v6534_v33  ;;  %v7636_v28 = vld [vmem:[#allocation5 + $0x44] ss:$16 sps:$4 sm:$0xff]   ;;  %v7640_v32 = vld [vmem:[#allocation5 + $0x40] ss:$16 sps:$4 sm:$0xff]   ;;  %v6673_v15 = vld [vmem:[#allocation10 + $0x1a0] ss:$20 sps:$4 sm:$0xff]  }
  0x74   :  { %1291 = vmatprep.subr.bf16.mxu1 %v6536_v34  ;;  %v6626_v31 = vld [vmem:[#allocation10 + $0x1ec] ss:$20 sps:$4 sm:$0xff]   ;;  %v6629_v33 = vld [vmem:[#allocation10 + $0x304] ss:$20 sps:$4 sm:$0xff]   ;;  %v6624_v34 = vld [vmem:[#allocation10 + $0x1e8] ss:$20 sps:$4 sm:$0xff]  }
  0x76   :  { %1207 = vmatpush2.bf16.msra.mxu0 %v6538_v35  ;;  %v6627_v35 = vld [vmem:[#allocation10 + $0x300] ss:$20 sps:$4 sm:$0xff]  }
  0x77   :  { %1292 = vmatpush2.bf16.msra.mxu1 %v6539_v36  ;;  %1208 = vmatprep.subr.bf16.mxu0 %v6542_v37  ;;  %v305_v36 = vld [vmem:[#allocation5 + $0x60] sm:$0xff] }
  0x78   :  { %1332 = vmatprep.subr.bf16.mxu1 %v6547_v38  ;;  %v6632_v37 = vld [vmem:[#allocation10 + $0x1c4] ss:$20 sps:$4 sm:$0xff]   ;;  %v6635_v38 = vld [vmem:[#allocation10 + $0x2dc] ss:$20 sps:$4 sm:$0xff]  }
  0x7a   :  { %1294 = vmatmul.mubr.bf16.vlgmr.msra.gmra.mxu1 %v7601_v39  ;;  %1209 = vmatpush2.bf16.msra.mxu0 %v6548_v41  ;;  %v7643_v41 = vcombine.high %v305_v36, %v305_v36 }
  0x7b   :  { %1333 = vmatpush1.bf16.msra.mxu1 %v6545_v40  ;;  %1210 = vmatprep.subr.bf16.mxu0 %v6549_v42  ;;  %v6630_v40 = vld [vmem:[#allocation10 + $0x1c0] ss:$20 sps:$4 sm:$0xff]   ;;  %v6633_v42 = vld [vmem:[#allocation10 + $0x2d8] ss:$20 sps:$4 sm:$0xff]  }
  0x7c   :  { %1334 = vmatprep.subr.bf16.mxu1 %v6553_v43  ;;  %5874 = vmatprep.mubr.msk.bf16.mxu1 %vm1177_vm0, %v7607_v59  ;;  %v6640_v43 = vld [vmem:[#allocation10 + $0x19c] ss:$20 sps:$4 sm:$0xff]  }
  0x7e   :  { %1211 = vmatpush2.bf16.msra.mxu0 %v6554_v45  ;;  %v6638_v45 = vld [vmem:[#allocation10 + $0x198] ss:$20 sps:$4 sm:$0xff]  }
  0x7f   :  { %1335 = vmatpush1.bf16.msra.mxu1 %v6551_v44  ;;  %1212 = vmatprep.subr.bf16.mxu0 %v6555_v46  ;;  %v6643_v44 = vld [vmem:[#allocation10 + $0x2b4] ss:$20 sps:$4 sm:$0xff]   ;;  %v6641_v46 = vld [vmem:[#allocation10 + $0x2b0] ss:$20 sps:$4 sm:$0xff]  }
  0x80   :  { %1336 = vmatprep.subr.bf16.mxu1 %v6559_v47  ;;  %v7647_v47 = vcombine.low %v305_v36, %v305_v36  ;;  %v6689_v36 = vld [vmem:[#allocation8 + $0x398] ss:$20 sps:$4 sm:$0xff]  }
  0x82   :  { %1213 = vmatpush2.bf16.msra.mxu0 %v6560_v49  ;;  %1304 = vmatmul.mubr.bf16.gmra.mxu1 %v7609_v61  ;;  %v6651_v49 = vld [vmem:[#allocation10 + $0x28c] ss:$20 sps:$4 sm:$0xff]  }
  0x83   :  { %1337 = vmatpush1.bf16.msra.mxu1 %v6557_v48  ;;  %1214 = vmatprep.subr.bf16.mxu0 %v6561_v50  ;;  %v6648_v48 = vld [vmem:[#allocation10 + $0x174] ss:$20 sps:$4 sm:$0xff]   ;;  %v6646_v50 = vld [vmem:[#allocation10 + $0x170] ss:$20 sps:$4 sm:$0xff]  }
  0x84   :  { %1338 = vmatprep.subr.bf16.mxu1 %v6565_v52  ;;  %5875 = vmatprep.mubr.msk.bf16.mxu1 %vm1177_vm0, %v7614_v5  ;;  %v6649_v52 = vld [vmem:[#allocation10 + $0x288] ss:$20 sps:$4 sm:$0xff]  }
  0x86   :  { %1215 = vmatpush2.bf16.msra.mxu0 %v6566_v54  ;;  %v6657_v54 = vld [vmem:[#allocation10 + $0x3cc] ss:$20 sps:$4 sm:$0xff]  }
  0x87   :  { %1339 = vmatpush1.bf16.msra.mxu1 %v6563_v53  ;;  %1216 = vmatprep.subr.bf16.mxu0 %v6567_v55  ;;  %v6654_v53 = vld [vmem:[#allocation10 + $0x14c] ss:$20 sps:$4 sm:$0xff]   ;;  %v6652_v55 = vld [vmem:[#allocation10 + $0x148] ss:$20 sps:$4 sm:$0xff]  }
  0x88   :  { %1340 = vmatprep.subr.bf16.mxu1 %v6571_v56  ;;  %v6655_v56 = vld [vmem:[#allocation10 + $0x3c8] ss:$20 sps:$4 sm:$0xff]  }
  0x8a   :  { %1217 = vmatpush2.bf16.msra.mxu0 %v6572_v58  ;;  %1314 = vmatmul.mubr.bf16.gmra.mxu1 %v7616_v7  ;;  %v6659_v58 = vld [vmem:[#allocation10 + $0x128] ss:$20 sps:$4 sm:$0xff]  }
  0x8b   :  { %1341 = vmatpush1.bf16.msra.mxu1 %v6569_v57  ;;  %1218 = vmatprep.subr.bf16.mxu0 %v6573_v60  ;;  %v6658_v57 = vld [vmem:[#allocation10 + $0x268] ss:$20 sps:$4 sm:$0xff]  }
  0x8c   :  { %1342 = vmatprep.subr.bf16.mxu1 %v6577_v62  ;;  %5876 = vmatprep.mubr.msk.bf16.mxu1 %vm1177_vm0, %v7626_v17  ;;  %v6660_v60 = vld [vmem:[#allocation10 + $0x3a8] ss:$20 sps:$4 sm:$0xff]   ;;  %v8473_v62 = vmov 0  }
  0x8e   :  { %1219 = vmatpush2.bf16.msra.mxu0 %v6578_v0  ;;  %v6662_v0 = vld [vmem:[#allocation10 + $0x100] ss:$20 sps:$4 sm:$0xff]  }
  0x8f   :  { %1343 = vmatpush1.bf16.msra.mxu1 %v6575_v63  ;;  %1220 = vmatprep.subr.bf16.mxu0 %v6579_v1  ;;  %v6661_v63 = vld [vmem:[#allocation10 + $0x240] ss:$20 sps:$4 sm:$0xff]  }
  0x90   :  { %1344 = vmatprep.subr.bf16.mxu1 %v6583_v2  ;;  %v6663_v1 = vld [vmem:[#allocation10 + $0x380] ss:$20 sps:$4 sm:$0xff]   ;;  %v6664_v2 = vld [vmem:[#allocation10 + $0x218] ss:$20 sps:$4 sm:$0xff]  }
  0x92   :  { %1221 = vmatpush2.bf16.msra.mxu0 %v6584_v4  ;;  %1324 = vmatmul.mubr.bf16.gmra.mxu1 %v7628_v18  ;;  %v6666_v4 = vld [vmem:[#allocation10 + $0x358] ss:$20 sps:$4 sm:$0xff]  }
  0x93   :  { %1345 = vmatpush1.bf16.msra.mxu1 %v6581_v3  ;;  %1403 = vmatprep.subr.bf16.mxu0 %v6593_v8  ;;  %v6665_v3 = vld [vmem:[#allocation10 + $0xd8] ss:$20 sps:$4 sm:$0xff]   ;;  %v6668_v8 = vld [vmem:[#allocation10 + $0xb0] ss:$20 sps:$4 sm:$0xff]  }
  0x94   :  { %1346 = vmatprep.subr.bf16.mxu1 %v6590_v6  ;;  %1364 = vmatprep.mubr.bf16.mxu1 %v7604_v51  ;;  %v6667_v6 = vld [vmem:[#allocation10 + $0x1f0] ss:$20 sps:$4 sm:$0xff]  }
  0x95   :  { %1223 = vmatmul.mubr.bf16.vlgmr.msra.gmra.mxu0 %v7618_v9 }
  0x96   :  { %1404 = vmatpush1.bf16.msra.mxu0 %v6591_v11  ;;  %1232 = vmatprep.mubr.bf16.mxu0 %v7623_v14  ;;  %v6670_v11 = vld [vmem:[#allocation10 + $0x1c8] ss:$20 sps:$4 sm:$0xff]  }
  0x97   :  { %1347 = vmatpush1.bf16.msra.mxu1 %v6588_v10  ;;  %1405 = vmatprep.subr.bf16.mxu0 %v6599_v13  ;;  %v6669_v10 = vld [vmem:[#allocation10 + $0x330] ss:$20 sps:$4 sm:$0xff]   ;;  %v6672_v13 = vld [vmem:[#allocation10 + $0x308] ss:$20 sps:$4 sm:$0xff]  }
  0x98   :  { %1348 = vmatprep.subr.bf16.mxu1 %v6596_v12  ;;  %v6671_v12 = vld [vmem:[#allocation10 + $0x88] ss:$20 sps:$4 sm:$0xff]  }
  0x9a   :  { %1406 = vmatpush1.bf16.msra.mxu0 %v6597_v19  ;;  %v6675_v19 = vld [vmem:[#allocation10 + $0x2e0] ss:$20 sps:$4 sm:$0xff]  }
  0x9b   :  { %1349 = vmatpush2.bf16.msra.mxu1 %v6594_v16  ;;  %1407 = vmatprep.subr.bf16.mxu0 %v6611_v21  ;;  %v6674_v16 = vld [vmem:[#allocation10 + $0x60] ss:$20 sps:$4 sm:$0xff]   ;;  %v6677_v21 = vld [vmem:[#allocation10 + $0x38] ss:$20 sps:$4 sm:$0xff]  }
  0x9c   :  { %1350 = vmatprep.subr.bf16.mxu1 %v6608_v20  ;;  %v6676_v20 = vld [vmem:[#allocation10 + $0x178] ss:$20 sps:$4 sm:$0xff]  }
  0x9d   :  { %1233 = vmatmul.mubr.bf16.gmra.mxu0 %v7633_v22 }
  0x9e   :  { %1408 = vmatpush1.bf16.msra.mxu0 %v6609_v24  ;;  %1242 = vmatprep.mubr.bf16.mxu0 %v7636_v28  ;;  %v6679_v24 = vld [vmem:[#allocation10 + $0x150] ss:$20 sps:$4 sm:$0xff]  }
  0x9f   :  { %1351 = vmatpush2.bf16.msra.mxu1 %v6606_v23  ;;  %1409 = vmatprep.subr.bf16.mxu0 %v6617_v26  ;;  %v6678_v23 = vld [vmem:[#allocation10 + $0x2b8] ss:$20 sps:$4 sm:$0xff]   ;;  %v6681_v26 = vld [vmem:[#allocation10 + $0x290] ss:$20 sps:$4 sm:$0xff]  }
  0xa0   :  { %1352 = vmatprep.subr.bf16.mxu1 %v6614_v25  ;;  %v6680_v25 = vld [vmem:[#allocation10 + $0x10] ss:$20 sps:$4 sm:$0xff]  }
  0xa2   :  { %1410 = vmatpush1.bf16.msra.mxu0 %v6615_v30  ;;  %v6682_v30 = vld [vmem:[#allocation8 + $0x118] ss:$20 sps:$4 sm:$0xff]  }
  0xa3   :  { %1353 = vmatpush2.bf16.msra.mxu1 %v6612_v27  ;;  %1411 = vmatprep.subr.bf16.mxu0 %v6629_v33  ;;  %v6684_v27 = vld [vmem:[#allocation8 + $0x11c] ss:$20 sps:$4 sm:$0xff]   ;;  %v6688_v33 = vld [vmem:[#allocation8 + $0xf4] ss:$20 sps:$4 sm:$0xff]  }
  0xa4   :  { %1354 = vmatprep.subr.bf16.mxu1 %v6626_v31  ;;  %v6685_v31 = vld [vmem:[#allocation10 + $0x3d0] ss:$20 sps:$4 sm:$0xff]  }
  0xa5   :  { %1243 = vmatmul.mubr.bf16.gmra.mxu0 %v7640_v32 }
  0xa6   :  { %1412 = vmatpush1.bf16.msra.mxu0 %v6627_v35  ;;  %1252 = vmatprep.mubr.bf16.mxu0 %v7643_v41  ;;  %v6686_v35 = vld [vmem:[#allocation8 + $0xf0] ss:$20 sps:$4 sm:$0xff]  }
  0xa7   :  { %1355 = vmatpush2.bf16.msra.mxu1 %v6624_v34  ;;  %1413 = vmatprep.subr.bf16.mxu0 %v6635_v38  ;;  %v6691_v34 = vld [vmem:[#allocation8 + $0x39c] ss:$20 sps:$4 sm:$0xff]  }
  0xa8   :  { %1356 = vmatprep.subr.bf16.mxu1 %v6632_v37  ;;  %v6697_v37 = vld [vmem:[#allocation8 + $0x374] ss:$20 sps:$4 sm:$0xff]   ;;  %v6695_v38 = vld [vmem:[#allocation8 + $0x370] ss:$20 sps:$4 sm:$0xff]  }
  0xaa   :  { %1414 = vmatpush1.bf16.msra.mxu0 %v6633_v42  ;;  %v6698_v42 = vld [vmem:[#allocation8 + $0xa0] ss:$20 sps:$4 sm:$0xff]  }
  0xab   :  { %1357 = vmatpush2.bf16.msra.mxu1 %v6630_v40  ;;  %1415 = vmatprep.subr.bf16.mxu0 %v6643_v44  ;;  %v6700_v40 = vld [vmem:[#allocation8 + $0xa4] ss:$20 sps:$4 sm:$0xff]  }
  0xac   :  { %1358 = vmatprep.subr.bf16.mxu1 %v6640_v43  ;;  %v6701_v43 = vld [vmem:[#allocation8 + $0x348] ss:$20 sps:$4 sm:$0xff]   ;;  %v6704_v44 = vld [vmem:[#allocation8 + $0x78] ss:$20 sps:$4 sm:$0xff]  }
  0xad   :  { %1253 = vmatmul.mubr.bf16.gmra.mxu0 %v7647_v47 }
  0xae   :  { %1416 = vmatpush1.bf16.msra.mxu0 %v6641_v46  ;;  %5877 = vmatprep.mubr.msk.bf16.mxu0 %vm1177_vm0, %v7597_v29  ;;  %v6710_v46 = vld [vmem:[#allocation8 + $0x50] ss:$20 sps:$4 sm:$0xff]  }
  0xaf   :  { %1359 = vmatpush2.bf16.msra.mxu1 %v6638_v45  ;;  %1417 = vmatprep.subr.bf16.mxu0 %v6651_v49  ;;  %v6707_v45 = vld [vmem:[#allocation8 + $0x320] ss:$20 sps:$4 sm:$0xff]   ;;  %v6716_v49 = vld [vmem:[#allocation8 + $0x28] ss:$20 sps:$4 sm:$0xff]  }
  0xb0   :  { %1360 = vmatprep.subr.bf16.mxu1 %v6648_v48  ;;  %v6713_v48 = vld [vmem:[#allocation8 + $0x2f8] ss:$20 sps:$4 sm:$0xff]  }
  0xb2   :  { %1418 = vmatpush1.bf16.msra.mxu0 %v6649_v52  ;;  %v7696_v52 = vld [vmem:[#allocation2 + $0x4] ss:$16 sps:$4 sm:$0xff]  }
  0xb3   :  { %1361 = vmatpush2.bf16.msra.mxu1 %v6646_v50  ;;  %1433 = vmatprep.subr.bf16.mxu0 %v6657_v54  ;;  %v6719_v50 = vld [vmem:[#allocation8 + $0x2d0] ss:$20 sps:$4 sm:$0xff]  }
  0xb4   :  { %1362 = vmatprep.subr.bf16.mxu1 %v6654_v53  ;;  %v6722_v53 = vld [vmem:[#allocation8] ss:$20 sps:$4 sm:$0xff]   ;;  %v6733_v54 = vld [vmem:[#allocation8 + $0x284] ss:$20 sps:$4 sm:$0xff]  }
  0xb6   :  { %1434 = vmatpush2.bf16.msra.mxu0 %v6655_v56  ;;  %v6728_v56 = vld [vmem:[#allocation8 + $0x258] ss:$20 sps:$4 sm:$0xff]  }
  0xb7   :  { %1363 = vmatpush2.bf16.msra.mxu1 %v6652_v55  ;;  %6351 = vmatprep.subr.bf16.mxu0 %v6658_v57  ;;  %v7699_v55 = vld [vmem:[#allocation2 + $0xc] ss:$16 sps:$4 sm:$0xff]   ;;  %v6739_v57 = vld [vmem:[#allocation8 + $0x3c4] ss:$20 sps:$4 sm:$0xff]  }
  0xb8   :  { %1538 = vmatprep.subr.bf16.mxu1 %v8473_v62 }
  0xb9   :  { %1436 = vmatmul.mubr.bf16.vlgmr.msra.gmra.mxu0 %v7601_v39 }
  0xba   :  { %1365 = vmatmul.mubr.bf16.vlgmr.msra.gmra.mxu1 %v7618_v9  ;;  %6352 = vmatpush3.bf16.msra.mxu0 %v6659_v58  ;;  %v6734_v58 = vld [vmem:[#allocation8 + $0x230] ss:$20 sps:$4 sm:$0xff]  }
  0xbb   :  { %1539 = vmatpush1.bf16.msra.mxu1 %v6660_v60  ;;  %6353 = vmatprep.subr.bf16.mxu0 %v6661_v63  ;;  %v6737_v60 = vld [vmem:[#allocation8 + $0x3c0] ss:$20 sps:$4 sm:$0xff]  }
  0xbc   :  { %1540 = vmatprep.subr.bf16.mxu1 %v8473_v62  ;;  %1374 = vmatprep.mubr.bf16.mxu1 %v7623_v14  ;;  %v6745_v63 = vld [vmem:[#allocation8 + $0x20c] ss:$20 sps:$4 sm:$0xff]  }
  0xbd   :  { %5878 = vmatprep.mubr.msk.bf16.mxu0 %vm1177_vm0, %v7607_v59 }
  0xbe   :  { %6354 = vmatpush3.bf16.msra.mxu0 %v6662_v0  ;;  %v6748_v0 = vld [vmem:[#allocation8 + $0x124] ss:$20 sps:$4 sm:$0xff]  }
  0xbf   :  { %1541 = vmatpush1.bf16.msra.mxu1 %v6663_v1  ;;  %6355 = vmatprep.subr.bf16.mxu0 %v6664_v2  ;;  %v6743_v1 = vld [vmem:[#allocation8 + $0x208] ss:$20 sps:$4 sm:$0xff]   ;;  %v6746_v2 = vld [vmem:[#allocation8 + $0x120] ss:$20 sps:$4 sm:$0xff]  }
  0xc0   :  { %1542 = vmatprep.subr.bf16.mxu1 %v8473_v62 }
  0xc1   :  { %1446 = vmatmul.mubr.bf16.gmra.mxu0 %v7609_v61 }
  0xc2   :  { %1375 = vmatmul.mubr.bf16.gmra.mxu1 %v7633_v22  ;;  %6356 = vmatpush3.bf16.msra.mxu0 %v6665_v3  ;;  %v6751_v3 = vld [vmem:[#allocation8 + $0x1e4] ss:$20 sps:$4 sm:$0xff]  }
  0xc3   :  { %1543 = vmatpush1.bf16.msra.mxu1 %v6666_v4  ;;  %6357 = vmatprep.subr.bf16.mxu0 %v6667_v6  ;;  %v6754_v4 = vld [vmem:[#allocation8 + $0xfc] ss:$20 sps:$4 sm:$0xff]  }
  0xc4   :  { %1544 = vmatprep.subr.bf16.mxu1 %v8473_v62  ;;  %1384 = vmatprep.mubr.bf16.mxu1 %v7636_v28  ;;  %v7707_v6 = vld [vmem:[#allocation2 + $0x2c] ss:$16 sps:$4 sm:$0xff]  }
  0xc5   :  { %5879 = vmatprep.mubr.msk.bf16.mxu0 %vm1177_vm0, %v7614_v5 }
  0xc6   :  { %6358 = vmatpush3.bf16.msra.mxu0 %v6668_v8  ;;  %v6749_v8 = vld [vmem:[#allocation8 + $0x1e0] ss:$20 sps:$4 sm:$0xff]  }
  0xc7   :  { %1545 = vmatpush1.bf16.msra.mxu1 %v6669_v10  ;;  %6359 = vmatprep.subr.bf16.mxu0 %v6670_v11  ;;  %v6752_v10 = vld [vmem:[#allocation8 + $0xf8] ss:$20 sps:$4 sm:$0xff]   ;;  %v6757_v11 = vld [vmem:[#allocation8 + $0x1bc] ss:$20 sps:$4 sm:$0xff]  }
  0xc8   :  { %1546 = vmatprep.subr.bf16.mxu1 %v8473_v62 }
  0xc9   :  { %1456 = vmatmul.mubr.bf16.gmra.mxu0 %v7616_v7 }
  0xca   :  { %1385 = vmatmul.mubr.bf16.gmra.mxu1 %v7640_v32  ;;  %6360 = vmatpush3.bf16.msra.mxu0 %v6671_v12  ;;  %v6760_v12 = vld [vmem:[#allocation8 + $0xd4] ss:$20 sps:$4 sm:$0xff]  }
  0xcb   :  { %1547 = vmatpush1.bf16.msra.mxu1 %v6672_v13  ;;  %6361 = vmatprep.subr.bf16.mxu0 %v6673_v15  ;;  %v6755_v13 = vld [vmem:[#allocation8 + $0x1b8] ss:$20 sps:$4 sm:$0xff]   ;;  %v6758_v15 = vld [vmem:[#allocation8 + $0xd0] ss:$20 sps:$4 sm:$0xff]  }
  0xcc   :  { %1548 = vmatprep.subr.bf16.mxu1 %v8473_v62  ;;  %1394 = vmatprep.mubr.bf16.mxu1 %v7643_v41 }
  0xcd   :  { %5880 = vmatprep.mubr.msk.bf16.mxu0 %vm1177_vm0, %v7626_v17 }
  0xce   :  { %6362 = vmatpush3.bf16.msra.mxu0 %v6674_v16  ;;  %v7712_v16 = vld [vmem:[#allocation2 + $0x28] ss:$16 sps:$4 sm:$0xff]  }
  0xcf   :  { %1549 = vmatpush1.bf16.msra.mxu1 %v6675_v19  ;;  %6363 = vmatprep.subr.bf16.mxu0 %v6676_v20  ;;  %v6763_v19 = vld [vmem:[#allocation8 + $0x194] ss:$20 sps:$4 sm:$0xff]   ;;  %v6766_v20 = vld [vmem:[#allocation8 + $0xac] ss:$20 sps:$4 sm:$0xff]  }
  0xd0   :  { %1550 = vmatprep.subr.bf16.mxu1 %v8473_v62 }
  0xd1   :  { %1466 = vmatmul.mubr.bf16.gmra.mxu0 %v7628_v18 }
  0xd2   :  { %1395 = vmatmul.mubr.bf16.gmra.mxu1 %v7647_v47  ;;  %6364 = vmatpush3.bf16.msra.mxu0 %v6677_v21  ;;  %v6761_v21 = vld [vmem:[#allocation8 + $0x190] ss:$20 sps:$4 sm:$0xff]  }
  0xd3   :  { %1551 = vmatpush1.bf16.msra.mxu1 %v6678_v23  ;;  %6365 = vmatprep.subr.bf16.mxu0 %v6679_v24  ;;  %v7714_v23 = vld [vmem:[#allocation2 + $0x4c] ss:$16 sps:$4 sm:$0xff]  }
  0xd4   :  { %1552 = vmatprep.subr.bf16.mxu1 %v8473_v62  ;;  %1506 = vmatprep.mubr.bf16.mxu0 %v7604_v51  ;;  %v6694_v51 = vld [vmem:[#allocation8 + $0xcc] ss:$20 sps:$4 sm:$0xff]   ;;  %v6764_v24 = vld [vmem:[#allocation8 + $0xa8] ss:$20 sps:$4 sm:$0xff]  }
  0xd5   :  { %5881 = vmatprep.mubr.msk.bf16.mxu1 %vm1177_vm0, %v7597_v29  ;;  %v6692_v29 = vld [vmem:[#allocation8 + $0xc8] ss:$20 sps:$4 sm:$0xff]  }
  0xd6   :  { %6366 = vmatpush3.bf16.msra.mxu0 %v6680_v25  ;;  %v6769_v25 = vld [vmem:[#allocation8 + $0x16c] ss:$20 sps:$4 sm:$0xff]  }
  0xd7   :  { %1553 = vmatpush1.bf16.msra.mxu1 %v6681_v26  ;;  %2334 = vmatprep.subr.bf16.mxu0 %v6684_v27  ;;  %v6772_v26 = vld [vmem:[#allocation8 + $0x84] ss:$20 sps:$4 sm:$0xff]   ;;  %v6767_v27 = vld [vmem:[#allocation8 + $0x168] ss:$20 sps:$4 sm:$0xff]  }
  0xd8   :  { %1568 = vmatprep.subr.bf16.mxu1 %v8473_v62 }
  0xd9   :  { %1507 = vmatmul.mubr.bf16.vlgmr.msra.gmra.mxu0 %v7618_v9  ;;  %v6703_v9 = vld [vmem:[#allocation8 + $0x34c] ss:$20 sps:$4 sm:$0xff]  }
  0xda   :  { %2335 = vmatpush1.bf16.msra.mxu0 %v6682_v30  ;;  %1514 = vmatprep.mubr.bf16.mxu0 %v7623_v14  ;;  %v6709_v14 = vld [vmem:[#allocation8 + $0x324] ss:$20 sps:$4 sm:$0xff]   ;;  %v6770_v30 = vld [vmem:[#allocation8 + $0x80] ss:$20 sps:$4 sm:$0xff]  }
  0xdb   :  { %1569 = vmatpush2.bf16.msra.mxu1 %v6685_v31  ;;  %2336 = vmatprep.subr.bf16.mxu0 %v6688_v33  ;;  %v7719_v31 = vld [vmem:[#allocation2 + $0x48] ss:$16 sps:$4 sm:$0xff]  }
  0xdc   :  { %2405 = vmatprep.subr.bf16.mxu1 %v6691_v34  ;;  %v142_v33 = vld [vmem:[#allocation2 + $0x68] sm:$0xff] }
  0xdd   :  { %v6775_v34 = vld [vmem:[#allocation8 + $0x144] ss:$20 sps:$4 sm:$0xff]  }
  0xde   :  { %1571 = vmatmul.mubr.bf16.vlgmr.msra.gmra.mxu1 %v7601_v39  ;;  %2337 = vmatpush1.bf16.msra.mxu0 %v6686_v35  ;;  %v6706_v39 = vld [vmem:[#allocation8 + $0x7c] ss:$20 sps:$4 sm:$0xff]  }
  0xdf   :  { %2406 = vmatpush1.bf16.msra.mxu1 %v6689_v36  ;;  %2338 = vmatprep.subr.bf16.mxu0 %v6694_v51  ;;  %v6778_v35 = vld [vmem:[#allocation8 + $0x5c] ss:$20 sps:$4 sm:$0xff]   ;;  %v6773_v36 = vld [vmem:[#allocation8 + $0x140] ss:$20 sps:$4 sm:$0xff]   ;;  %v7721_v51 = vcombine.high %v142_v33, %v142_v33 }
  0xe0   :  { %2407 = vmatprep.subr.bf16.mxu1 %v6697_v37  ;;  %5882 = vmatprep.mubr.msk.bf16.mxu1 %vm1177_vm0, %v7607_v59  ;;  %v6712_v59 = vld [vmem:[#allocation8 + $0x54] ss:$20 sps:$4 sm:$0xff]   ;;  %v6776_v37 = vld [vmem:[#allocation8 + $0x58] ss:$20 sps:$4 sm:$0xff]  }
  0xe1   :  { %1515 = vmatmul.mubr.bf16.gmra.mxu0 %v7633_v22  ;;  %v6715_v22 = vld [vmem:[#allocation8 + $0x2fc] ss:$20 sps:$4 sm:$0xff]  }
  0xe2   :  { %2339 = vmatpush1.bf16.msra.mxu0 %v6692_v29  ;;  %1522 = vmatprep.mubr.bf16.mxu0 %v7636_v28  ;;  %v6721_v28 = vld [vmem:[#allocation8 + $0x2d4] ss:$20 sps:$4 sm:$0xff]  }
  0xe3   :  { %2408 = vmatpush1.bf16.msra.mxu1 %v6695_v38  ;;  %2340 = vmatprep.subr.bf16.mxu0 %v6700_v40  ;;  %v6784_v29 = vld [vmem:[#allocation8 + $0x34] ss:$20 sps:$4 sm:$0xff]   ;;  %v7724_v38 = vld [vmem:[#allocation2] ss:$16 sps:$4 sm:$0xff]   ;;  %v6787_v40 = vld [vmem:[#allocation8 + $0x3a4] ss:$20 sps:$4 sm:$0xff]  }
  0xe4   :  { %2409 = vmatprep.subr.bf16.mxu1 %v6703_v9  ;;  %v6782_v9 = vld [vmem:[#allocation8 + $0x30] ss:$20 sps:$4 sm:$0xff]  }
  0xe6   :  { %1579 = vmatmul.mubr.bf16.gmra.mxu1 %v7609_v61  ;;  %2341 = vmatpush1.bf16.msra.mxu0 %v6698_v42  ;;  %v6718_v61 = vld [vmem:[#allocation8 + $0x2c] ss:$20 sps:$4 sm:$0xff]  }
  0xe7   :  { %2410 = vmatpush1.bf16.msra.mxu1 %v6701_v43  ;;  %2342 = vmatprep.subr.bf16.mxu0 %v6706_v39  ;;  %v6785_v42 = vld [vmem:[#allocation8 + $0x3a0] ss:$20 sps:$4 sm:$0xff]   ;;  %v7728_v43 = vcombine.low %v142_v33, %v142_v33 }
  0xe8   :  { %2411 = vmatprep.subr.bf16.mxu1 %v6709_v14  ;;  %5883 = vmatprep.mubr.msk.bf16.mxu1 %vm1177_vm0, %v7614_v5  ;;  %v6724_v5 = vld [vmem:[#allocation8 + $0x4] ss:$20 sps:$4 sm:$0xff]   ;;  %v6790_v39 = vld [vmem:[#allocation8 + $0xc] ss:$20 sps:$4 sm:$0xff]   ;;  %v6793_v14 = vld [vmem:[#allocation8 + $0x37c] ss:$20 sps:$4 sm:$0xff]  }
  0xe9   :  { %1523 = vmatmul.mubr.bf16.gmra.mxu0 %v7640_v32  ;;  %v6727_v32 = vld [vmem:[#allocation8 + $0x2ac] ss:$20 sps:$4 sm:$0xff]  }
  0xea   :  { %2343 = vmatpush1.bf16.msra.mxu0 %v6704_v44  ;;  %1530 = vmatprep.mubr.bf16.mxu0 %v7643_v41  ;;  %v6725_v41 = vld [vmem:[#allocation8 + $0x2a8] ss:$20 sps:$4 sm:$0xff]   ;;  %v7730_v44 = vld [vmem:[#allocation2 + $0x24] ss:$16 sps:$4 sm:$0xff]  }
  0xeb   :  { %2412 = vmatpush1.bf16.msra.mxu1 %v6707_v45  ;;  %2344 = vmatprep.subr.bf16.mxu0 %v6712_v59  ;;  %v6788_v45 = vld [vmem:[#allocation8 + $0x8] ss:$20 sps:$4 sm:$0xff]   ;;  %v6791_v59 = vld [vmem:[#allocation8 + $0x378] ss:$20 sps:$4 sm:$0xff]   ;;  %v6857_v33 = vld [vmem:[#allocation8 + $0x240] ss:$20 sps:$4 sm:$0xff]  }
  0xec   :  { %2413 = vmatprep.subr.bf16.mxu1 %v6715_v22  ;;  %v6799_v22 = vld [vmem:[#allocation8 + $0x264] ss:$20 sps:$4 sm:$0xff]  }
  0xee   :  { %1587 = vmatmul.mubr.bf16.gmra.mxu1 %v7616_v7  ;;  %2345 = vmatpush1.bf16.msra.mxu0 %v6710_v46  ;;  %v6730_v7 = vld [vmem:[#allocation8 + $0x25c] ss:$20 sps:$4 sm:$0xff]   ;;  %v6802_v46 = vld [vmem:[#allocation8 + $0x354] ss:$20 sps:$4 sm:$0xff]  }
  0xef   :  { %2414 = vmatpush1.bf16.msra.mxu1 %v6713_v48  ;;  %2346 = vmatprep.subr.bf16.mxu0 %v6718_v61  ;;  %v7736_v48 = vld [vmem:[#allocation2 + $0x20] ss:$16 sps:$4 sm:$0xff]  }
  0xf0   :  { %2415 = vmatprep.subr.bf16.mxu1 %v6721_v28  ;;  %5884 = vmatprep.mubr.msk.bf16.mxu1 %vm1177_vm0, %v7626_v17  ;;  %v6731_v17 = vld [vmem:[#allocation8 + $0x280] ss:$20 sps:$4 sm:$0xff]   ;;  %v6800_v28 = vld [vmem:[#allocation8 + $0x350] ss:$20 sps:$4 sm:$0xff]  }
  0xf1   :  { %1531 = vmatmul.mubr.bf16.gmra.mxu0 %v7647_v47  ;;  %v6736_v47 = vld [vmem:[#allocation8 + $0x234] ss:$20 sps:$4 sm:$0xff]  }
  0xf2   :  { %2347 = vmatpush1.bf16.msra.mxu0 %v6716_v49  ;;  %2366 = vmatprep.mubr.bf16.mxu0 %v7696_v52  ;;  %v6797_v61 = vld [vmem:[#allocation8 + $0x260] ss:$20 sps:$4 sm:$0xff]   ;;  %v6808_v49 = vld [vmem:[#allocation8 + $0x23c] ss:$20 sps:$4 sm:$0xff]  }
  0xf3   :  { %2416 = vmatpush1.bf16.msra.mxu1 %v6719_v50  ;;  %2348 = vmatprep.subr.bf16.mxu0 %v6724_v5  ;;  %v6811_v50 = vld [vmem:[#allocation8 + $0x32c] ss:$20 sps:$4 sm:$0xff]   ;;  %v7738_v5 = vld [vmem:[#allocation2 + $0x44] ss:$16 sps:$4 sm:$0xff]  }
  0xf4   :  { %2417 = vmatprep.subr.bf16.mxu1 %v6727_v32  ;;  %v6806_v32 = vld [vmem:[#allocation8 + $0x238] ss:$20 sps:$4 sm:$0xff]  }
  0xf6   :  { %1595 = vmatmul.mubr.bf16.gmra.mxu1 %v7628_v18  ;;  %2349 = vmatpush1.bf16.msra.mxu0 %v6722_v53  ;;  %v7705_v18 = vld [vmem:[#allocation2 + $0x8] ss:$16 sps:$4 sm:$0xff]  }
  0xf7   :  { %2418 = vmatpush1.bf16.msra.mxu1 %v6725_v41  ;;  %2350 = vmatprep.subr.bf16.mxu0 %v6730_v7  ;;  %v6809_v53 = vld [vmem:[#allocation8 + $0x328] ss:$20 sps:$4 sm:$0xff]   ;;  %v6820_v7 = vld [vmem:[#allocation8 + $0x304] ss:$20 sps:$4 sm:$0xff]  }
  0xf8   :  { %2419 = vmatprep.subr.bf16.mxu1 %v6733_v54  ;;  %6026 = vmatprep.mubr.msk.bf16.mxu1 %vm1177_vm0, %v7699_v55  ;;  %v6817_v41 = vld [vmem:[#allocation8 + $0x214] ss:$20 sps:$4 sm:$0xff]   ;;  %v7742_v54 = vld [vmem:[#allocation2 + $0x40] ss:$16 sps:$4 sm:$0xff]  }
  0xfa   :  { %2351 = vmatpush2.bf16.msra.mxu0 %v6728_v56  ;;  %v141_v56 = vld [vmem:[#allocation2 + $0x60] sm:$0xff] }
  0xfb   :  { %2420 = vmatpush1.bf16.msra.mxu1 %v6731_v17  ;;  %2352 = vmatprep.subr.bf16.mxu0 %v6736_v47  ;;  %v6815_v17 = vld [vmem:[#allocation8 + $0x210] ss:$20 sps:$4 sm:$0xff]   ;;  %v6818_v47 = vld [vmem:[#allocation8 + $0x300] ss:$20 sps:$4 sm:$0xff]  }
  0xfc   :  { %2435 = vmatprep.subr.bf16.mxu1 %v6739_v57  ;;  %v6826_v57 = vld [vmem:[#allocation8 + $0x1ec] ss:$20 sps:$4 sm:$0xff]  }
  0xfe   :  { %2353 = vmatpush2.bf16.msra.mxu0 %v6734_v58  ;;  %v6829_v58 = vld [vmem:[#allocation8 + $0x2dc] ss:$20 sps:$4 sm:$0xff]  }
  0xff   :  { %2436 = vmatpush2.bf16.msra.mxu1 %v6737_v60  ;;  %2354 = vmatprep.subr.bf16.mxu0 %v6745_v63  ;;  %v7744_v60 = vcombine.high %v141_v56, %v141_v56  ;;  %v6824_v63 = vld [vmem:[#allocation8 + $0x1e8] ss:$20 sps:$4 sm:$0xff]  }
 0x100   :  { %2476 = vmatprep.subr.bf16.mxu1 %v6748_v0  ;;  %v6827_v0 = vld [vmem:[#allocation8 + $0x2d8] ss:$20 sps:$4 sm:$0xff]  }
 0x102   :  { %2438 = vmatmul.mubr.bf16.vlgmr.msra.gmra.mxu1 %v7705_v18  ;;  %2355 = vmatpush2.bf16.msra.mxu0 %v6743_v1  ;;  %v6834_v1 = vld [vmem:[#allocation8 + $0x1c4] ss:$20 sps:$4 sm:$0xff]  }
 0x103   :  { %2477 = vmatpush1.bf16.msra.mxu1 %v6746_v2  ;;  %2356 = vmatprep.subr.bf16.mxu0 %v6751_v3  ;;  %v6837_v2 = vld [vmem:[#allocation8 + $0x2b4] ss:$20 sps:$4 sm:$0xff]   ;;  %v7748_v3 = vcombine.low %v141_v56, %v141_v56 }
 0x104   :  { %2478 = vmatprep.subr.bf16.mxu1 %v6754_v4  ;;  %6027 = vmatprep.mubr.msk.bf16.mxu1 %vm1177_vm0, %v7707_v6  ;;  %v6832_v4 = vld [vmem:[#allocation8 + $0x1c0] ss:$20 sps:$4 sm:$0xff]  }
 0x106   :  { %2357 = vmatpush2.bf16.msra.mxu0 %v6749_v8  ;;  %v6835_v8 = vld [vmem:[#allocation8 + $0x2b0] ss:$20 sps:$4 sm:$0xff]  }
 0x107   :  { %2479 = vmatpush1.bf16.msra.mxu1 %v6752_v10  ;;  %2358 = vmatprep.subr.bf16.mxu0 %v6757_v11  ;;  %v6842_v10 = vld [vmem:[#allocation8 + $0x19c] ss:$20 sps:$4 sm:$0xff]   ;;  %v6845_v11 = vld [vmem:[#allocation8 + $0x28c] ss:$20 sps:$4 sm:$0xff]  }
 0x108   :  { %2480 = vmatprep.subr.bf16.mxu1 %v6760_v12  ;;  %v6840_v12 = vld [vmem:[#allocation8 + $0x198] ss:$20 sps:$4 sm:$0xff]  }
 0x10a   :  { %2448 = vmatmul.mubr.bf16.gmra.mxu1 %v7712_v16  ;;  %2359 = vmatpush2.bf16.msra.mxu0 %v6755_v13  ;;  %v6843_v13 = vld [vmem:[#allocation8 + $0x288] ss:$20 sps:$4 sm:$0xff]  }
 0x10b   :  { %2481 = vmatpush1.bf16.msra.mxu1 %v6758_v15  ;;  %2360 = vmatprep.subr.bf16.mxu0 %v6763_v19  ;;  %v6848_v15 = vld [vmem:[#allocation8 + $0x174] ss:$20 sps:$4 sm:$0xff]   ;;  %v6851_v19 = vld [vmem:[#allocation8 + $0x3cc] ss:$20 sps:$4 sm:$0xff]  }
 0x10c   :  { %2482 = vmatprep.subr.bf16.mxu1 %v6766_v20  ;;  %6028 = vmatprep.mubr.msk.bf16.mxu1 %vm1177_vm0, %v7714_v23  ;;  %v6846_v20 = vld [vmem:[#allocation8 + $0x170] ss:$20 sps:$4 sm:$0xff]  }
 0x10e   :  { %2361 = vmatpush2.bf16.msra.mxu0 %v6761_v21  ;;  %v6849_v21 = vld [vmem:[#allocation8 + $0x3c8] ss:$20 sps:$4 sm:$0xff]  }
 0x10f   :  { %2483 = vmatpush1.bf16.msra.mxu1 %v6764_v24  ;;  %2362 = vmatprep.subr.bf16.mxu0 %v6769_v25  ;;  %v6854_v24 = vld [vmem:[#allocation8 + $0x14c] ss:$20 sps:$4 sm:$0xff]   ;;  %v6855_v25 = vld [vmem:[#allocation8 + $0x268] ss:$20 sps:$4 sm:$0xff]  }
 0x110   :  { %2484 = vmatprep.subr.bf16.mxu1 %v6772_v26  ;;  %v6852_v26 = vld [vmem:[#allocation8 + $0x148] ss:$20 sps:$4 sm:$0xff]  }
 0x112   :  { %2458 = vmatmul.mubr.bf16.gmra.mxu1 %v7719_v31  ;;  %2363 = vmatpush2.bf16.msra.mxu0 %v6767_v27  ;;  %v6856_v27 = vld [vmem:[#allocation8 + $0x128] ss:$20 sps:$4 sm:$0xff]  }
 0x113   :  { %2485 = vmatpush1.bf16.msra.mxu1 %v6770_v30  ;;  %2364 = vmatprep.subr.bf16.mxu0 %v6775_v34  ;;  %v6858_v34 = vld [vmem:[#allocation8 + $0x100] ss:$20 sps:$4 sm:$0xff]  }
 0x114   :  { %2486 = vmatprep.subr.bf16.mxu1 %v6778_v35  ;;  %6029 = vmatprep.mubr.msk.bf16.mxu1 %vm1177_vm0, %v7721_v51  ;;  %v6859_v35 = vld [vmem:[#allocation8 + $0x3a8] ss:$20 sps:$4 sm:$0xff]  }
 0x116   :  { %2365 = vmatpush2.bf16.msra.mxu0 %v6773_v36 }
 0x117   :  { %2487 = vmatpush1.bf16.msra.mxu1 %v6776_v37  ;;  %2547 = vmatprep.subr.bf16.mxu0 %v6787_v40  ;;  %v6860_v37 = vld [vmem:[#allocation8 + $0x218] ss:$20 sps:$4 sm:$0xff]   ;;  %v6862_v40 = vld [vmem:[#allocation8 + $0x380] ss:$20 sps:$4 sm:$0xff]  }
 0x118   :  { %2488 = vmatprep.subr.bf16.mxu1 %v6784_v29  ;;  %v6861_v29 = vld [vmem:[#allocation8 + $0xd8] ss:$20 sps:$4 sm:$0xff]  }
 0x119   :  { %2367 = vmatmul.mubr.bf16.vlgmr.msra.gmra.mxu0 %v7724_v38 }
 0x11a   :  { %2468 = vmatmul.mubr.bf16.gmra.mxu1 %v7728_v43  ;;  %2548 = vmatpush1.bf16.msra.mxu0 %v6785_v42  ;;  %v6863_v42 = vld [vmem:[#allocation8 + $0x1f0] ss:$20 sps:$4 sm:$0xff]  }
 0x11b   :  { %2489 = vmatpush1.bf16.msra.mxu1 %v6782_v9  ;;  %2549 = vmatprep.subr.bf16.mxu0 %v6793_v14  ;;  %v6865_v14 = vld [vmem:[#allocation8 + $0x358] ss:$20 sps:$4 sm:$0xff]  }
 0x11c   :  { %2490 = vmatprep.subr.bf16.mxu1 %v6790_v39  ;;  %2376 = vmatprep.mubr.bf16.mxu0 %v7730_v44  ;;  %v6864_v39 = vld [vmem:[#allocation8 + $0xb0] ss:$20 sps:$4 sm:$0xff]  }
 0x11d   :  { %2508 = vmatprep.mubr.bf16.mxu1 %v7696_v52 }
 0x11e   :  { %2550 = vmatpush1.bf16.msra.mxu0 %v6791_v59  ;;  %v6866_v59 = vld [vmem:[#allocation8 + $0x1c8] ss:$20 sps:$4 sm:$0xff]  }
 0x11f   :  { %2491 = vmatpush1.bf16.msra.mxu1 %v6788_v45  ;;  %2551 = vmatprep.subr.bf16.mxu0 %v6802_v46  ;;  %v6867_v46 = vld [vmem:[#allocation8 + $0x88] ss:$20 sps:$4 sm:$0xff]  }
 0x120   :  { %2492 = vmatprep.subr.bf16.mxu1 %v6799_v22 }
 0x121   :  { %2377 = vmatmul.mubr.bf16.gmra.mxu0 %v7736_v48 }
 0x122   :  { %2552 = vmatpush1.bf16.msra.mxu0 %v6800_v28  ;;  %2386 = vmatprep.mubr.bf16.mxu0 %v7738_v5  ;;  %v6869_v28 = vld [vmem:[#allocation8 + $0x1a0] ss:$20 sps:$4 sm:$0xff]  }
 0x123   :  { %2493 = vmatpush2.bf16.msra.mxu1 %v6797_v61  ;;  %2553 = vmatprep.subr.bf16.mxu0 %v6811_v50  ;;  %v6868_v61 = vld [vmem:[#allocation8 + $0x330] ss:$20 sps:$4 sm:$0xff]  }
 0x124   :  { %2494 = vmatprep.subr.bf16.mxu1 %v6808_v49 }
 0x126   :  { %2554 = vmatpush1.bf16.msra.mxu0 %v6809_v53  ;;  %v6871_v53 = vld [vmem:[#allocation8 + $0x308] ss:$20 sps:$4 sm:$0xff]  }
 0x127   :  { %2495 = vmatpush2.bf16.msra.mxu1 %v6806_v32  ;;  %2555 = vmatprep.subr.bf16.mxu0 %v6820_v7  ;;  %v6870_v32 = vld [vmem:[#allocation8 + $0x60] ss:$20 sps:$4 sm:$0xff]  }
 0x128   :  { %2496 = vmatprep.subr.bf16.mxu1 %v6817_v41  ;;  %v6872_v41 = vld [vmem:[#allocation8 + $0x178] ss:$20 sps:$4 sm:$0xff]  }
 0x129   :  { %2387 = vmatmul.mubr.bf16.gmra.mxu0 %v7742_v54 }
 0x12a   :  { %2556 = vmatpush1.bf16.msra.mxu0 %v6818_v47  ;;  %2396 = vmatprep.mubr.bf16.mxu0 %v7744_v60  ;;  %v6874_v47 = vld [vmem:[#allocation8 + $0x2e0] ss:$20 sps:$4 sm:$0xff]  }
 0x12b   :  { %2497 = vmatpush2.bf16.msra.mxu1 %v6815_v17  ;;  %2557 = vmatprep.subr.bf16.mxu0 %v6829_v58  ;;  %v6873_v17 = vld [vmem:[#allocation8 + $0x38] ss:$20 sps:$4 sm:$0xff]  }
 0x12c   :  { %2498 = vmatprep.subr.bf16.mxu1 %v6826_v57  ;;  %v6875_v57 = vld [vmem:[#allocation8 + $0x150] ss:$20 sps:$4 sm:$0xff]  }
 0x12e   :  { %2558 = vmatpush1.bf16.msra.mxu0 %v6827_v0 }
 0x12f   :  { %2499 = vmatpush2.bf16.msra.mxu1 %v6824_v63  ;;  %2559 = vmatprep.subr.bf16.mxu0 %v6837_v2  ;;  %v6876_v2 = vld [vmem:[#allocation8 + $0x10] ss:$20 sps:$4 sm:$0xff]  }
 0x130   :  { %2500 = vmatprep.subr.bf16.mxu1 %v6834_v1 }
 0x131   :  { %2397 = vmatmul.mubr.bf16.gmra.mxu0 %v7748_v3 }
 0x132   :  { %2560 = vmatpush1.bf16.msra.mxu0 %v6835_v8  ;;  %6030 = vmatprep.mubr.msk.bf16.mxu0 %vm1177_vm0, %v7699_v55 }
 0x133   :  { %2501 = vmatpush2.bf16.msra.mxu1 %v6832_v4  ;;  %2561 = vmatprep.subr.bf16.mxu0 %v6845_v11  ;;  %v6877_v4 = vld [vmem:[#allocation8 + $0x2b8] ss:$20 sps:$4 sm:$0xff]  }
 0x134   :  { %2502 = vmatprep.subr.bf16.mxu1 %v6842_v10  ;;  %v6880_v10 = vld [vmem:[#allocation11 + $0x11c] ss:$20 sps:$4 sm:$0xff]  }
 0x136   :  { %2562 = vmatpush1.bf16.msra.mxu0 %v6843_v13 }
 0x137   :  { %2503 = vmatpush2.bf16.msra.mxu1 %v6840_v12  ;;  %2577 = vmatprep.subr.bf16.mxu0 %v6851_v19 }
 0x138   :  { %2504 = vmatprep.subr.bf16.mxu1 %v6848_v15 }
 0x13a   :  { %2578 = vmatpush2.bf16.msra.mxu0 %v6849_v21  ;;  %v7753_v30 = vpop.f32.mrf.mxu1  ;;  %v6881_v21 = vld [vmem:[#allocation8 + $0x290] ss:$20 sps:$4 sm:$0xff]  }
 0x13b   :  { %2505 = vmatpush2.bf16.msra.mxu1 %v6846_v20  ;;  %6391 = vmatprep.subr.bf16.mxu0 %v6855_v25  ;;  %v6878_v20 = vld [vmem:[#allocation11 + $0x118] ss:$20 sps:$4 sm:$0xff]   ;;  %v6884_v25 = vld [vmem:[#allocation11 + $0xf4] ss:$20 sps:$4 sm:$0xff]  }
 0x13c   :  { %2506 = vmatprep.subr.bf16.mxu1 %v6854_v24  ;;  %v7756_v36 = vpop.f32.mrf.mxu1 }
 0x13d   :  { %2580 = vmatmul.mubr.bf16.vlgmr.msra.gmra.mxu0 %v7705_v18 }
 0x13e   :  { %6392 = vmatpush3.bf16.msra.mxu0 %v6856_v27  ;;  %6031 = vmatprep.mubr.msk.bf16.mxu0 %vm1177_vm0, %v7707_v6  ;;  %v7762_v9 = vpop.f32.mrf.mxu1  ;;  %v6882_v27 = vld [vmem:[#allocation11 + $0xf0] ss:$20 sps:$4 sm:$0xff]  }
 0x13f   :  { %2507 = vmatpush2.bf16.msra.mxu1 %v6852_v26  ;;  %6393 = vmatprep.subr.bf16.mxu0 %v6857_v33 }
 0x140   :  { %2682 = vmatprep.subr.bf16.mxu1 %v8473_v62  ;;  %v7767_v45 = vpop.f32.mrf.mxu1 }
 0x141   :  { %8477 = vst [vmem:[#allocation20_spill] sm:$0xff] %v7767_v45 }
 0x142   :  { %2509 = vmatmul.mubr.bf16.vlgmr.msra.gmra.mxu1 %v7724_v38  ;;  %6394 = vmatpush3.bf16.msra.mxu0 %v6858_v34  ;;  %v7773_v22 = vpop.f32.mrf.mxu1 }
 0x143   :  { %2683 = vmatpush1.bf16.msra.mxu1 %v6859_v35  ;;  %6395 = vmatprep.subr.bf16.mxu0 %v6860_v37  ;;  %v6888_v35 = vld [vmem:[#allocation11 + $0xcc] ss:$20 sps:$4 sm:$0xff]   ;;  %v6891_v37 = vld [vmem:[#allocation11 + $0x39c] ss:$20 sps:$4 sm:$0xff]  }
 0x144   :  { %2684 = vmatprep.subr.bf16.mxu1 %v8473_v62  ;;  %2518 = vmatprep.mubr.bf16.mxu1 %v7730_v44  ;;  %v7776_v49 = vpop.f32.mrf.mxu1 }
 0x145   :  { %2590 = vmatmul.mubr.bf16.gmra.mxu0 %v7712_v16 }
 0x146   :  { %6396 = vmatpush3.bf16.msra.mxu0 %v6861_v29  ;;  %6032 = vmatprep.mubr.msk.bf16.mxu0 %vm1177_vm0, %v7714_v23  ;;  %v7780_v50 = vpop.f32.mrf.mxu1 }
 0x147   :  { %2685 = vmatpush1.bf16.msra.mxu1 %v6862_v40  ;;  %6397 = vmatprep.subr.bf16.mxu0 %v6863_v42  ;;  %v6886_v40 = vld [vmem:[#allocation11 + $0xc8] ss:$20 sps:$4 sm:$0xff]  }
 0x148   :  { %2686 = vmatprep.subr.bf16.mxu1 %v8473_v62  ;;  %v7783_v7 = vpop.f32.mrf.mxu1 }
 0x149   :  { %8478 = vst [vmem:[#allocation21_spill] sm:$0xff] %v7783_v7 }
 0x14a   :  { %2519 = vmatmul.mubr.bf16.gmra.mxu1 %v7736_v48  ;;  %6398 = vmatpush3.bf16.msra.mxu0 %v6864_v39  ;;  %v7788_v56 = vpop.f32.mrf.mxu1  ;;  %v6894_v39 = vld [vmem:[#allocation11 + $0xa4] ss:$20 sps:$4 sm:$0xff]  }
 0x14b   :  { %2687 = vmatpush1.bf16.msra.mxu1 %v6865_v14  ;;  %6399 = vmatprep.subr.bf16.mxu0 %v6866_v59  ;;  %v6897_v59 = vld [vmem:[#allocation11 + $0x374] ss:$20 sps:$4 sm:$0xff]  }
 0x14c   :  { %2688 = vmatprep.subr.bf16.mxu1 %v8473_v62  ;;  %2528 = vmatprep.mubr.bf16.mxu1 %v7738_v5  ;;  %v7791_v58 = vpop.f32.mrf.mxu1 }
 0x14d   :  { %2600 = vmatmul.mubr.bf16.gmra.mxu0 %v7719_v31 }
 0x14e   :  { %6400 = vmatpush3.bf16.msra.mxu0 %v6867_v46  ;;  %6033 = vmatprep.mubr.msk.bf16.mxu0 %vm1177_vm0, %v7721_v51  ;;  %v7795_v0 = vpop.f32.mrf.mxu1 }
 0x14f   :  { %2689 = vmatpush1.bf16.msra.mxu1 %v6868_v61  ;;  %6401 = vmatprep.subr.bf16.mxu0 %v6869_v28  ;;  %v6895_v61 = vld [vmem:[#allocation11 + $0x370] ss:$20 sps:$4 sm:$0xff]  }
 0x150   :  { %2690 = vmatprep.subr.bf16.mxu1 %v8473_v62  ;;  %v7801_v11 = vpop.f32.mrf.mxu1 }
 0x151   :  { %8479 = vst [vmem:[#allocation22_spill] sm:$0xff] %v7801_v11  ;;  %v7023_v11 = vld [vmem:[#allocation11 + $0x2dc] ss:$20 sps:$4 sm:$0xff]  }
 0x152   :  { %2529 = vmatmul.mubr.bf16.gmra.mxu1 %v7742_v54  ;;  %6402 = vmatpush3.bf16.msra.mxu0 %v6870_v32  ;;  %v7808_v15 = vpop.f32.mrf.mxu1 }
 0x153   :  { %2691 = vmatpush1.bf16.msra.mxu1 %v6871_v53  ;;  %6403 = vmatprep.subr.bf16.mxu0 %v6872_v41  ;;  %v6901_v53 = vld [vmem:[#allocation11 + $0x348] ss:$20 sps:$4 sm:$0xff]  }
 0x154   :  { %2692 = vmatprep.subr.bf16.mxu1 %v8473_v62  ;;  %2538 = vmatprep.mubr.bf16.mxu1 %v7744_v60  ;;  %v7816_v26 = vpop.f32.mrf.mxu1 }
 0x155   :  { %v1224_v63 = vpop.f32.mrf.mxu0  ;;  %2610 = vmatmul.mubr.bf16.gmra.mxu0 %v7728_v43 }
 0x156   :  { %v7798_v1 = vadd.f32 %v7753_v30, %v1224_v63  ;;  %6404 = vmatpush3.bf16.msra.mxu0 %v6873_v17  ;;  %2650 = vmatprep.mubr.bf16.mxu0 %v7696_v52  ;;  %v6885_v30 = vld [vmem:[#allocation8 + $0x3d0] ss:$20 sps:$4 sm:$0xff]   ;;  %v1329_v33 = vpop.f32.mrf.mxu1 }
 0x157   :  { %2693 = vmatpush1.bf16.msra.mxu1 %v6874_v47  ;;  %v1226_v8 = vpop.f32.mrf.mxu0  ;;  %6405 = vmatprep.subr.bf16.mxu0 %v6875_v57  ;;  %v6909_v47 = vld [vmem:[#allocation11 + $0x324] ss:$20 sps:$4 sm:$0xff]   ;;  %v6912_v63 = vld [vmem:[#allocation11 + $0x2c] ss:$20 sps:$4 sm:$0xff]  }
 0x158   :  { %2694 = vmatprep.subr.bf16.mxu1 %v8473_v62  ;;  %v7804_v12 = vadd.f32 %v7756_v36, %v1226_v8  ;;  %v1330_v29 = vpop.f32.mrf.mxu1  ;;  %v6904_v57 = vld [vmem:[#allocation11 + $0x50] ss:$20 sps:$4 sm:$0xff]   ;;  %v6913_v8 = vld [vmem:[#allocation11 + $0x2f8] ss:$20 sps:$4 sm:$0xff]  }
 0x159   :  { %v1228_v13 = vpop.f32.mrf.mxu0  ;;  %v6928_v29 = vld [vmem:[#allocation11 + $0x230] ss:$20 sps:$4 sm:$0xff]  }
 0x15a   :  { %2539 = vmatmul.mubr.bf16.gmra.mxu1 %v7748_v3  ;;  %v7811_v19 = vadd.f32 %v7762_v9, %v1228_v13  ;;  %6406 = vmatpush3.bf16.msra.mxu0 %v6876_v2  ;;  %v6889_v9 = vld [vmem:[#allocation11 + $0x398] ss:$20 sps:$4 sm:$0xff]   ;;  %v6915_v2 = vld [vmem:[#allocation11 + $0x2fc] ss:$20 sps:$4 sm:$0xff]  }
 0x15b   :  { %2695 = vmatpush1.bf16.msra.mxu1 %v6877_v4  ;;  %v7813_v24 = vpop.f32.mrf.mxu0  ;;  %3642 = vmatprep.subr.bf16.mxu0 %v6880_v10  ;;  %v6918_v10 = vld [vmem:[#allocation11 + $0x4] ss:$20 sps:$4 sm:$0xff]  }
 0x15c   :  { %8480 = vst [vmem:[#allocation23_spill] sm:$0xff] %v7813_v24  ;;  %2696 = vmatprep.subr.bf16.mxu1 %v8473_v62  ;;  %6034 = vmatprep.mubr.msk.bf16.mxu1 %vm1177_vm0, %v7699_v55 }
 0x15d   :  { %v1234_v52 = vpop.f32.mrf.mxu0  ;;  %2651 = vmatmul.mubr.bf16.vlgmr.msra.gmra.mxu0 %v7724_v38 }
 0x15e   :  { %v7822_v34 = vadd.f32 %v7773_v22, %v1234_v52  ;;  %3643 = vmatpush1.bf16.msra.mxu0 %v6878_v20  ;;  %2658 = vmatprep.mubr.bf16.mxu0 %v7730_v44  ;;  %v6892_v44 = vld [vmem:[#allocation11 + $0xa0] ss:$20 sps:$4 sm:$0xff]  }
 0x15f   :  { %2697 = vmatpush1.bf16.msra.mxu1 %v6881_v21  ;;  %v1236_v36 = vpop.f32.mrf.mxu0  ;;  %3644 = vmatprep.subr.bf16.mxu0 %v6884_v25  ;;  %v6916_v20 = vld [vmem:[#allocation11] ss:$20 sps:$4 sm:$0xff]  }
 0x160   :  { %2712 = vmatprep.subr.bf16.mxu1 %v8473_v62  ;;  %v7826_v55 = vadd.f32 %v7776_v49, %v1236_v36  ;;  %v6900_v49 = vld [vmem:[#allocation11 + $0x7c] ss:$20 sps:$4 sm:$0xff]   ;;  %v7861_v21 = vld [vmem:[#allocation7 + $0x4] ss:$16 sps:$4 sm:$0xff]   ;;  %v6927_v25 = vld [vmem:[#allocation11 + $0x2ac] ss:$20 sps:$4 sm:$0xff]  }
 0x161   :  { %v1238_v38 = vpop.f32.mrf.mxu0  ;;  %v6933_v36 = vld [vmem:[#allocation11 + $0x284] ss:$20 sps:$4 sm:$0xff]  }
 0x162   :  { %v7830_v42 = vadd.f32 %v7780_v50, %v1238_v38  ;;  %3645 = vmatpush1.bf16.msra.mxu0 %v6882_v27  ;;  %v6903_v50 = vld [vmem:[#allocation11 + $0x34c] ss:$20 sps:$4 sm:$0xff]   ;;  %v6997_v62 = vld [vmem:[#allocation11 + $0x350] ss:$20 sps:$4 sm:$0xff]  }
 0x163   :  { %2713 = vmatpush2.bf16.msra.mxu1 %v6885_v30  ;;  %v7832_v14 = vpop.f32.mrf.mxu0  ;;  %3646 = vmatprep.subr.bf16.mxu0 %v6888_v35  ;;  %v6925_v30 = vld [vmem:[#allocation11 + $0x2a8] ss:$20 sps:$4 sm:$0xff]  }
 0x164   :  { %8481 = vst [vmem:[#allocation24_spill] sm:$0xff] %v7832_v14  ;;  %3713 = vmatprep.subr.bf16.mxu1 %v6891_v37  ;;  %v7872_v38 = vld [vmem:[#allocation7 + $0xc] ss:$16 sps:$4 sm:$0xff]  }
 0x165   :  { %v1244_v22 = vpop.f32.mrf.mxu0  ;;  %2659 = vmatmul.mubr.bf16.gmra.mxu0 %v7736_v48 }
 0x166   :  { %2715 = vmatmul.mubr.bf16.vlgmr.msra.gmra.mxu1 %v7705_v18  ;;  %v7837_v46 = vadd.f32 %v7788_v56, %v1244_v22  ;;  %3647 = vmatpush1.bf16.msra.mxu0 %v6886_v40  ;;  %v6898_v18 = vld [vmem:[#allocation11 + $0x78] ss:$20 sps:$4 sm:$0xff]   ;;  %v6906_v56 = vld [vmem:[#allocation11 + $0x54] ss:$20 sps:$4 sm:$0xff]  }
 0x167   :  { %3714 = vmatpush1.bf16.msra.mxu1 %v6889_v9  ;;  %v1246_v28 = vpop.f32.mrf.mxu0  ;;  %3648 = vmatprep.subr.bf16.mxu0 %v6894_v39  ;;  %v6936_v39 = vld [vmem:[#allocation11 + $0x20c] ss:$20 sps:$4 sm:$0xff]   ;;  %v6939_v22 = vld [vmem:[#allocation11 + $0x3c4] ss:$20 sps:$4 sm:$0xff]  }
 0x168   :  { %3715 = vmatprep.subr.bf16.mxu1 %v6897_v59  ;;  %v7840_v32 = vadd.f32 %v7791_v58, %v1246_v28  ;;  %2666 = vmatprep.mubr.bf16.mxu0 %v7738_v5  ;;  %v6907_v5 = vld [vmem:[#allocation11 + $0x320] ss:$20 sps:$4 sm:$0xff]   ;;  %v6934_v28 = vld [vmem:[#allocation11 + $0x208] ss:$20 sps:$4 sm:$0xff]  }
 0x169   :  { %6035 = vmatprep.mubr.msk.bf16.mxu1 %vm1177_vm0, %v7707_v6  ;;  %v1248_v48 = vpop.f32.mrf.mxu0 }
 0x16a   :  { %v7846_v41 = vadd.f32 %v7795_v0, %v1248_v48  ;;  %3649 = vmatpush1.bf16.msra.mxu0 %v6892_v44  ;;  %v6948_v48 = vld [vmem:[#allocation11 + $0x124] ss:$20 sps:$4 sm:$0xff]  }
 0x16b   :  { %3716 = vmatpush1.bf16.msra.mxu1 %v6895_v61  ;;  %v7848_v17 = vpop.f32.mrf.mxu0  ;;  %3650 = vmatprep.subr.bf16.mxu0 %v6900_v49  ;;  %v6937_v49 = vld [vmem:[#allocation11 + $0x3c0] ss:$20 sps:$4 sm:$0xff]  }
 0x16c   :  { %8482 = vst [vmem:[#allocation25_spill] sm:$0xff] %v7848_v17  ;;  %3717 = vmatprep.subr.bf16.mxu1 %v6903_v50 }
 0x16d   :  { %2667 = vmatmul.mubr.bf16.gmra.mxu0 %v7742_v54  ;;  %v1254_v6 = vpop.f32.mrf.mxu0 }
 0x16e   :  { %2723 = vmatmul.mubr.bf16.gmra.mxu1 %v7712_v16  ;;  %3651 = vmatpush1.bf16.msra.mxu0 %v6898_v18  ;;  %v7853_v58 = vadd.f32 %v7808_v15, %v1254_v6  ;;  %v6910_v16 = vld [vmem:[#allocation11 + $0x28] ss:$20 sps:$4 sm:$0xff]  }
 0x16f   :  { %3718 = vmatpush1.bf16.msra.mxu1 %v6901_v53  ;;  %3652 = vmatprep.subr.bf16.mxu0 %v6906_v56  ;;  %v1256_v0 = vpop.f32.mrf.mxu0  ;;  %v6921_v15 = vld [vmem:[#allocation11 + $0x2d4] ss:$20 sps:$4 sm:$0xff]  }
 0x170   :  { %3719 = vmatprep.subr.bf16.mxu1 %v6909_v47  ;;  %v7856_v4 = vadd.f32 %v7816_v26, %v1256_v0  ;;  %2674 = vmatprep.mubr.bf16.mxu0 %v7744_v60  ;;  %v6919_v60 = vld [vmem:[#allocation11 + $0x2d0] ss:$20 sps:$4 sm:$0xff]   ;;  %v6922_v26 = vld [vmem:[#allocation11 + $0x258] ss:$20 sps:$4 sm:$0xff]  }
 0x171   :  { %6036 = vmatprep.mubr.msk.bf16.mxu1 %vm1177_vm0, %v7714_v23  ;;  %v1258_v54 = vpop.f32.mrf.mxu0  ;;  %v6924_v23 = vld [vmem:[#allocation11 + $0x25c] ss:$20 sps:$4 sm:$0xff]  }
 0x172   :  { %3653 = vmatpush1.bf16.msra.mxu0 %v6904_v57  ;;  %v7885_v57 = vld [vmem:[#allocation7 + $0x8] ss:$16 sps:$4 sm:$0xff]   ;;  %v6954_v54 = vld [vmem:[#allocation11 + $0xfc] ss:$20 sps:$4 sm:$0xff]  }
 0x173   :  { %3720 = vmatpush1.bf16.msra.mxu1 %v6907_v5  ;;  %3654 = vmatprep.subr.bf16.mxu0 %v6912_v63  ;;  %v1259_v13 = vpop.f32.mrf.mxu0  ;;  %v6943_v5 = vld [vmem:[#allocation11 + $0x1e0] ss:$20 sps:$4 sm:$0xff]  }
 0x174   :  { %3721 = vmatprep.subr.bf16.mxu1 %v6915_v2  ;;  %v6946_v63 = vld [vmem:[#allocation11 + $0x120] ss:$20 sps:$4 sm:$0xff]  }
 0x175   :  { %2675 = vmatmul.mubr.bf16.gmra.mxu0 %v7748_v3 }
 0x176   :  { %2731 = vmatmul.mubr.bf16.gmra.mxu1 %v7719_v31  ;;  %3655 = vmatpush1.bf16.msra.mxu0 %v6910_v16  ;;  %v6930_v31 = vld [vmem:[#allocation11 + $0x234] ss:$20 sps:$4 sm:$0xff]   ;;  %v6951_v16 = vld [vmem:[#allocation11 + $0x1bc] ss:$20 sps:$4 sm:$0xff]  }
 0x177   :  { %3722 = vmatpush1.bf16.msra.mxu1 %v6913_v8  ;;  %3656 = vmatprep.subr.bf16.mxu0 %v6918_v10  ;;  %v7891_v10 = vld [vmem:[#allocation7 + $0x2c] ss:$16 sps:$4 sm:$0xff]  }
 0x178   :  { %3723 = vmatprep.subr.bf16.mxu1 %v6921_v15  ;;  %6037 = vmatprep.mubr.msk.bf16.mxu1 %vm1177_vm0, %v7721_v51  ;;  %v6931_v51 = vld [vmem:[#allocation11 + $0x280] ss:$20 sps:$4 sm:$0xff]  }
 0x179   :  { %3674 = vmatprep.mubr.bf16.mxu0 %v7861_v21  ;;  %v1437_v27 = vpop.f32.mrf.mxu0 }
 0x17a   :  { %v1366_v52 = vpop.f32.mrf.mxu1  ;;  %3657 = vmatpush1.bf16.msra.mxu0 %v6916_v20  ;;  %v6949_v20 = vld [vmem:[#allocation11 + $0x1b8] ss:$20 sps:$4 sm:$0xff]  }
 0x17b   :  { %v7868_v33 = vadd.f32 %v1437_v27, %v1366_v52  ;;  %3724 = vmatpush1.bf16.msra.mxu1 %v6919_v60  ;;  %v1439_v35 = vpop.f32.mrf.mxu0  ;;  %3658 = vmatprep.subr.bf16.mxu0 %v6924_v23  ;;  %v6952_v60 = vld [vmem:[#allocation11 + $0xf8] ss:$20 sps:$4 sm:$0xff]   ;;  %v6960_v52 = vld [vmem:[#allocation11 + $0xd4] ss:$20 sps:$4 sm:$0xff]  }
 0x17c   :  { %v1368_v3 = vpop.f32.mrf.mxu1  ;;  %3725 = vmatprep.subr.bf16.mxu1 %v6927_v25 }
 0x17d   :  { %v7870_v37 = vadd.f32 %v1439_v35, %v1368_v3  ;;  %v1441_v9 = vpop.f32.mrf.mxu0  ;;  %v7900_v3 = vld [vmem:[#allocation7 + $0x28] ss:$16 sps:$4 sm:$0xff]  }
 0x17e   :  { %v1370_v40 = vpop.f32.mrf.mxu1  ;;  %2739 = vmatmul.mubr.bf16.gmra.mxu1 %v7728_v43  ;;  %3659 = vmatpush2.bf16.msra.mxu0 %v6922_v26  ;;  %v6945_v43 = vld [vmem:[#allocation11 + $0x1e4] ss:$20 sps:$4 sm:$0xff]   ;;  %v6957_v26 = vld [vmem:[#allocation11 + $0x194] ss:$20 sps:$4 sm:$0xff]  }
 0x17f   :  { %v7875_v59 = vadd.f32 %v1441_v9, %v1370_v40  ;;  %3726 = vmatpush1.bf16.msra.mxu1 %v6925_v30  ;;  %v7879_v61 = vpop.f32.mrf.mxu0  ;;  %3660 = vmatprep.subr.bf16.mxu0 %v6930_v31  ;;  %v6963_v9 = vld [vmem:[#allocation11 + $0x16c] ss:$20 sps:$4 sm:$0xff]  }
 0x180   :  { %v7877_v44 = vpop.f32.mrf.mxu1  ;;  %8484 = vst [vmem:[#allocation27_spill] sm:$0xff] %v7879_v61  ;;  %3727 = vmatprep.subr.bf16.mxu1 %v6933_v36  ;;  %6179 = vmatprep.mubr.msk.bf16.mxu1 %vm1177_vm0, %v7872_v38  ;;  %v6955_v36 = vld [vmem:[#allocation11 + $0x190] ss:$20 sps:$4 sm:$0xff]  }
 0x181   :  { %8483 = vst [vmem:[#allocation26_spill] sm:$0xff] %v7877_v44  ;;  %v1447_v18 = vpop.f32.mrf.mxu0  ;;  %v7020_v44 = vld [vmem:[#allocation11 + $0x214] ss:$20 sps:$4 sm:$0xff]  }
 0x182   :  { %v1376_v50 = vpop.f32.mrf.mxu1  ;;  %3661 = vmatpush2.bf16.msra.mxu0 %v6928_v29  ;;  %v6958_v29 = vld [vmem:[#allocation11 + $0xd0] ss:$20 sps:$4 sm:$0xff]  }
 0x183   :  { %v7883_v53 = vadd.f32 %v1447_v18, %v1376_v50  ;;  %3728 = vmatpush1.bf16.msra.mxu1 %v6931_v51  ;;  %v1449_v47 = vpop.f32.mrf.mxu0  ;;  %3662 = vmatprep.subr.bf16.mxu0 %v6936_v39  ;;  %v6966_v39 = vld [vmem:[#allocation11 + $0xac] ss:$20 sps:$4 sm:$0xff]   ;;  %v6961_v18 = vld [vmem:[#allocation11 + $0x168] ss:$20 sps:$4 sm:$0xff]  }
 0x184   :  { %v1378_v56 = vpop.f32.mrf.mxu1  ;;  %3743 = vmatprep.subr.bf16.mxu1 %v6939_v22 }
 0x185   :  { %v7887_v6 = vadd.f32 %v1449_v47, %v1378_v56  ;;  %v1451_v2 = vpop.f32.mrf.mxu0  ;;  %v6969_v47 = vld [vmem:[#allocation11 + $0x144] ss:$20 sps:$4 sm:$0xff]  }
 0x186   :  { %v1380_v0 = vpop.f32.mrf.mxu1  ;;  %3663 = vmatpush2.bf16.msra.mxu0 %v6934_v28  ;;  %v7908_v28 = vld [vmem:[#allocation7 + $0x4c] ss:$16 sps:$4 sm:$0xff]  }
 0x187   :  { %v7889_v8 = vadd.f32 %v1451_v2, %v1380_v0  ;;  %3744 = vmatpush2.bf16.msra.mxu1 %v6937_v49  ;;  %v7895_v15 = vpop.f32.mrf.mxu0  ;;  %3664 = vmatprep.subr.bf16.mxu0 %v6945_v43  ;;  %v6964_v43 = vld [vmem:[#allocation11 + $0xa8] ss:$20 sps:$4 sm:$0xff]  }
 0x188   :  { %v7893_v13 = vpop.f32.mrf.mxu1  ;;  %8486 = vst [vmem:[#allocation29_spill] sm:$0xff] %v7895_v15  ;;  %3784 = vmatprep.subr.bf16.mxu1 %v6948_v48  ;;  %v7002_v15 = vld [vmem:[#allocation11 + $0x264] ss:$20 sps:$4 sm:$0xff]  }
 0x189   :  { %8485 = vst [vmem:[#allocation28_spill] sm:$0xff] %v7893_v13  ;;  %v1457_v25 = vpop.f32.mrf.mxu0  ;;  %v7014_v13 = vld [vmem:[#allocation11 + $0x23c] ss:$20 sps:$4 sm:$0xff]  }
 0x18a   :  { %v1386_v23 = vpop.f32.mrf.mxu1  ;;  %3746 = vmatmul.mubr.bf16.vlgmr.msra.gmra.mxu1 %v7885_v57  ;;  %3665 = vmatpush2.bf16.msra.mxu0 %v6943_v5  ;;  %v6972_v5 = vld [vmem:[#allocation11 + $0x84] ss:$20 sps:$4 sm:$0xff]  }
 0x18b   :  { %v7898_v27 = vadd.f32 %v1457_v25, %v1386_v23  ;;  %3785 = vmatpush1.bf16.msra.mxu1 %v6946_v63  ;;  %v1459_v31 = vpop.f32.mrf.mxu0  ;;  %3666 = vmatprep.subr.bf16.mxu0 %v6951_v16  ;;  %v7917_v16 = vld [vmem:[#allocation7 + $0x48] ss:$16 sps:$4 sm:$0xff]   ;;  %v6970_v23 = vld [vmem:[#allocation11 + $0x80] ss:$20 sps:$4 sm:$0xff]  }
 0x18c   :  { %v1388_v30 = vpop.f32.mrf.mxu1  ;;  %3786 = vmatprep.subr.bf16.mxu1 %v6954_v54  ;;  %6180 = vmatprep.mubr.msk.bf16.mxu1 %vm1177_vm0, %v7891_v10  ;;  %v2759_v54 = vld [vmem:[#allocation7 + $0x68] sm:$0xff] }
 0x18d   :  { %v7902_v35 = vadd.f32 %v1459_v31, %v1388_v30  ;;  %v1461_v40 = vpop.f32.mrf.mxu0  ;;  %v6981_v30 = vld [vmem:[#allocation11 + $0x3a4] ss:$20 sps:$4 sm:$0xff]  }
 0x18e   :  { %v1390_v51 = vpop.f32.mrf.mxu1  ;;  %3667 = vmatpush2.bf16.msra.mxu0 %v6949_v20 }
 0x18f   :  { %v7906_v22 = vadd.f32 %v1461_v40, %v1390_v51  ;;  %3787 = vmatpush1.bf16.msra.mxu1 %v6952_v60  ;;  %v7912_v50 = vpop.f32.mrf.mxu0  ;;  %3668 = vmatprep.subr.bf16.mxu0 %v6957_v26  ;;  %v6967_v60 = vld [vmem:[#allocation11 + $0x140] ss:$20 sps:$4 sm:$0xff]   ;;  %v6976_v51 = vld [vmem:[#allocation11 + $0x58] ss:$20 sps:$4 sm:$0xff]  }
 0x190   :  { %v7910_v49 = vpop.f32.mrf.mxu1  ;;  %8488 = vst [vmem:[#allocation31_spill] sm:$0xff] %v7912_v50  ;;  %3788 = vmatprep.subr.bf16.mxu1 %v6960_v52  ;;  %v6978_v52 = vld [vmem:[#allocation11 + $0x5c] ss:$20 sps:$4 sm:$0xff]   ;;  %v6979_v40 = vld [vmem:[#allocation11 + $0x3a0] ss:$20 sps:$4 sm:$0xff]  }
 0x191   :  { %8487 = vst [vmem:[#allocation30_spill] sm:$0xff] %v7910_v49  ;;  %v1467_v56 = vpop.f32.mrf.mxu0 }
 0x192   :  { %v1396_v48 = vpop.f32.mrf.mxu1  ;;  %3756 = vmatmul.mubr.bf16.gmra.mxu1 %v7900_v3  ;;  %3669 = vmatpush2.bf16.msra.mxu0 %v6955_v36 }
 0x193   :  { %v7915_v63 = vadd.f32 %v1467_v56, %v1396_v48  ;;  %3789 = vmatpush1.bf16.msra.mxu1 %v6958_v29  ;;  %v1469_v2 = vpop.f32.mrf.mxu0  ;;  %3670 = vmatprep.subr.bf16.mxu0 %v6963_v9  ;;  %v7923_v29 = vld [vmem:[#allocation7] ss:$16 sps:$4 sm:$0xff]   ;;  %v7925_v9 = vcombine.high %v2759_v54, %v2759_v54  ;;  %v6984_v48 = vld [vmem:[#allocation11 + $0x34] ss:$20 sps:$4 sm:$0xff]  }
 0x194   :  { %v1398_v0 = vpop.f32.mrf.mxu1  ;;  %3790 = vmatprep.subr.bf16.mxu1 %v6966_v39  ;;  %6181 = vmatprep.mubr.msk.bf16.mxu1 %vm1177_vm0, %v7908_v28  ;;  %v6987_v56 = vld [vmem:[#allocation11 + $0x37c] ss:$20 sps:$4 sm:$0xff]  }
 0x195   :  { %v7919_v20 = vadd.f32 %v1469_v2, %v1398_v0  ;;  %v1471_v26 = vpop.f32.mrf.mxu0  ;;  %v7928_v0 = vld [vmem:[#allocation7 + $0x24] ss:$16 sps:$4 sm:$0xff]  }
 0x196   :  { %v1400_v25 = vpop.f32.mrf.mxu1  ;;  %3671 = vmatpush2.bf16.msra.mxu0 %v6961_v18  ;;  %v6996_v26 = vld [vmem:[#allocation11 + $0xc] ss:$20 sps:$4 sm:$0xff]  }
 0x197   :  { %3791 = vmatpush1.bf16.msra.mxu1 %v6964_v43  ;;  %v1472_v36 = vpop.f32.mrf.mxu0  ;;  %3672 = vmatprep.subr.bf16.mxu0 %v6969_v47  ;;  %v6982_v47 = vld [vmem:[#allocation11 + $0x30] ss:$20 sps:$4 sm:$0xff]  }
 0x198   :  { %v1401_v31 = vpop.f32.mrf.mxu1  ;;  %3792 = vmatprep.subr.bf16.mxu1 %v6972_v5  ;;  %v6985_v5 = vld [vmem:[#allocation11 + $0x378] ss:$20 sps:$4 sm:$0xff]   ;;  %v7933_v36 = vcombine.low %v2759_v54, %v2759_v54 }
 0x199   :  { %v6367_v39 = vpop.f32.mrf.mxu0  ;;  %v6999_v31 = vld [vmem:[#allocation11 + $0x354] ss:$20 sps:$4 sm:$0xff]   ;;  %v7005_v54 = vld [vmem:[#allocation11 + $0x32c] ss:$20 sps:$4 sm:$0xff]  }
 0x19a   :  { %3766 = vmatmul.mubr.bf16.gmra.mxu1 %v7917_v16  ;;  %3673 = vmatpush2.bf16.msra.mxu0 %v6967_v60 }
 0x19b   :  { %3793 = vmatpush1.bf16.msra.mxu1 %v6970_v23  ;;  %v6368_v18 = vpop.f32.mrf.mxu0  ;;  %3855 = vmatprep.subr.bf16.mxu0 %v6981_v30  ;;  %v7937_v30 = vld [vmem:[#allocation7 + $0x20] ss:$16 sps:$4 sm:$0xff]  }
 0x19c   :  { %3794 = vmatprep.subr.bf16.mxu1 %v6978_v52  ;;  %v6369_v43 = vadd.f32 %v6368_v18, %v6367_v39  ;;  %6182 = vmatprep.mubr.msk.bf16.mxu1 %vm1177_vm0, %v7925_v9  ;;  %v6994_v18 = vld [vmem:[#allocation11 + $0x8] ss:$20 sps:$4 sm:$0xff]  }
 0x19d   :  { %v6370_v2 = vpop.f32.mrf.mxu0  ;;  %3675 = vmatmul.mubr.bf16.vlgmr.msra.gmra.mxu0 %v7923_v29 }
 0x19e   :  { %v1572_v25 = vpop.f32.mrf.mxu1  ;;  %3856 = vmatpush1.bf16.msra.mxu0 %v6979_v40  ;;  %3684 = vmatprep.mubr.bf16.mxu0 %v7928_v0 }
 0x19f   :  { %v7935_v60 = vadd.f32 %v6369_v43, %v1572_v25  ;;  %3795 = vmatpush1.bf16.msra.mxu1 %v6976_v51  ;;  %v6371_v23 = vpop.f32.mrf.mxu0  ;;  %3857 = vmatprep.subr.bf16.mxu0 %v6987_v56  ;;  %v7943_v51 = vld [vmem:[#allocation7 + $0x44] ss:$16 sps:$4 sm:$0xff]   ;;  %v7003_v25 = vld [vmem:[#allocation11 + $0x328] ss:$20 sps:$4 sm:$0xff]  }
 0x1a0   :  { %v1574_v52 = vpop.f32.mrf.mxu1  ;;  %3796 = vmatprep.subr.bf16.mxu1 %v6984_v48  ;;  %v6372_v39 = vadd.f32 %v6371_v23, %v6370_v2  ;;  %v7000_v2 = vld [vmem:[#allocation11 + $0x260] ss:$20 sps:$4 sm:$0xff]  }
 0x1a1   :  { %v6373_v49 = vpop.f32.mrf.mxu0 }
 0x1a2   :  { %v1575_v50 = vpop.f32.mrf.mxu1  ;;  %3776 = vmatmul.mubr.bf16.gmra.mxu1 %v7933_v36  ;;  %3858 = vmatpush1.bf16.msra.mxu0 %v6985_v5 }
 0x1a3   :  { %v7941_v43 = vadd.f32 %v6372_v39, %v1575_v50  ;;  %3797 = vmatpush1.bf16.msra.mxu1 %v6982_v47  ;;  %v6374_v48 = vpop.f32.mrf.mxu0  ;;  %3859 = vmatprep.subr.bf16.mxu0 %v6999_v31  ;;  %v7017_v50 = vld [vmem:[#allocation11 + $0x304] ss:$20 sps:$4 sm:$0xff]  }
 0x1a4   :  { %v1577_v40 = vpop.f32.mrf.mxu1  ;;  %3798 = vmatprep.subr.bf16.mxu1 %v6996_v26  ;;  %v6375_v56 = vadd.f32 %v6374_v48, %v6373_v49  ;;  %3816 = vmatprep.mubr.bf16.mxu1 %v7861_v21  ;;  %v7949_v26 = vld [vmem:[#allocation7 + $0x40] ss:$16 sps:$4 sm:$0xff]   ;;  %v7012_v21 = vld [vmem:[#allocation11 + $0x238] ss:$20 sps:$4 sm:$0xff]  }
 0x1a5   :  { %3685 = vmatmul.mubr.bf16.gmra.mxu0 %v7937_v30  ;;  %v6376_v52 = vpop.f32.mrf.mxu0  ;;  %v2758_v49 = vld [vmem:[#allocation7 + $0x60] sm:$0xff] }
 0x1a6   :  { %v1580_v23 = vpop.f32.mrf.mxu1  ;;  %3860 = vmatpush1.bf16.msra.mxu0 %v6997_v62  ;;  %3694 = vmatprep.mubr.bf16.mxu0 %v7943_v51  ;;  %v7015_v40 = vld [vmem:[#allocation11 + $0x300] ss:$20 sps:$4 sm:$0xff]  }
 0x1a7   :  { %v7947_v39 = vadd.f32 %v6375_v56, %v1580_v23  ;;  %3799 = vmatpush1.bf16.msra.mxu1 %v6994_v18  ;;  %v6377_v5 = vpop.f32.mrf.mxu0  ;;  %3861 = vmatprep.subr.bf16.mxu0 %v7005_v54  ;;  %v7018_v54 = vld [vmem:[#allocation11 + $0x210] ss:$20 sps:$4 sm:$0xff]   ;;  %v7021_v23 = vld [vmem:[#allocation11 + $0x2d8] ss:$20 sps:$4 sm:$0xff]  }
 0x1a8   :  { %v1582_v47 = vpop.f32.mrf.mxu1  ;;  %3800 = vmatprep.subr.bf16.mxu1 %v7002_v15  ;;  %v6378_v31 = vadd.f32 %v6377_v5, %v6376_v52  ;;  %v7954_v52 = vcombine.high %v2758_v49, %v2758_v49 }
 0x1a9   :  { %v6379_v61 = vpop.f32.mrf.mxu0 }
 0x1aa   :  { %v1583_v48 = vpop.f32.mrf.mxu1  ;;  %3862 = vmatpush1.bf16.msra.mxu0 %v7003_v25 }
 0x1ab   :  { %v7952_v56 = vadd.f32 %v6378_v31, %v1583_v48  ;;  %3801 = vmatpush2.bf16.msra.mxu1 %v7000_v2  ;;  %v6380_v18 = vpop.f32.mrf.mxu0  ;;  %3863 = vmatprep.subr.bf16.mxu0 %v7017_v50  ;;  %v7030_v31 = vld [vmem:[#allocation11 + $0x1ec] ss:$20 sps:$4 sm:$0xff]   ;;  %v7031_v48 = vld [vmem:[#allocation11 + $0x2b0] ss:$20 sps:$4 sm:$0xff]  }
 0x1ac   :  { %v1585_v62 = vpop.f32.mrf.mxu1  ;;  %3802 = vmatprep.subr.bf16.mxu1 %v7014_v13  ;;  %v6381_v15 = vadd.f32 %v6380_v18, %v6379_v61  ;;  %v7033_v13 = vld [vmem:[#allocation11 + $0x2b4] ss:$20 sps:$4 sm:$0xff]   ;;  %v7960_v18 = vcombine.low %v2758_v49, %v2758_v49 }
 0x1ad   :  { %3695 = vmatmul.mubr.bf16.gmra.mxu0 %v7949_v26  ;;  %v6382_v5 = vpop.f32.mrf.mxu0  ;;  %v7028_v61 = vld [vmem:[#allocation11 + $0x1e8] ss:$20 sps:$4 sm:$0xff]   ;;  %v7034_v49 = vld [vmem:[#allocation11 + $0x1c0] ss:$20 sps:$4 sm:$0xff]  }
 0x1ae   :  { %v1588_v47 = vpop.f32.mrf.mxu1  ;;  %3864 = vmatpush1.bf16.msra.mxu0 %v7015_v40  ;;  %3704 = vmatprep.mubr.bf16.mxu0 %v7954_v52 }
 0x1af   :  { %v7957_v17 = vadd.f32 %v6381_v15, %v1588_v47  ;;  %3803 = vmatpush2.bf16.msra.mxu1 %v7012_v21  ;;  %v6383_v25 = vpop.f32.mrf.mxu0  ;;  %3865 = vmatprep.subr.bf16.mxu0 %v7023_v11  ;;  %v7036_v21 = vld [vmem:[#allocation11 + $0x1c4] ss:$20 sps:$4 sm:$0xff]   ;;  %v7039_v11 = vld [vmem:[#allocation11 + $0x28c] ss:$20 sps:$4 sm:$0xff]  }
 0x1b0   :  { %v1590_v2 = vpop.f32.mrf.mxu1  ;;  %3804 = vmatprep.subr.bf16.mxu1 %v7020_v44  ;;  %v6384_v50 = vadd.f32 %v6383_v25, %v6382_v5  ;;  %v7037_v25 = vld [vmem:[#allocation11 + $0x288] ss:$20 sps:$4 sm:$0xff]  }
 0x1b1   :  { %8489 = vst [vmem:[#allocation32_spill] sm:$0xff] %v7957_v17  ;;  %v6385_v7 = vpop.f32.mrf.mxu0 }
 0x1b2   :  { %v1591_v62 = vpop.f32.mrf.mxu1  ;;  %3866 = vmatpush1.bf16.msra.mxu0 %v7021_v23  ;;  %v7045_v23 = vld [vmem:[#allocation11 + $0x3cc] ss:$20 sps:$4 sm:$0xff]  }
 0x1b3   :  { %v7962_v14 = vadd.f32 %v6384_v50, %v1591_v62  ;;  %3805 = vmatpush2.bf16.msra.mxu1 %v7018_v54  ;;  %3867 = vmatprep.subr.bf16.mxu0 %v7033_v13  ;;  %v6386_v44 = vpop.f32.mrf.mxu0  ;;  %v7042_v54 = vld [vmem:[#allocation11 + $0x19c] ss:$20 sps:$4 sm:$0xff]   ;;  %v7040_v13 = vld [vmem:[#allocation11 + $0x198] ss:$20 sps:$4 sm:$0xff]  }
 0x1b4   :  { %v1593_v40 = vpop.f32.mrf.mxu1  ;;  %3806 = vmatprep.subr.bf16.mxu1 %v7030_v31  ;;  %v6387_v15 = vadd.f32 %v6386_v44, %v6385_v7  ;;  %v7043_v62 = vld [vmem:[#allocation11 + $0x3c8] ss:$20 sps:$4 sm:$0xff]  }
 0x1b5   :  { %8490 = vst [vmem:[#allocation33_spill] sm:$0xff] %v7962_v14  ;;  %3705 = vmatmul.mubr.bf16.gmra.mxu0 %v7960_v18  ;;  %v6388_v5 = vpop.f32.mrf.mxu0  ;;  %v7049_v40 = vld [vmem:[#allocation11 + $0x268] ss:$20 sps:$4 sm:$0xff]   ;;  %v7317_v14 = vld [vmem:[#allocation7 + $0x4] ss:$16 sps:$4 sm:$0xff]  }
 0x1b6   :  { %v1596_v47 = vpop.f32.mrf.mxu1  ;;  %3868 = vmatpush1.bf16.msra.mxu0 %v7031_v48  ;;  %6183 = vmatprep.mubr.msk.bf16.mxu0 %vm1177_vm0, %v7872_v38  ;;  %v7048_v48 = vld [vmem:[#allocation11 + $0x174] ss:$20 sps:$4 sm:$0xff]  }
 0x1b7   :  { %3807 = vmatpush2.bf16.msra.mxu1 %v7028_v61  ;;  %v7965_v2 = vadd.f32 %v6387_v15, %v1596_v47  ;;  %3869 = vmatprep.subr.bf16.mxu0 %v7039_v11  ;;  %v6389_v31 = vpop.f32.mrf.mxu0  ;;  %v7050_v44 = vld [vmem:[#allocation11 + $0x128] ss:$20 sps:$4 sm:$0xff]   ;;  %v7053_v11 = vld [vmem:[#allocation11 + $0x14c] ss:$20 sps:$4 sm:$0xff]  }
 0x1b8   :  { %v1598_v50 = vpop.f32.mrf.mxu1  ;;  %3808 = vmatprep.subr.bf16.mxu1 %v7036_v21  ;;  %v7046_v21 = vld [vmem:[#allocation11 + $0x170] ss:$20 sps:$4 sm:$0xff]   ;;  %v7054_v15 = vld [vmem:[#allocation11 + $0x240] ss:$20 sps:$4 sm:$0xff]   ;;  %v7051_v38 = vld [vmem:[#allocation11 + $0x148] ss:$20 sps:$4 sm:$0xff]  }
 0x1b9   :  { %8491 = vst [vmem:[#allocation34_spill] sm:$0xff] %v7965_v2  ;;  %v7055_v5 = vld [vmem:[#allocation11 + $0x100] ss:$20 sps:$4 sm:$0xff]  }
 0x1ba   :  { %v1599_v7 = vpop.f32.mrf.mxu1  ;;  %3870 = vmatpush1.bf16.msra.mxu0 %v7037_v25  ;;  %v7057_v25 = vld [vmem:[#allocation11 + $0x218] ss:$20 sps:$4 sm:$0xff]  }
 0x1bb   :  { %3809 = vmatpush2.bf16.msra.mxu1 %v7034_v49  ;;  %3885 = vmatprep.subr.bf16.mxu0 %v7045_v23  ;;  %v7058_v23 = vld [vmem:[#allocation11 + $0xd8] ss:$20 sps:$4 sm:$0xff]   ;;  %v7060_v7 = vld [vmem:[#allocation11 + $0x1f0] ss:$20 sps:$4 sm:$0xff]  }
 0x1bc   :  { %v1600_v61 = vpop.f32.mrf.mxu1  ;;  %3810 = vmatprep.subr.bf16.mxu1 %v7042_v54  ;;  %v7056_v54 = vld [vmem:[#allocation11 + $0x3a8] ss:$20 sps:$4 sm:$0xff]  }
 0x1bd   :  { %v7061_v61 = vld [vmem:[#allocation11 + $0xb0] ss:$20 sps:$4 sm:$0xff]  }
 0x1be   :  { %3886 = vmatpush2.bf16.msra.mxu0 %v7043_v62  ;;  %v7059_v62 = vld [vmem:[#allocation11 + $0x380] ss:$20 sps:$4 sm:$0xff]  }
 0x1bf   :  { %3811 = vmatpush2.bf16.msra.mxu1 %v7040_v13  ;;  %6431 = vmatprep.subr.bf16.mxu0 %v7049_v40 }
 0x1c0   :  { %3812 = vmatprep.subr.bf16.mxu1 %v7048_v48  ;;  %v7063_v48 = vld [vmem:[#allocation11 + $0x1c8] ss:$20 sps:$4 sm:$0xff]  }
 0x1c1   :  { %3888 = vmatmul.mubr.bf16.vlgmr.msra.gmra.mxu0 %v7885_v57  ;;  %v8493_v57 = vmov 0  }
 0x1c2   :  { %v7969_v47 = vpop.f32.mrf.mxu1  ;;  %6432 = vmatpush3.bf16.msra.mxu0 %v7050_v44  ;;  %6184 = vmatprep.mubr.msk.bf16.mxu0 %vm1177_vm0, %v7891_v10  ;;  %v7062_v44 = vld [vmem:[#allocation11 + $0x358] ss:$20 sps:$4 sm:$0xff]  }
 0x1c3   :  { %3813 = vmatpush2.bf16.msra.mxu1 %v7046_v21  ;;  %6433 = vmatprep.subr.bf16.mxu0 %v7054_v15  ;;  %v7066_v15 = vld [vmem:[#allocation11 + $0x1a0] ss:$20 sps:$4 sm:$0xff]  }
 0x1c4   :  { %v7972_v49 = vpop.f32.mrf.mxu1  ;;  %3814 = vmatprep.subr.bf16.mxu1 %v7053_v11  ;;  %v7064_v11 = vld [vmem:[#allocation11 + $0x88] ss:$20 sps:$4 sm:$0xff]  }
 0x1c6   :  { %v7976_v50 = vpop.f32.mrf.mxu1  ;;  %6434 = vmatpush3.bf16.msra.mxu0 %v7055_v5 }
 0x1c7   :  { %3815 = vmatpush2.bf16.msra.mxu1 %v7051_v38  ;;  %6435 = vmatprep.subr.bf16.mxu0 %v7057_v25  ;;  %v7065_v25 = vld [vmem:[#allocation11 + $0x330] ss:$20 sps:$4 sm:$0xff]  }
 0x1c8   :  { %v7978_v31 = vpop.f32.mrf.mxu1  ;;  %3990 = vmatprep.subr.bf16.mxu1 %v8493_v57 }
 0x1c9   :  { %8492 = vst [vmem:[#allocation35_spill] sm:$0xff] %v7978_v31  ;;  %3898 = vmatmul.mubr.bf16.gmra.mxu0 %v7900_v3 }
 0x1ca   :  { %3817 = vmatmul.mubr.bf16.vlgmr.msra.gmra.mxu1 %v7923_v29  ;;  %v7983_v13 = vpop.f32.mrf.mxu1  ;;  %6436 = vmatpush3.bf16.msra.mxu0 %v7058_v23  ;;  %v7069_v23 = vld [vmem:[#allocation11 + $0x178] ss:$20 sps:$4 sm:$0xff]  }
 0x1cb   :  { %3991 = vmatpush1.bf16.msra.mxu1 %v7056_v54  ;;  %6437 = vmatprep.subr.bf16.mxu0 %v7060_v7  ;;  %v7067_v54 = vld [vmem:[#allocation11 + $0x60] ss:$20 sps:$4 sm:$0xff]  }
 0x1cc   :  { %3992 = vmatprep.subr.bf16.mxu1 %v8493_v57  ;;  %v7986_v40 = vpop.f32.mrf.mxu1  ;;  %3826 = vmatprep.mubr.bf16.mxu1 %v7928_v0 }
 0x1cd   :  { %6185 = vmatprep.mubr.msk.bf16.mxu0 %vm1177_vm0, %v7908_v28 }
 0x1ce   :  { %v7991_v21 = vpop.f32.mrf.mxu1  ;;  %6438 = vmatpush3.bf16.msra.mxu0 %v7061_v61  ;;  %v7068_v61 = vld [vmem:[#allocation11 + $0x308] ss:$20 sps:$4 sm:$0xff]  }
 0x1cf   :  { %3993 = vmatpush1.bf16.msra.mxu1 %v7059_v62  ;;  %6439 = vmatprep.subr.bf16.mxu0 %v7063_v48  ;;  %v7070_v48 = vld [vmem:[#allocation11 + $0x38] ss:$20 sps:$4 sm:$0xff]  }
 0x1d0   :  { %3994 = vmatprep.subr.bf16.mxu1 %v8493_v57  ;;  %v7994_v38 = vpop.f32.mrf.mxu1 }
 0x1d1   :  { %8494 = vst [vmem:[#allocation36_spill] sm:$0xff] %v7994_v38  ;;  %3908 = vmatmul.mubr.bf16.gmra.mxu0 %v7917_v16 }
 0x1d2   :  { %3827 = vmatmul.mubr.bf16.gmra.mxu1 %v7937_v30  ;;  %v7998_v5 = vpop.f32.mrf.mxu1  ;;  %6440 = vmatpush3.bf16.msra.mxu0 %v7064_v11 }
 0x1d3   :  { %3995 = vmatpush1.bf16.msra.mxu1 %v7062_v44  ;;  %6441 = vmatprep.subr.bf16.mxu0 %v7066_v15  ;;  %v7072_v44 = vld [vmem:[#allocation11 + $0x150] ss:$20 sps:$4 sm:$0xff]  }
 0x1d4   :  { %3996 = vmatprep.subr.bf16.mxu1 %v8493_v57  ;;  %v8001_v7 = vpop.f32.mrf.mxu1  ;;  %3836 = vmatprep.mubr.bf16.mxu1 %v7943_v51 }
 0x1d5   :  { %6186 = vmatprep.mubr.msk.bf16.mxu0 %vm1177_vm0, %v7925_v9 }
 0x1d6   :  { %v8006_v62 = vpop.f32.mrf.mxu1  ;;  %6442 = vmatpush3.bf16.msra.mxu0 %v7067_v54  ;;  %v7073_v54 = vld [vmem:[#allocation11 + $0x10] ss:$20 sps:$4 sm:$0xff]  }
 0x1d7   :  { %3997 = vmatpush1.bf16.msra.mxu1 %v7065_v25  ;;  %6443 = vmatprep.subr.bf16.mxu0 %v7069_v23  ;;  %v7071_v25 = vld [vmem:[#allocation11 + $0x2e0] ss:$20 sps:$4 sm:$0xff]  }
 0x1d8   :  { %3998 = vmatprep.subr.bf16.mxu1 %v8493_v57  ;;  %v8009_v11 = vpop.f32.mrf.mxu1 }
 0x1d9   :  { %8495 = vst [vmem:[#allocation37_spill] sm:$0xff] %v8009_v11  ;;  %v2368_v15 = vpop.f32.mrf.mxu0  ;;  %3918 = vmatmul.mubr.bf16.gmra.mxu0 %v7933_v36  ;;  %v7079_v11 = vld [vmem:[#allocation13 + $0xe4] ss:$16 sps:$4 sm:$0xff]  }
 0x1da   :  { %3837 = vmatmul.mubr.bf16.gmra.mxu1 %v7949_v26  ;;  %v8013_v38 = vpop.f32.mrf.mxu1  ;;  %v2369_v31 = vadd.f32 %v2368_v15, %v7798_v1  ;;  %6444 = vmatpush3.bf16.msra.mxu0 %v7070_v48 }
 0x1db   :  { %3999 = vmatpush1.bf16.msra.mxu1 %v7068_v61  ;;  %v2370_v45 = vpop.f32.mrf.mxu0  ;;  %6445 = vmatprep.subr.bf16.mxu0 %v7072_v44  ;;  %v7074_v44 = vld [vmem:[#allocation11 + $0x2b8] ss:$20 sps:$4 sm:$0xff]  }
 0x1dc   :  { %4000 = vmatprep.subr.bf16.mxu1 %v8493_v57  ;;  %v8017_v23 = vpop.f32.mrf.mxu1  ;;  %v8020_v24 = vadd.f32 %v7969_v47, %v2369_v31  ;;  %v2371_v2 = vadd.f32 %v2370_v45, %v7804_v12  ;;  %3846 = vmatprep.mubr.bf16.mxu1 %v7954_v52  ;;  %v7077_v12 = vld [vmem:[#allocation13 + $0xe0] ss:$16 sps:$4 sm:$0xff]   ;;  %v7318_v31 = vld [vmem:[#allocation7 + $0xc] ss:$16 sps:$4 sm:$0xff]  }
 0x1dd   :  { %3958 = vmatprep.mubr.bf16.mxu0 %v7317_v14  ;;  %v2372_v1 = vpop.f32.mrf.mxu0 }
 0x1de   :  { %v2473_v61 = vpop.f32.mrf.mxu1  ;;  %v8025_v48 = vadd.f32 %v7972_v49, %v2371_v2  ;;  %v2373_v15 = vadd.f32 %v2372_v1, %v7811_v19  ;;  %6446 = vmatpush3.bf16.msra.mxu0 %v7073_v54  ;;  %v7082_v2 = vld [vmem:[#allocation13 + $0xc4] ss:$16 sps:$4 sm:$0xff]   ;;  %v7075_v49 = vld [vmem:[#allocation11 + $0x290] ss:$20 sps:$4 sm:$0xff]  }
 0x1df   :  { %4001 = vmatpush1.bf16.msra.mxu1 %v7071_v25  ;;  %v8028_v17 = vpop.f32.mrf.mxu0  ;;  %5258 = vmatprep.subr.bf16.mxu0 %v7079_v11 }
 0x1e0   :  { %4002 = vmatprep.subr.bf16.mxu1 %v8493_v57  ;;  %v2474_v47 = vpop.f32.mrf.mxu1  ;;  %v8032_v45 = vadd.f32 %v7976_v50, %v2373_v15  ;;  %v7076_v15 = vld [vmem:[#allocation11 + $0x3d0] ss:$20 sps:$4 sm:$0xff]  }
 0x1e1   :  { %v2378_v14 = vpop.f32.mrf.mxu0  ;;  %3959 = vmatmul.mubr.bf16.vlgmr.msra.gmra.mxu0 %v7923_v29  ;;  %v7080_v29 = vld [vmem:[#allocation13 + $0xc0] ss:$16 sps:$4 sm:$0xff]  }
 0x1e2   :  { %3847 = vmatmul.mubr.bf16.gmra.mxu1 %v7960_v18  ;;  %v2379_v19 = vadd.f32 %v2378_v14, %v7822_v34  ;;  %3966 = vmatprep.mubr.bf16.mxu0 %v7928_v0  ;;  %v7085_v34 = vld [vmem:[#allocation13 + $0xa4] ss:$16 sps:$4 sm:$0xff]  }
 0x1e3   :  { %4003 = vmatpush1.bf16.msra.mxu1 %v7074_v44  ;;  %6187 = vmatprep.mubr.msk.bf16.mxu1 %vm1177_vm0, %v7318_v31  ;;  %v2380_v25 = vpop.f32.mrf.mxu0 }
 0x1e4   :  { %4004 = vmatprep.subr.bf16.mxu1 %v8493_v57  ;;  %v2381_v50 = vadd.f32 %v2380_v25, %v7826_v55  ;;  %v8042_v11 = vadd.f32 %v7983_v13, %v2379_v19  ;;  %5259 = vmatpush1.bf16.msra.mxu0 %v7077_v12  ;;  %v7112_v55 = vld [vmem:[#allocation13 + $0x2e4] ss:$16 sps:$4 sm:$0xff]   ;;  %v7083_v13 = vld [vmem:[#allocation13 + $0xa0] ss:$16 sps:$4 sm:$0xff]  }
 0x1e5   :  { %v2382_v54 = vpop.f32.mrf.mxu0  ;;  %5260 = vmatprep.subr.bf16.mxu0 %v7082_v2  ;;  %v7110_v12 = vld [vmem:[#allocation13 + $0x2e0] ss:$16 sps:$4 sm:$0xff]   ;;  %v7118_v2 = vld [vmem:[#allocation13 + $0x2c4] ss:$16 sps:$4 sm:$0xff]  }
 0x1e6   :  { %v2383_v1 = vadd.f32 %v2382_v54, %v7830_v42  ;;  %v8046_v61 = vadd.f32 %v7986_v40, %v2381_v50  ;;  %v7088_v42 = vld [vmem:[#allocation13 + $0x84] ss:$16 sps:$4 sm:$0xff]   ;;  %v7089_v54 = vld [vmem:[#allocation13 + $0x60] ss:$16 sps:$4 sm:$0xff]  }
 0x1e7   :  { %4005 = vmatpush1.bf16.msra.mxu1 %v7075_v49  ;;  %v8048_v44 = vpop.f32.mrf.mxu0  ;;  %v7086_v49 = vld [vmem:[#allocation13 + $0x80] ss:$16 sps:$4 sm:$0xff]   ;;  %v7091_v25 = vld [vmem:[#allocation13 + $0x64] ss:$16 sps:$4 sm:$0xff]  }
 0x1e8   :  { %4020 = vmatprep.subr.bf16.mxu1 %v8493_v57  ;;  %v8052_v0 = vadd.f32 %v7991_v21, %v2383_v1  ;;  %5261 = vmatpush1.bf16.msra.mxu0 %v7080_v29 }
 0x1e9   :  { %v2388_v47 = vpop.f32.mrf.mxu0  ;;  %3967 = vmatmul.mubr.bf16.gmra.mxu0 %v7937_v30  ;;  %5262 = vmatprep.subr.bf16.mxu0 %v7085_v34  ;;  %v7319_v30 = vld [vmem:[#allocation7 + $0x8] ss:$16 sps:$4 sm:$0xff]  }
 0x1ea   :  { %v2389_v40 = vadd.f32 %v2388_v47, %v7837_v46  ;;  %3974 = vmatprep.mubr.bf16.mxu0 %v7943_v51  ;;  %v7097_v47 = vld [vmem:[#allocation13 + $0x24] ss:$16 sps:$4 sm:$0xff]  }
 0x1eb   :  { %4021 = vmatpush2.bf16.msra.mxu1 %v7076_v15  ;;  %v2390_v14 = vpop.f32.mrf.mxu0  ;;  %v7130_v15 = vld [vmem:[#allocation13 + $0x284] ss:$16 sps:$4 sm:$0xff]  }
 0x1ec   :  { %5329 = vmatprep.subr.bf16.mxu1 %v7112_v55  ;;  %v2391_v19 = vadd.f32 %v2390_v14, %v7840_v32  ;;  %v8059_v21 = vadd.f32 %v7998_v5, %v2389_v40  ;;  %5263 = vmatpush1.bf16.msra.mxu0 %v7083_v13  ;;  %v7116_v32 = vld [vmem:[#allocation13 + $0x2c0] ss:$16 sps:$4 sm:$0xff]   ;;  %v7124_v5 = vld [vmem:[#allocation13 + $0x2a4] ss:$16 sps:$4 sm:$0xff]  }
 0x1ed   :  { %v2392_v31 = vpop.f32.mrf.mxu0  ;;  %5264 = vmatprep.subr.bf16.mxu0 %v7088_v42  ;;  %v7092_v13 = vld [vmem:[#allocation13 + $0x40] ss:$16 sps:$4 sm:$0xff]  }
 0x1ee   :  { %4023 = vmatmul.mubr.bf16.vlgmr.msra.gmra.mxu1 %v7319_v30  ;;  %v2393_v46 = vadd.f32 %v2392_v31, %v7846_v41  ;;  %v8063_v51 = vadd.f32 %v8001_v7, %v2391_v19  ;;  %v7094_v41 = vld [vmem:[#allocation13 + $0x44] ss:$16 sps:$4 sm:$0xff]   ;;  %v7134_v40 = vld [vmem:[#allocation13 + $0x260] ss:$16 sps:$4 sm:$0xff]  }
 0x1ef   :  { %6188 = vmatprep.mubr.msk.bf16.mxu1 %vm1177_vm0, %v7891_v10  ;;  %5330 = vmatpush1.bf16.msra.mxu1 %v7110_v12  ;;  %v8067_v50 = vpop.f32.mrf.mxu0  ;;  %v7122_v10 = vld [vmem:[#allocation13 + $0x2a0] ss:$16 sps:$4 sm:$0xff]   ;;  %v7142_v12 = vld [vmem:[#allocation13 + $0x244] ss:$16 sps:$4 sm:$0xff]  }
 0x1f0   :  { %5331 = vmatprep.subr.bf16.mxu1 %v7118_v2  ;;  %v8070_v29 = vadd.f32 %v8006_v62, %v2393_v46  ;;  %5265 = vmatpush1.bf16.msra.mxu0 %v7086_v49  ;;  %v7140_v2 = vld [vmem:[#allocation13 + $0x240] ss:$16 sps:$4 sm:$0xff]  }
 0x1f1   :  { %v2398_v34 = vpop.f32.mrf.mxu0  ;;  %3975 = vmatmul.mubr.bf16.gmra.mxu0 %v7949_v26  ;;  %5266 = vmatprep.subr.bf16.mxu0 %v7091_v25  ;;  %v7101_v49 = vld [vmem:[#allocation13 + $0x1e0] ss:$16 sps:$4 sm:$0xff]   ;;  %v7106_v25 = vld [vmem:[#allocation13 + $0x1c4] ss:$16 sps:$4 sm:$0xff]  }
 0x1f2   :  { %v2399_v7 = vadd.f32 %v2398_v34, %v7853_v58  ;;  %3982 = vmatprep.mubr.bf16.mxu0 %v7954_v52  ;;  %v7128_v52 = vld [vmem:[#allocation13 + $0x280] ss:$16 sps:$4 sm:$0xff]  }
 0x1f3   :  { %5332 = vmatpush1.bf16.msra.mxu1 %v7116_v32  ;;  %v2400_v1 = vpop.f32.mrf.mxu0 }
 0x1f4   :  { %5333 = vmatprep.subr.bf16.mxu1 %v7124_v5  ;;  %v2401_v55 = vadd.f32 %v2400_v1, %v7856_v4  ;;  %v8077_v62 = vadd.f32 %v8013_v38, %v2399_v7  ;;  %5267 = vmatpush1.bf16.msra.mxu0 %v7089_v54  ;;  %v7136_v4 = vld [vmem:[#allocation13 + $0x264] ss:$16 sps:$4 sm:$0xff]   ;;  %v7095_v38 = vld [vmem:[#allocation13 + $0x20] ss:$16 sps:$4 sm:$0xff]  }
 0x1f5   :  { %v2402_v26 = vpop.f32.mrf.mxu0  ;;  %5268 = vmatprep.subr.bf16.mxu0 %v7094_v41  ;;  %v7104_v41 = vld [vmem:[#allocation13 + $0x1c0] ss:$16 sps:$4 sm:$0xff]   ;;  %v7109_v1 = vld [vmem:[#allocation13 + $0x1a4] ss:$16 sps:$4 sm:$0xff]  }
 0x1f6   :  { %4031 = vmatmul.mubr.bf16.gmra.mxu1 %v7900_v3  ;;  %v8081_v58 = vadd.f32 %v8017_v23, %v2401_v55  ;;  %v7100_v3 = vld [vmem:[#allocation13 + $0x4] ss:$16 sps:$4 sm:$0xff]   ;;  %v7098_v23 = vld [vmem:[#allocation13] ss:$16 sps:$4 sm:$0xff]  }
 0x1f7   :  { %6189 = vmatprep.mubr.msk.bf16.mxu1 %vm1177_vm0, %v7908_v28  ;;  %5334 = vmatpush1.bf16.msra.mxu1 %v7122_v10  ;;  %v2403_v42 = vpop.f32.mrf.mxu0  ;;  %v7103_v28 = vld [vmem:[#allocation13 + $0x1e4] ss:$16 sps:$4 sm:$0xff]   ;;  %v7146_v55 = vld [vmem:[#allocation13 + $0x200] ss:$16 sps:$4 sm:$0xff]  }
 0x1f8   :  { %5335 = vmatprep.subr.bf16.mxu1 %v7130_v15  ;;  %5269 = vmatpush1.bf16.msra.mxu0 %v7092_v13 }
 0x1f9   :  { %3983 = vmatmul.mubr.bf16.gmra.mxu0 %v7960_v18  ;;  %5270 = vmatprep.subr.bf16.mxu0 %v7097_v47  ;;  %v7145_v18 = vld [vmem:[#allocation13 + $0x224] ss:$16 sps:$4 sm:$0xff]  }
 0x1fa   :  { %v7151_v47 = vld [vmem:[#allocation13 + $0x3e4] ss:$16 sps:$4 sm:$0xff]  }
 0x1fb   :  { %5336 = vmatpush1.bf16.msra.mxu1 %v7128_v52  ;;  %v7107_v52 = vld [vmem:[#allocation13 + $0x1a0] ss:$16 sps:$4 sm:$0xff]  }
 0x1fc   :  { %5337 = vmatprep.subr.bf16.mxu1 %v7136_v4  ;;  %5271 = vmatpush1.bf16.msra.mxu0 %v7095_v38 }
 0x1fd   :  { %v2581_v14 = vpop.f32.mrf.mxu0  ;;  %5272 = vmatprep.subr.bf16.mxu0 %v7100_v3  ;;  %v7149_v3 = vld [vmem:[#allocation13 + $0x3e0] ss:$16 sps:$4 sm:$0xff]  }
 0x1fe   :  { %4039 = vmatmul.mubr.bf16.gmra.mxu1 %v7917_v16  ;;  %v7143_v16 = vld [vmem:[#allocation13 + $0x220] ss:$16 sps:$4 sm:$0xff]  }
 0x1ff   :  { %6190 = vmatprep.mubr.msk.bf16.mxu1 %vm1177_vm0, %v7925_v9  ;;  %5338 = vmatpush1.bf16.msra.mxu1 %v7134_v40  ;;  %v2583_v19 = vpop.f32.mrf.mxu0  ;;  %v7148_v9 = vld [vmem:[#allocation13 + $0x204] ss:$16 sps:$4 sm:$0xff]  }
 0x200   :  { %5339 = vmatprep.subr.bf16.mxu1 %v7142_v12  ;;  %5273 = vmatpush1.bf16.msra.mxu0 %v7098_v23  ;;  %v7154_v12 = vld [vmem:[#allocation13 + $0x3c4] ss:$16 sps:$4 sm:$0xff]  }
 0x201   :  { %v2585_v30 = vpop.f32.mrf.mxu0  ;;  %5274 = vmatprep.subr.bf16.mxu0 %v7103_v28  ;;  %v7113_v28 = vld [vmem:[#allocation13 + $0x180] ss:$16 sps:$4 sm:$0xff]  }
 0x202   :  { %v2510_v31 = vpop.f32.mrf.mxu1 }
 0x203   :  { %v2511_v46 = vadd.f32 %v2510_v31, %v7868_v33  ;;  %5340 = vmatpush1.bf16.msra.mxu1 %v7140_v2  ;;  %v8090_v5 = vpop.f32.mrf.mxu0  ;;  %v7152_v31 = vld [vmem:[#allocation13 + $0x3c0] ss:$16 sps:$4 sm:$0xff]  }
 0x204   :  { %v2512_v32 = vpop.f32.mrf.mxu1  ;;  %5341 = vmatprep.subr.bf16.mxu1 %v7145_v18  ;;  %5275 = vmatpush2.bf16.msra.mxu0 %v7101_v49  ;;  %v7121_v18 = vld [vmem:[#allocation13 + $0x164] ss:$16 sps:$4 sm:$0xff]  }
 0x205   :  { %v8092_v54 = vadd.f32 %v2581_v14, %v2511_v46  ;;  %v2513_v34 = vadd.f32 %v2512_v32, %v7870_v37  ;;  %v2591_v10 = vpop.f32.mrf.mxu0  ;;  %5276 = vmatprep.subr.bf16.mxu0 %v7106_v25  ;;  %v7157_v46 = vld [vmem:[#allocation13 + $0x3a4] ss:$16 sps:$4 sm:$0xff]  }
 0x206   :  { %v2514_v7 = vpop.f32.mrf.mxu1  ;;  %4047 = vmatmul.mubr.bf16.gmra.mxu1 %v7933_v36  ;;  %v7115_v36 = vld [vmem:[#allocation13 + $0x184] ss:$16 sps:$4 sm:$0xff]  }
 0x207   :  { %v8096_v33 = vadd.f32 %v2583_v19, %v2513_v34  ;;  %v2515_v15 = vadd.f32 %v2514_v7, %v7875_v59  ;;  %5342 = vmatpush1.bf16.msra.mxu1 %v7143_v16  ;;  %v2593_v26 = vpop.f32.mrf.mxu0  ;;  %v7127_v34 = vld [vmem:[#allocation13 + $0x144] ss:$16 sps:$4 sm:$0xff]   ;;  %v7155_v7 = vld [vmem:[#allocation13 + $0x3a0] ss:$16 sps:$4 sm:$0xff]  }
 0x208   :  { %v8099_v13 = vpop.f32.mrf.mxu1  ;;  %5343 = vmatprep.subr.bf16.mxu1 %v7148_v9  ;;  %5277 = vmatpush2.bf16.msra.mxu0 %v7104_v41 }
 0x209   :  { %v8101_v37 = vadd.f32 %v2585_v30, %v2515_v15  ;;  %v2595_v4 = vpop.f32.mrf.mxu0  ;;  %5278 = vmatprep.subr.bf16.mxu0 %v7109_v1  ;;  %v7160_v1 = vld [vmem:[#allocation13 + $0x384] ss:$16 sps:$4 sm:$0xff]  }
 0x20a   :  { %v2520_v42 = vpop.f32.mrf.mxu1 }
 0x20b   :  { %v2521_v38 = vadd.f32 %v2520_v42, %v7883_v53  ;;  %5344 = vmatpush1.bf16.msra.mxu1 %v7146_v55  ;;  %v8104_v40 = vpop.f32.mrf.mxu0  ;;  %v7133_v42 = vld [vmem:[#allocation13 + $0x124] ss:$16 sps:$4 sm:$0xff]  }
 0x20c   :  { %v2522_v59 = vpop.f32.mrf.mxu1  ;;  %5345 = vmatprep.subr.bf16.mxu1 %v7151_v47  ;;  %5279 = vmatpush2.bf16.msra.mxu0 %v7107_v52 }
 0x20d   :  { %v8106_v23 = vadd.f32 %v2591_v10, %v2521_v38  ;;  %v2523_v14 = vadd.f32 %v2522_v59, %v7887_v6  ;;  %v2601_v19 = vpop.f32.mrf.mxu0  ;;  %5280 = vmatprep.subr.bf16.mxu0 %v7115_v36  ;;  %v7119_v6 = vld [vmem:[#allocation13 + $0x160] ss:$16 sps:$4 sm:$0xff]   ;;  %v7163_v59 = vld [vmem:[#allocation13 + $0x364] ss:$16 sps:$4 sm:$0xff]  }
 0x20e   :  { %v2524_v2 = vpop.f32.mrf.mxu1  ;;  %v7158_v36 = vld [vmem:[#allocation13 + $0x380] ss:$16 sps:$4 sm:$0xff]  }
 0x20f   :  { %v8109_v49 = vadd.f32 %v2593_v26, %v2523_v14  ;;  %v2525_v53 = vadd.f32 %v2524_v2, %v7889_v8  ;;  %5346 = vmatpush2.bf16.msra.mxu1 %v7149_v3  ;;  %v2603_v25 = vpop.f32.mrf.mxu0  ;;  %v7125_v26 = vld [vmem:[#allocation13 + $0x140] ss:$16 sps:$4 sm:$0xff]   ;;  %v7139_v2 = vld [vmem:[#allocation13 + $0x104] ss:$16 sps:$4 sm:$0xff]  }
 0x210   :  { %v8112_v30 = vpop.f32.mrf.mxu1  ;;  %5347 = vmatprep.subr.bf16.mxu1 %v7154_v12  ;;  %5281 = vmatpush2.bf16.msra.mxu0 %v7113_v28 }
 0x211   :  { %v8114_v16 = vadd.f32 %v2595_v4, %v2525_v53  ;;  %v2605_v9 = vpop.f32.mrf.mxu0  ;;  %5282 = vmatprep.subr.bf16.mxu0 %v7121_v18  ;;  %v7161_v18 = vld [vmem:[#allocation13 + $0x360] ss:$16 sps:$4 sm:$0xff]  }
 0x212   :  { %v2530_v32 = vpop.f32.mrf.mxu1 }
 0x213   :  { %v2531_v41 = vadd.f32 %v2530_v32, %v7898_v27  ;;  %5348 = vmatpush2.bf16.msra.mxu1 %v7152_v31  ;;  %v8117_v10 = vpop.f32.mrf.mxu0  ;;  %v7166_v31 = vld [vmem:[#allocation13 + $0x344] ss:$16 sps:$4 sm:$0xff]  }
 0x214   :  { %v2532_v8 = vpop.f32.mrf.mxu1  ;;  %5349 = vmatprep.subr.bf16.mxu1 %v7157_v46  ;;  %5283 = vmatpush2.bf16.msra.mxu0 %v7119_v6  ;;  %v7137_v6 = vld [vmem:[#allocation13 + $0x100] ss:$16 sps:$4 sm:$0xff]  }
 0x215   :  { %v8119_v15 = vadd.f32 %v2601_v19, %v2531_v41  ;;  %v2533_v55 = vadd.f32 %v2532_v8, %v7902_v35  ;;  %v2611_v52 = vpop.f32.mrf.mxu0  ;;  %5284 = vmatprep.subr.bf16.mxu0 %v7127_v34  ;;  %v7131_v35 = vld [vmem:[#allocation13 + $0x120] ss:$16 sps:$4 sm:$0xff]   ;;  %v7178_v34 = vld [vmem:[#allocation13 + $0x4e4] ss:$16 sps:$4 sm:$0xff]  }
 0x216   :  { %v2534_v47 = vpop.f32.mrf.mxu1 }
 0x217   :  { %v8122_v4 = vadd.f32 %v2603_v25, %v2533_v55  ;;  %v2535_v27 = vadd.f32 %v2534_v47, %v7906_v22  ;;  %5350 = vmatpush2.bf16.msra.mxu1 %v7155_v7  ;;  %v2613_v3 = vpop.f32.mrf.mxu0  ;;  %v7167_v47 = vld [vmem:[#allocation13 + $0x320] ss:$16 sps:$4 sm:$0xff]  }
 0x218   :  { %v8125_v38 = vpop.f32.mrf.mxu1  ;;  %5351 = vmatprep.subr.bf16.mxu1 %v7160_v1  ;;  %5285 = vmatpush2.bf16.msra.mxu0 %v7125_v26  ;;  %v7169_v1 = vld [vmem:[#allocation13 + $0x324] ss:$16 sps:$4 sm:$0xff]  }
 0x219   :  { %v8127_v12 = vadd.f32 %v2605_v9, %v2535_v27  ;;  %v2615_v28 = vpop.f32.mrf.mxu0  ;;  %5286 = vmatprep.subr.bf16.mxu0 %v7133_v42  ;;  %v7172_v42 = vld [vmem:[#allocation13 + $0x304] ss:$16 sps:$4 sm:$0xff]  }
 0x21a   :  { %v2540_v14 = vpop.f32.mrf.mxu1 }
 0x21b   :  { %v2541_v19 = vadd.f32 %v2540_v14, %v7915_v63  ;;  %5352 = vmatpush2.bf16.msra.mxu1 %v7158_v36  ;;  %v2616_v53 = vpop.f32.mrf.mxu0  ;;  %v7164_v63 = vld [vmem:[#allocation13 + $0x340] ss:$16 sps:$4 sm:$0xff]  }
 0x21c   :  { %v2542_v22 = vpop.f32.mrf.mxu1  ;;  %5353 = vmatprep.subr.bf16.mxu1 %v7163_v59  ;;  %5287 = vmatpush2.bf16.msra.mxu0 %v7131_v35  ;;  %v7170_v14 = vld [vmem:[#allocation13 + $0x300] ss:$16 sps:$4 sm:$0xff]  }
 0x21d   :  { %v8130_v25 = vadd.f32 %v2611_v52, %v2541_v19  ;;  %v2543_v46 = vadd.f32 %v2542_v22, %v7919_v20  ;;  %v6407_v9 = vpop.f32.mrf.mxu0  ;;  %5288 = vmatprep.subr.bf16.mxu0 %v7139_v2  ;;  %v7175_v19 = vld [vmem:[#allocation13 + $0xec] ss:$16 sps:$4 sm:$0xff]  }
 0x21e   :  { %v2544_v32 = vpop.f32.mrf.mxu1 }
 0x21f   :  { %8496 = vst [vmem:[#allocation38_spill] sm:$0xff] %v8130_v25  ;;  %v8133_v41 = vadd.f32 %v2613_v3, %v2543_v46  ;;  %5354 = vmatpush2.bf16.msra.mxu1 %v7161_v18  ;;  %v6408_v8 = vpop.f32.mrf.mxu0 }
 0x220   :  { %v2545_v7 = vpop.f32.mrf.mxu1  ;;  %5355 = vmatprep.subr.bf16.mxu1 %v7166_v31  ;;  %v6409_v55 = vadd.f32 %v6408_v8, %v6407_v9  ;;  %5289 = vmatpush2.bf16.msra.mxu0 %v7137_v6 }
 0x221   :  { %8497 = vst [vmem:[#allocation39_spill] sm:$0xff] %v8133_v41  ;;  %v6410_v26 = vpop.f32.mrf.mxu0  ;;  %5400 = vmatprep.subr.bf16.mxu0 %v7178_v34 }
 0x222   :  { %v2653_v20 = vadd.f32 %v6409_v55, %v7935_v60 }
 0x223   :  { %5356 = vmatpush2.bf16.msra.mxu1 %v7164_v63  ;;  %v6411_v52 = vpop.f32.mrf.mxu0 }
 0x224   :  { %5357 = vmatprep.subr.bf16.mxu1 %v7169_v1  ;;  %v6412_v27 = vadd.f32 %v6411_v52, %v6410_v26 }
 0x225   :  { %v6413_v36 = vpop.f32.mrf.mxu0 }
 0x226   :  { %v2716_v3 = vpop.f32.mrf.mxu1  ;;  %v2656_v35 = vadd.f32 %v6412_v27, %v7941_v43 }
 0x227   :  { %v8136_v59 = vadd.f32 %v2716_v3, %v2653_v20  ;;  %5358 = vmatpush2.bf16.msra.mxu1 %v7167_v47  ;;  %v6414_v28 = vpop.f32.mrf.mxu0  ;;  %v8502_v47 = vld [vmem:[#allocation32_spill] sm:$0xff] }
 0x228   :  { %v2718_v2 = vpop.f32.mrf.mxu1  ;;  %5359 = vmatprep.subr.bf16.mxu1 %v7172_v42  ;;  %v6415_v18 = vadd.f32 %v6414_v28, %v6413_v36 }
 0x229   :  { %8498 = vst [vmem:[#allocation40_spill] sm:$0xff] %v8136_v59  ;;  %v6416_v60 = vpop.f32.mrf.mxu0 }
 0x22a   :  { %v2719_v22 = vpop.f32.mrf.mxu1  ;;  %v2661_v31 = vadd.f32 %v6415_v18, %v7947_v39 }
 0x22b   :  { %v8139_v53 = vadd.f32 %v2719_v22, %v2656_v35  ;;  %5360 = vmatpush2.bf16.msra.mxu1 %v7170_v14  ;;  %v6417_v46 = vpop.f32.mrf.mxu0  ;;  %v8504_v14 = vld [vmem:[#allocation33_spill] sm:$0xff] }
 0x22c   :  { %v2721_v6 = vpop.f32.mrf.mxu1  ;;  %5471 = vmatprep.subr.bf16.mxu1 %v7175_v19  ;;  %v6418_v32 = vadd.f32 %v6417_v46, %v6416_v60 }
 0x22d   :  { %8499 = vst [vmem:[#allocation41_spill] sm:$0xff] %v8139_v53  ;;  %v6419_v9 = vpop.f32.mrf.mxu0 }
 0x22e   :  { %v2724_v43 = vpop.f32.mrf.mxu1  ;;  %v2664_v63 = vadd.f32 %v6418_v32, %v7952_v56 }
 0x22f   :  { %v8142_v34 = vadd.f32 %v2724_v43, %v2661_v31  ;;  %v6420_v7 = vpop.f32.mrf.mxu0  ;;  %v8506_v31 = vld [vmem:[#allocation34_spill] sm:$0xff] }
 0x230   :  { %v2726_v8 = vpop.f32.mrf.mxu1  ;;  %v6421_v1 = vadd.f32 %v6420_v7, %v6419_v9 }
 0x231   :  { %8500 = vst [vmem:[#allocation42_spill] sm:$0xff] %v8142_v34  ;;  %v6422_v55 = vpop.f32.mrf.mxu0  ;;  %v8512_v34 = vld [vmem:[#allocation35_spill] sm:$0xff] }
 0x232   :  { %v2727_v26 = vpop.f32.mrf.mxu1  ;;  %v2669_v39 = vadd.f32 %v6421_v1, %v8502_v47 }
 0x233   :  { %v8145_v20 = vadd.f32 %v2727_v26, %v2664_v63  ;;  %v6423_v52 = vpop.f32.mrf.mxu0 }
 0x234   :  { %v2729_v42 = vpop.f32.mrf.mxu1  ;;  %v6424_v27 = vadd.f32 %v6423_v52, %v6422_v55  ;;  %v4091_v52 = vlaneseq }
 0x235   :  { %8501 = vst [vmem:[#allocation43_spill] sm:$0xff] %v8145_v20  ;;  %v6425_v36 = vpop.f32.mrf.mxu0 }
 0x236   :  { %v2732_v3 = vpop.f32.mrf.mxu1  ;;  %v2672_v28 = vadd.f32 %v6424_v27, %v8504_v14 }
 0x237   :  { %v8148_v35 = vadd.f32 %v2732_v3, %v2669_v39  ;;  %v6426_v2 = vpop.f32.mrf.mxu0 }
 0x238   :  { %v2734_v56 = vpop.f32.mrf.mxu1  ;;  %v6427_v19 = vadd.f32 %v6426_v2, %v6425_v36  ;;  %v8156_v36 = vshrl.u32 %v4091_v52, 7  ;;  %v8164_v2 = vld [vmem:[%s8469_s6] sm:$0x1f] }
 0x239   :  { %8503 = vst [vmem:[#allocation32_spill] sm:$0xff] %v8148_v35  ;;  %v6428_v60 = vpop.f32.mrf.mxu0 }
 0x23a   :  { %v2735_v18 = vpop.f32.mrf.mxu1  ;;  %v2677_v46 = vadd.f32 %v6427_v19, %v8506_v31  ;;  %v8476_v19 = vsub.s32 1, %v8156_v36 }
 0x23b   :  { %v8151_v22 = vadd.f32 %v2735_v18, %v2672_v28  ;;  %v6429_v32 = vpop.f32.mrf.mxu0  ;;  %v8475_v28 = vsub.s32 0, %v8156_v36 }
 0x23c   :  { %v2737_v6 = vpop.f32.mrf.mxu1  ;;  %v8509_v32 = vld [vmem:[#allocation20_spill] sm:$0xff] }
 0x23d   :  { %8505 = vst [vmem:[#allocation33_spill] sm:$0xff] %v8151_v22  ;;  %v8508_v6 = vld [vmem:[#allocation23_spill] sm:$0xff] }
 0x23e   :  { %v2740_v9 = vpop.f32.mrf.mxu1 }
 0x23f   :  { %v8154_v43 = vadd.f32 %v2740_v9, %v2677_v46  ;;  %v8174_v46 = vrot.slane %v8164_v2, %v8475_v28  ;;  %v1302_v9 = vadd.f32 %v8509_v32, %v8508_v6 }
 0x240   :  { %v2742_v63 = vpop.f32.mrf.mxu1 }
 0x241   :  { %8507 = vst [vmem:[#allocation34_spill] sm:$0xff] %v8154_v43  ;;  %v8184_v43 = vrot.slane %v8164_v2, %v8476_v19 }
 0x242   :  { %v2743_v7 = vpop.f32.mrf.mxu1 }
 0x244   :  { %v2744_v8 = vpop.f32.mrf.mxu1 }
 0x24a   :  { %v3747_v1 = vpop.f32.mrf.mxu1 }
 0x24c   :  { %v3749_v55 = vpop.f32.mrf.mxu1 }
 0x24e   :  { %v3751_v26 = vpop.f32.mrf.mxu1 }
 0x250   :  { %v3753_v47 = vpop.f32.mrf.mxu1 }
 0x252   :  { %v3757_v39 = vpop.f32.mrf.mxu1 }
 0x254   :  { %v3759_v42 = vpop.f32.mrf.mxu1 }
 0x256   :  { %v3761_v27 = vpop.f32.mrf.mxu1 }
 0x258   :  { %v3763_v3 = vpop.f32.mrf.mxu1 }
 0x25a   :  { %v8158_v14 = vpop.f32.mrf.mxu1 }
 0x25c   :  { %v8166_v56 = vpop.f32.mrf.mxu1 }
 0x25d   :  { %v3676_v18 = vpop.f32.mrf.mxu0 }
 0x25e   :  { %v8169_v60 = vpop.f32.mrf.mxu1  ;;  %v3748_v31 = vadd.f32 %v3747_v1, %v3676_v18  ;;  %v2375_v1 = vadd.f32 %v8028_v17, %v1302_v9 }
 0x25f   :  { %v3678_v63 = vpop.f32.mrf.mxu0 }
 0x260   :  { %v8178_v7 = vpop.f32.mrf.mxu1  ;;  %v4054_v8 = vadd.f32 %v3748_v31, %v8020_v24  ;;  %v3750_v52 = vadd.f32 %v3749_v55, %v3678_v63  ;;  %v8510_v31 = vld [vmem:[#allocation24_spill] sm:$0xff]  ;;  %v8511_v63 = vld [vmem:[#allocation21_spill] sm:$0xff]  ;;  %v2446_v17 = vadd.f32 %v8512_v34, %v2375_v1 }
 0x261   :  { %v3680_v18 = vpop.f32.mrf.mxu0  ;;  %v1312_v19 = vadd.f32 %v8511_v63, %v8510_v31 }
 0x262   :  { %v8187_v22 = vpop.f32.mrf.mxu1  ;;  %v4116_v28 = vadd.f32 %v8174_v46, %v4054_v8  ;;  %v4055_v6 = vadd.f32 %v3750_v52, %v8025_v48  ;;  %v3752_v32 = vadd.f32 %v3751_v26, %v3680_v18 }
 0x263   :  { %v3682_v35 = vpop.f32.mrf.mxu0  ;;  %v2385_v8 = vadd.f32 %v8048_v44, %v1312_v19  ;;  %v8513_v19 = vld [vmem:[#allocation25_spill] sm:$0xff] }
 0x264   :  { %v8191_v20 = vpop.f32.mrf.mxu1  ;;  %v4117_v24 = vadd.f32 %v8184_v43, %v4055_v6  ;;  %v4059_v55 = vadd.f32 %v3752_v32, %v8032_v45  ;;  %v4186_v9 = vmul.f32 0.2, %v4116_v28  ;;  %v3754_v53 = vadd.f32 %v3753_v47, %v3682_v35 }
 0x265   :  { %v3686_v59 = vpop.f32.mrf.mxu0  ;;  %vm4151_vm1 = vcmp.gt.f32.partialorder %v4116_v28, 0.0 }
 0x266   :  { %v3781_v41 = vpop.f32.mrf.mxu1  ;;  %v4121_v48 = vadd.f32 %v8174_v46, %v4059_v55  ;;  %v3758_v26 = vadd.f32 %v3757_v39, %v3686_v59  ;;  %v4187_v52 = vmul.f32 0.2, %v4117_v24  ;;  %v4060_v18 = vadd.f32 %v3754_v53, %v2446_v17  ;;  %v8514_v55 = vld [vmem:[#allocation22_spill] sm:$0xff] }
 0x267   :  { %v3688_v6 = vpop.f32.mrf.mxu0  ;;  %v4221_v34 = vsel %vm4151_vm1, %v4116_v28, %v4186_v9  ;;  %vm4152_vm3 = vcmp.gt.f32.partialorder %v4117_v24, 0.0 }
 0x268   :  { %v3782_v25 = vpop.f32.mrf.mxu1  ;;  %vm4156_vm2 = vcmp.gt.f32.partialorder %v4121_v48, 0.0  ;;  %v4191_v45 = vmul.f32 0.2, %v4121_v48  ;;  %v4064_v32 = vadd.f32 %v3758_v26, %v8042_v11  ;;  %v3760_v31 = vadd.f32 %v3759_v42, %v3688_v6  ;;  %v8515_v42 = vld [vmem:[#allocation36_spill] sm:$0xff] }
 0x269   :  { %v4122_v35 = vadd.f32 %v8184_v43, %v4060_v18  ;;  %v3690_v47 = vpop.f32.mrf.mxu0  ;;  %v1322_v11 = vadd.f32 %v8514_v55, %v8513_v19  ;;  %v2456_v28 = vadd.f32 %v8515_v42, %v2385_v8  ;;  %v4222_v17 = vsel %vm4152_vm3, %v4117_v24, %v4187_v52  ;;  %v7190_v55 = vld [vmem:[#allocation13 + $0x4a4] ss:$16 sps:$4 sm:$0xff]  }
 0x26a   :  { %v4226_v41 = vsel %vm4156_vm2, %v4121_v48, %v4191_v45  ;;  %v4126_v1 = vadd.f32 %v8174_v46, %v4064_v32  ;;  %v4065_v59 = vadd.f32 %v3760_v31, %v8046_v61  ;;  %v3762_v44 = vadd.f32 %v3761_v27, %v3690_v47  ;;  %v7176_v32 = vld [vmem:[#allocation13 + $0x4e0] ss:$16 sps:$4 sm:$0xff]  }
 0x26b   :  { %v8204_v39 = vpack.c.bf16 %v4226_v41, %v4221_v34  ;;  %v4192_v53 = vmul.f32 0.2, %v4122_v35  ;;  %v3692_v25 = vpop.f32.mrf.mxu0  ;;  %vm4157_vm4 = vcmp.gt.f32.partialorder %v4122_v35, 0.0  ;;  %v2395_v31 = vadd.f32 %v8067_v50, %v1322_v11  ;;  %v8516_v11 = vld [vmem:[#allocation37_spill] sm:$0xff] }
 0x26c   :  { %v4069_v63 = vadd.f32 %v3762_v44, %v8052_v0  ;;  %v4196_v9 = vmul.f32 0.2, %v4126_v1  ;;  %v4127_v48 = vadd.f32 %v8184_v43, %v4065_v59  ;;  %v3764_v26 = vadd.f32 %v3763_v3, %v3692_v25  ;;  %v7184_v0 = vld [vmem:[#allocation13 + $0x4c4] ss:$16 sps:$4 sm:$0xff]  }
 0x26d   :  { %v3696_v18 = vpop.f32.mrf.mxu0  ;;  %v4227_v61 = vsel %vm4157_vm4, %v4122_v35, %v4192_v53  ;;  %vm4161_vm5 = vcmp.gt.f32.partialorder %v4126_v1, 0.0  ;;  %v2466_v42 = vadd.f32 %v8516_v11, %v2395_v31 }
 0x26e   :  { %v4131_v27 = vadd.f32 %v8174_v46, %v4069_v63  ;;  %v3768_v6 = vadd.f32 %v8158_v14, %v3696_v18  ;;  %v8213_v45 = vpack.c.bf16 %v4227_v61, %v4222_v17  ;;  %v4070_v8 = vadd.f32 %v3764_v26, %v2456_v28 }
 0x26f   :  { %v3698_v34 = vpop.f32.mrf.mxu0  ;;  %v4197_v35 = vmul.f32 0.2, %v4127_v48  ;;  %vm4162_vm7 = vcmp.gt.f32.partialorder %v4127_v48, 0.0  ;;  %v4231_v50 = vsel %vm4161_vm5, %v4126_v1, %v4196_v9 }
 0x270   :  { %vm4166_vm6 = vcmp.gt.f32.partialorder %v4131_v27, 0.0  ;;  %v4201_v24 = vmul.f32 0.2, %v4131_v27  ;;  %v4074_v52 = vadd.f32 %v3768_v6, %v8059_v21  ;;  %v3770_v3 = vadd.f32 %v8166_v56, %v3698_v34  ;;  %5290 = vmatprep.mubr.bf16.mxu0 %v8213_v45  ;;  %v7182_v56 = vld [vmem:[#allocation13 + $0x4c0] ss:$16 sps:$4 sm:$0xff]  }
 0x271   :  { %v4132_v47 = vadd.f32 %v8184_v43, %v4070_v8  ;;  %5291 = vmatmul.mubr.bf16.vlgmr.msra.gmra.mxu0 %v8204_v39  ;;  %v3700_v14 = vpop.f32.mrf.mxu0 }
 0x272   :  { %v4136_v41 = vadd.f32 %v8174_v46, %v4074_v52  ;;  %v4075_v59 = vadd.f32 %v3770_v3, %v8063_v51  ;;  %v3772_v44 = vadd.f32 %v8169_v60, %v3700_v14  ;;  %v4236_v21 = vsel %vm4166_vm6, %v4131_v27, %v4201_v24  ;;  %5401 = vmatpush1.bf16.msra.mxu0 %v7176_v32  ;;  %v7188_v27 = vld [vmem:[#allocation13 + $0x4a0] ss:$16 sps:$4 sm:$0xff]   ;;  %v7196_v32 = vld [vmem:[#allocation13 + $0x484] ss:$16 sps:$4 sm:$0xff]  }
 0x273   :  { %v4202_v53 = vmul.f32 0.2, %v4132_v47  ;;  %v3702_v25 = vpop.f32.mrf.mxu0  ;;  %vm4167_vm8 = vcmp.gt.f32.partialorder %v4132_v47, 0.0  ;;  %v8225_v19 = vpack.c.bf16 %v4236_v21, %v4231_v50  ;;  %5402 = vmatprep.subr.bf16.mxu0 %v7184_v0  ;;  %v4232_v60 = vsel %vm4162_vm7, %v4127_v48, %v4197_v35  ;;  %v7194_v3 = vld [vmem:[#allocation13 + $0x480] ss:$16 sps:$4 sm:$0xff]  }
 0x274   :  { %v4079_v1 = vadd.f32 %v3772_v44, %v8070_v29  ;;  %v4137_v28 = vadd.f32 %v8184_v43, %v4075_v59  ;;  %v3774_v51 = vadd.f32 %v8178_v7, %v3702_v25  ;;  %v4206_v9 = vmul.f32 0.2, %v4136_v41  ;;  %v7200_v21 = vld [vmem:[#allocation13 + $0x460] ss:$16 sps:$4 sm:$0xff]  }
 0x275   :  { %v3706_v63 = vpop.f32.mrf.mxu0  ;;  %v4237_v17 = vsel %vm4167_vm8, %v4132_v47, %v4202_v53  ;;  %vm4171_vm9 = vcmp.gt.f32.partialorder %v4136_v41, 0.0  ;;  %v7202_v47 = vld [vmem:[#allocation13 + $0x464] ss:$16 sps:$4 sm:$0xff]  }
 0x276   :  { %v4141_v26 = vadd.f32 %v8174_v46, %v4079_v1  ;;  %v3778_v18 = vadd.f32 %v8187_v22, %v3706_v63  ;;  %v8234_v61 = vpack.c.bf16 %v4237_v17, %v4232_v60  ;;  %5403 = vmatpush1.bf16.msra.mxu0 %v7182_v56  ;;  %v4080_v6 = vadd.f32 %v3774_v51, %v2466_v42  ;;  %v7208_v56 = vld [vmem:[#allocation13 + $0x444] ss:$16 sps:$4 sm:$0xff]   ;;  %v7212_v63 = vld [vmem:[#allocation13 + $0x420] ss:$16 sps:$4 sm:$0xff]  }
 0x277   :  { %v3708_v29 = vpop.f32.mrf.mxu0  ;;  %5404 = vmatprep.subr.bf16.mxu0 %v7190_v55  ;;  %v4207_v8 = vmul.f32 0.2, %v4137_v28  ;;  %vm4172_vm11 = vcmp.gt.f32.partialorder %v4137_v28, 0.0  ;;  %v4241_v24 = vsel %vm4171_vm9, %v4136_v41, %v4206_v9  ;;  %v7214_v42 = vld [vmem:[#allocation13 + $0x424] ss:$16 sps:$4 sm:$0xff]   ;;  %v4101_v51 = vsub.s32 2, %v8156_v36 }
 0x278   :  { %vm4176_vm10 = vcmp.gt.f32.partialorder %v4141_v26, 0.0  ;;  %v4211_v7 = vmul.f32 0.2, %v4141_v26  ;;  %v4084_v31 = vadd.f32 %v3778_v18, %v8077_v62  ;;  %v3780_v48 = vadd.f32 %v8191_v20, %v3708_v29  ;;  %5300 = vmatprep.mubr.bf16.mxu0 %v8234_v61  ;;  %v7220_v9 = vld [vmem:[#allocation13 + $0x404] ss:$16 sps:$4 sm:$0xff]  }
 0x279   :  { %v4142_v22 = vadd.f32 %v8184_v43, %v4080_v6  ;;  %5301 = vmatmul.mubr.bf16.gmra.mxu0 %v8225_v19  ;;  %v3710_v34 = vpop.f32.mrf.mxu0  ;;  %v4242_v59 = vsel %vm4172_vm11, %v4137_v28, %v4207_v8  ;;  %v8262_v29 = vrot.slane %v8164_v2, %v4101_v51 }
 0x27a   :  { %v4085_v0 = vadd.f32 %v3780_v48, %v8081_v58  ;;  %v4246_v52 = vsel %vm4176_vm10, %v4141_v26, %v4211_v7  ;;  %5405 = vmatpush1.bf16.msra.mxu0 %v7188_v27  ;;  %v4146_v14 = vadd.f32 %v8174_v46, %v4084_v31  ;;  %v4105_v26 = vsub.s32 3, %v8156_v36  ;;  %v8517_v7 = vld [vmem:[#allocation26_spill] sm:$0xff]  ;;  %v8518_v31 = vld [vmem:[#allocation27_spill] sm:$0xff] }
 0x27b   :  { %v4212_v35 = vmul.f32 0.2, %v4142_v22  ;;  %vm4177_vm12 = vcmp.gt.f32.partialorder %v4142_v22, 0.0  ;;  %v8243_v62 = vpack.c.bf16 %v4246_v52, %v4241_v24  ;;  %v3711_v20 = vpop.f32.mrf.mxu0  ;;  %5406 = vmatprep.subr.bf16.mxu0 %v7196_v32  ;;  %v7218_v32 = vld [vmem:[#allocation13 + $0x400] ss:$16 sps:$4 sm:$0xff]   ;;  %v1444_v48 = vadd.f32 %v8518_v31, %v8517_v7 }
 0x27c   :  { %v4147_v50 = vadd.f32 %v8184_v43, %v4085_v0  ;;  %v4216_v53 = vmul.f32 0.2, %v4146_v14  ;;  %vm4181_vm14 = vcmp.gt.f32.partialorder %v4146_v14, 0.0  ;;  %v7206_v43 = vld [vmem:[#allocation13 + $0x440] ss:$16 sps:$4 sm:$0xff]   ;;  %v8271_v52 = vrot.slane %v8164_v2, %v4105_v26 }
 0x27d   :  { %v4247_v44 = vsel %vm4177_vm12, %v4142_v22, %v4212_v35  ;;  %v7226_v34 = vld [vmem:[#allocation13 + $0x2ec] ss:$16 sps:$4 sm:$0xff]  }
 0x27e   :  { %v8247_v58 = vpack.c.bf16 %v4247_v44, %v4242_v59  ;;  %vm4182_vm13 = vcmp.gt.f32.partialorder %v4147_v50, 0.0  ;;  %v4217_v41 = vmul.f32 0.2, %v4147_v50  ;;  %5407 = vmatpush1.bf16.msra.mxu0 %v7194_v3  ;;  %v4251_v1 = vsel %vm4181_vm14, %v4146_v14, %v4216_v53 }
 0x27f   :  { %5408 = vmatprep.subr.bf16.mxu0 %v7202_v47  ;;  %v8255_v60 = vpack.c.bf16 %v4251_v1, %v4251_v1  ;;  %v2517_v3 = vadd.f32 %v8099_v13, %v1444_v48 }
 0x280   :  { %5310 = vmatprep.mubr.bf16.mxu0 %v8247_v58  ;;  %v4252_v25 = vsel %vm4182_vm13, %v4147_v50, %v4217_v41 }
 0x281   :  { %5311 = vmatmul.mubr.bf16.gmra.mxu0 %v8243_v62  ;;  %v3889_v46 = vpop.f32.mrf.mxu0  ;;  %v8251_v55 = vpack.c.bf16 %v4252_v25, %v4252_v25  ;;  %v2588_v13 = vadd.f32 %v8090_v5, %v2517_v3 }
 0x282   :  { %5409 = vmatpush1.bf16.msra.mxu0 %v7200_v21  ;;  %v8519_v21 = vld [vmem:[#allocation28_spill] sm:$0xff] }
 0x283   :  { %5320 = vmatprep.mubr.bf16.mxu0 %v8251_v55  ;;  %v3891_v11 = vpop.f32.mrf.mxu0  ;;  %5410 = vmatprep.subr.bf16.mxu0 %v7208_v56  ;;  %v8520_v56 = vld [vmem:[#allocation29_spill] sm:$0xff] }
 0x284   :  { %v1454_v53 = vadd.f32 %v8520_v56, %v8519_v21 }
 0x285   :  { %v3893_v28 = vpop.f32.mrf.mxu0 }
 0x286   :  { %5411 = vmatpush1.bf16.msra.mxu0 %v7206_v43  ;;  %v2527_v1 = vadd.f32 %v8112_v30, %v1454_v53 }
 0x287   :  { %v3895_v17 = vpop.f32.mrf.mxu0  ;;  %5412 = vmatprep.subr.bf16.mxu0 %v7214_v42 }
 0x289   :  { %5321 = vmatmul.mubr.bf16.gmra.mxu0 %v8255_v60  ;;  %v3899_v27 = vpop.f32.mrf.mxu0 }
 0x28a   :  { %v3818_v18 = vpop.f32.mrf.mxu1  ;;  %5413 = vmatpush1.bf16.msra.mxu0 %v7212_v63  ;;  %5432 = vmatprep.mubr.bf16.mxu0 %v8493_v57 }
 0x28b   :  { %v3890_v6 = vadd.f32 %v3889_v46, %v3818_v18  ;;  %v3901_v22 = vpop.f32.mrf.mxu0  ;;  %5414 = vmatprep.subr.bf16.mxu0 %v7220_v9 }
 0x28c   :  { %v3820_v8 = vpop.f32.mrf.mxu1 }
 0x28d   :  { %v4056_v0 = vadd.f32 %v3890_v6, %v8092_v54  ;;  %v3892_v24 = vadd.f32 %v3891_v11, %v3820_v8  ;;  %v3903_v20 = vpop.f32.mrf.mxu0 }
 0x28e   :  { %v3822_v35 = vpop.f32.mrf.mxu1  ;;  %5415 = vmatpush1.bf16.msra.mxu0 %v7218_v32 }
 0x28f   :  { %v4118_v47 = vadd.f32 %v8262_v29, %v4056_v0  ;;  %v4057_v14 = vadd.f32 %v3892_v24, %v8096_v33  ;;  %v3894_v50 = vadd.f32 %v3893_v28, %v3822_v35  ;;  %v3905_v44 = vpop.f32.mrf.mxu0  ;;  %5542 = vmatprep.subr.bf16.mxu0 %v7226_v34 }
 0x290   :  { %v3824_v59 = vpop.f32.mrf.mxu1 }
 0x291   :  { %v4119_v54 = vadd.f32 %v8271_v52, %v4057_v14  ;;  %v4061_v41 = vadd.f32 %v3894_v50, %v8101_v37  ;;  %v4188_v25 = vmul.f32 0.2, %v4118_v47  ;;  %v3896_v46 = vadd.f32 %v3895_v17, %v3824_v59  ;;  %v3909_v11 = vpop.f32.mrf.mxu0 }
 0x292   :  { %v3828_v43 = vpop.f32.mrf.mxu1  ;;  %vm4153_vm15 = vcmp.gt.f32.partialorder %v4118_v47, 0.0 }
 0x293   :  { %v4123_v33 = vadd.f32 %v8262_v29, %v4061_v41  ;;  %v3900_v42 = vadd.f32 %v3899_v27, %v3828_v43  ;;  %v4189_v28 = vmul.f32 0.2, %v4119_v54  ;;  %v4062_v63 = vadd.f32 %v3896_v46, %v2588_v13  ;;  %v3911_v18 = vpop.f32.mrf.mxu0  ;;  %v7173_v46 = vld [vmem:[#allocation13 + $0xe8] ss:$16 sps:$4 sm:$0xff]  }
 0x294   :  { %v3830_v9 = vpop.f32.mrf.mxu1  ;;  %v4223_v5 = vsel %vm4153_vm15, %v4118_v47, %v4188_v25  ;;  %vm4154_vm1 = vcmp.gt.f32.partialorder %v4119_v54, 0.0  ;;  %v2598_v47 = vadd.f32 %v8104_v40, %v2527_v1 }
 0x295   :  { %vm4158_vm0 = vcmp.gt.f32.partialorder %v4123_v33, 0.0  ;;  %v4193_v37 = vmul.f32 0.2, %v4123_v33  ;;  %v4066_v6 = vadd.f32 %v3900_v42, %v8106_v23  ;;  %v3902_v32 = vadd.f32 %v3901_v22, %v3830_v9  ;;  %v3913_v31 = vpop.f32.mrf.mxu0  ;;  %v8521_v23 = vld [vmem:[#allocation30_spill] sm:$0xff]  ;;  %v8522_v22 = vld [vmem:[#allocation31_spill] sm:$0xff] }
 0x296   :  { %v4124_v17 = vadd.f32 %v8271_v52, %v4062_v63  ;;  %v3832_v7 = vpop.f32.mrf.mxu1  ;;  %v1464_v35 = vadd.f32 %v8522_v22, %v8521_v23  ;;  %v4224_v50 = vsel %vm4154_vm1, %v4119_v54, %v4189_v28  ;;  %v7181_v54 = vld [vmem:[#allocation13 + $0xcc] ss:$16 sps:$4 sm:$0xff]  }
 0x297   :  { %v4228_v48 = vsel %vm4158_vm0, %v4123_v33, %v4193_v37  ;;  %v4128_v27 = vadd.f32 %v8262_v29, %v4066_v6  ;;  %v4067_v30 = vadd.f32 %v3902_v32, %v8109_v49  ;;  %v3904_v8 = vadd.f32 %v3903_v20, %v3832_v7  ;;  %v3915_v3 = vpop.f32.mrf.mxu0 }
 0x298   :  { %v8287_v34 = vpack.c.bf16 %v4228_v48, %v4223_v5  ;;  %v4194_v0 = vmul.f32 0.2, %v4124_v17  ;;  %v3834_v24 = vpop.f32.mrf.mxu1  ;;  %vm4159_vm2 = vcmp.gt.f32.partialorder %v4124_v17, 0.0  ;;  %v2537_v43 = vadd.f32 %v8125_v38, %v1464_v35  ;;  %v7187_v48 = vld [vmem:[#allocation13 + $0xac] ss:$16 sps:$4 sm:$0xff]  }
 0x299   :  { %v4071_v14 = vadd.f32 %v3904_v8, %v8114_v16  ;;  %v4198_v59 = vmul.f32 0.2, %v4128_v27  ;;  %v4129_v41 = vadd.f32 %v8271_v52, %v4067_v30  ;;  %v3906_v21 = vadd.f32 %v3905_v44, %v3834_v24  ;;  %v3919_v20 = vpop.f32.mrf.mxu0 }
 0x29a   :  { %v3838_v49 = vpop.f32.mrf.mxu1  ;;  %v4229_v56 = vsel %vm4159_vm2, %v4124_v17, %v4194_v0  ;;  %vm4163_vm3 = vcmp.gt.f32.partialorder %v4128_v27, 0.0  ;;  %v2608_v8 = vadd.f32 %v8117_v10, %v2537_v43 }
 0x29b   :  { %v4133_v53 = vadd.f32 %v8262_v29, %v4071_v14  ;;  %v3910_v13 = vadd.f32 %v3909_v11, %v3838_v49  ;;  %v8295_v25 = vpack.c.bf16 %v4229_v56, %v4224_v50  ;;  %v4072_v40 = vadd.f32 %v3906_v21, %v2598_v47  ;;  %v3921_v16 = vpop.f32.mrf.mxu0  ;;  %v7193_v49 = vld [vmem:[#allocation13 + $0x8c] ss:$16 sps:$4 sm:$0xff]   ;;  %v8523_v56 = vld [vmem:[#allocation38_spill] sm:$0xff] }
 0x29c   :  { %v3840_v33 = vpop.f32.mrf.mxu1  ;;  %v4199_v28 = vmul.f32 0.2, %v4129_v41  ;;  %vm4164_vm5 = vcmp.gt.f32.partialorder %v4129_v41, 0.0  ;;  %v4233_v38 = vsel %vm4163_vm3, %v4128_v27, %v4198_v59  ;;  %v7185_v59 = vld [vmem:[#allocation13 + $0xa8] ss:$16 sps:$4 sm:$0xff]  }
 0x29d   :  { %vm4168_vm4 = vcmp.gt.f32.partialorder %v4133_v53, 0.0  ;;  %v4203_v42 = vmul.f32 0.2, %v4133_v53  ;;  %v4076_v44 = vadd.f32 %v3910_v13, %v8119_v15  ;;  %v3912_v1 = vadd.f32 %v3911_v18, %v3840_v33  ;;  %5361 = vmatprep.mubr.bf16.mxu1 %v8295_v25  ;;  %v3923_v9 = vpop.f32.mrf.mxu0  ;;  %v7179_v15 = vld [vmem:[#allocation13 + $0xc8] ss:$16 sps:$4 sm:$0xff]  }
 0x29e   :  { %v4134_v63 = vadd.f32 %v8271_v52, %v4072_v40  ;;  %5362 = vmatmul.mubr.bf16.vlgmr.msra.gmra.mxu1 %v8287_v34  ;;  %v3842_v11 = vpop.f32.mrf.mxu1  ;;  %v4234_v23 = vsel %vm4164_vm5, %v4129_v41, %v4199_v28  ;;  %v8524_v40 = vld [vmem:[#allocation39_spill] sm:$0xff] }
 0x29f   :  { %v4138_v37 = vadd.f32 %v8262_v29, %v4076_v44  ;;  %v4077_v6 = vadd.f32 %v3912_v1, %v8122_v4  ;;  %5472 = vmatpush1.bf16.msra.mxu1 %v7173_v46  ;;  %v3914_v32 = vadd.f32 %v3913_v31, %v3842_v11  ;;  %v4238_v18 = vsel %vm4168_vm4, %v4133_v53, %v4203_v42  ;;  %v3924_v7 = vpop.f32.mrf.mxu0 }
 0x2a0   :  { %v4204_v5 = vmul.f32 0.2, %v4134_v63  ;;  %v3844_v17 = vpop.f32.mrf.mxu1  ;;  %5473 = vmatprep.subr.bf16.mxu1 %v7181_v54  ;;  %vm4169_vm6 = vcmp.gt.f32.partialorder %v4134_v63, 0.0  ;;  %v8306_v30 = vpack.c.bf16 %v4238_v18, %v4233_v38  ;;  %v7191_v54 = vld [vmem:[#allocation13 + $0x88] ss:$16 sps:$4 sm:$0xff]  }
 0x2a1   :  { %v4081_v27 = vadd.f32 %v3914_v32, %v8127_v12  ;;  %v4139_v0 = vadd.f32 %v8271_v52, %v4077_v6  ;;  %v3916_v4 = vadd.f32 %v3915_v3, %v3844_v17  ;;  %v6447_v31 = vpop.f32.mrf.mxu0  ;;  %v4208_v35 = vmul.f32 0.2, %v4138_v37  ;;  %v7205_v7 = vld [vmem:[#allocation13 + $0x4c] ss:$16 sps:$4 sm:$0xff]  }
 0x2a2   :  { %v3848_v24 = vpop.f32.mrf.mxu1  ;;  %v4239_v22 = vsel %vm4169_vm6, %v4134_v63, %v4204_v5  ;;  %vm4173_vm7 = vcmp.gt.f32.partialorder %v4138_v37, 0.0  ;;  %v7199_v63 = vld [vmem:[#allocation13 + $0x6c] ss:$16 sps:$4 sm:$0xff]   ;;  %v4109_v5 = vsub.s32 4, %v8156_v36 }
 0x2a3   :  { %v4143_v47 = vadd.f32 %v8262_v29, %v4081_v27  ;;  %5474 = vmatpush1.bf16.msra.mxu1 %v7179_v15  ;;  %v3920_v14 = vadd.f32 %v3919_v20, %v3848_v24  ;;  %v8313_v50 = vpack.c.bf16 %v4239_v22, %v4234_v23  ;;  %v4082_v10 = vadd.f32 %v3916_v4, %v2608_v8  ;;  %v6448_v12 = vpop.f32.mrf.mxu0  ;;  %v7203_v22 = vld [vmem:[#allocation13 + $0x48] ss:$16 sps:$4 sm:$0xff]  }
 0x2a4   :  { %v3850_v21 = vpop.f32.mrf.mxu1  ;;  %5475 = vmatprep.subr.bf16.mxu1 %v7187_v48  ;;  %v4209_v13 = vmul.f32 0.2, %v4139_v0  ;;  %vm4174_vm9 = vcmp.gt.f32.partialorder %v4139_v0, 0.0  ;;  %v4243_v42 = vsel %vm4173_vm7, %v4138_v37, %v4208_v35  ;;  %v7197_v37 = vld [vmem:[#allocation13 + $0x68] ss:$16 sps:$4 sm:$0xff]   ;;  %v6449_v27 = vadd.f32 %v6448_v12, %v6447_v31 }
 0x2a5   :  { %vm4178_vm8 = vcmp.gt.f32.partialorder %v4143_v47, 0.0  ;;  %v4213_v3 = vmul.f32 0.2, %v4143_v47  ;;  %v4086_v53 = vadd.f32 %v3920_v14, %v8523_v56  ;;  %v3922_v41 = vadd.f32 %v3921_v16, %v3850_v21  ;;  %5371 = vmatprep.mubr.bf16.mxu1 %v8313_v50  ;;  %v6450_v43 = vpop.f32.mrf.mxu0  ;;  %v7211_v31 = vld [vmem:[#allocation13 + $0x2c] ss:$16 sps:$4 sm:$0xff]  }
 0x2a6   :  { %v4144_v46 = vadd.f32 %v8271_v52, %v4082_v10  ;;  %5372 = vmatmul.mubr.bf16.gmra.mxu1 %v8306_v30  ;;  %v3852_v20 = vpop.f32.mrf.mxu1  ;;  %v4244_v6 = vsel %vm4174_vm9, %v4139_v0, %v4209_v13  ;;  %v8333_v23 = vrot.slane %v8164_v2, %v4109_v5 }
 0x2a7   :  { %v4087_v33 = vadd.f32 %v3922_v41, %v8524_v40  ;;  %5476 = vmatpush1.bf16.msra.mxu1 %v7185_v59  ;;  %v4248_v44 = vsel %vm4178_vm8, %v4143_v47, %v4213_v3  ;;  %v6451_v16 = vpop.f32.mrf.mxu0  ;;  %v4148_v9 = vadd.f32 %v8262_v29, %v4086_v53  ;;  %v8525_v59 = vld [vmem:[#allocation40_spill] sm:$0xff]  ;;  %v7209_v53 = vld [vmem:[#allocation13 + $0x28] ss:$16 sps:$4 sm:$0xff]  }
 0x2a8   :  { %v4214_v1 = vmul.f32 0.2, %v4144_v46  ;;  %v3853_v28 = vpop.f32.mrf.mxu1  ;;  %5477 = vmatprep.subr.bf16.mxu1 %v7193_v49  ;;  %vm4179_vm10 = vcmp.gt.f32.partialorder %v4144_v46, 0.0  ;;  %v8321_v11 = vpack.c.bf16 %v4248_v44, %v4243_v42  ;;  %v6452_v14 = vadd.f32 %v6451_v16, %v6450_v43  ;;  %v8526_v40 = vld [vmem:[#allocation41_spill] sm:$0xff] }
 0x2a9   :  { %v4149_v38 = vadd.f32 %v8271_v52, %v4087_v33  ;;  %v6453_v15 = vpop.f32.mrf.mxu0  ;;  %v4218_v8 = vmul.f32 0.2, %v4148_v9  ;;  %vm4183_vm12 = vcmp.gt.f32.partialorder %v4148_v9, 0.0  ;;  %v7215_v16 = vld [vmem:[#allocation13 + $0x8] ss:$16 sps:$4 sm:$0xff]  }
 0x2aa   :  { %v4249_v32 = vsel %vm4179_vm10, %v4144_v46, %v4214_v1  ;;  %v7217_v46 = vld [vmem:[#allocation13 + $0xc] ss:$16 sps:$4 sm:$0xff]  }
 0x2ab   :  { %5478 = vmatpush1.bf16.msra.mxu1 %v7191_v54  ;;  %v8325_v18 = vpack.c.bf16 %v4249_v32, %v4244_v6  ;;  %vm4184_vm11 = vcmp.gt.f32.partialorder %v4149_v38, 0.0  ;;  %v4219_v17 = vmul.f32 0.2, %v4149_v38  ;;  %v6454_v48 = vpop.f32.mrf.mxu0  ;;  %v4253_v21 = vsel %vm4183_vm12, %v4148_v9, %v4218_v8  ;;  %v7223_v9 = vld [vmem:[#allocation13 + $0x1ec] ss:$16 sps:$4 sm:$0xff]   ;;  %v8527_v32 = vld [vmem:[#allocation42_spill] sm:$0xff] }
 0x2ac   :  { %5479 = vmatprep.subr.bf16.mxu1 %v7199_v63  ;;  %v6455_v2 = vadd.f32 %v6454_v48, %v6453_v15  ;;  %v8339_v13 = vpack.c.bf16 %v4253_v21, %v4253_v21 }
 0x2ad   :  { %5381 = vmatprep.mubr.bf16.mxu1 %v8325_v18  ;;  %v4254_v29 = vsel %vm4184_vm11, %v4149_v38, %v4219_v17  ;;  %v6456_v4 = vpop.f32.mrf.mxu0 }
 0x2ae   :  { %5382 = vmatmul.mubr.bf16.gmra.mxu1 %v8321_v11  ;;  %v4024_v52 = vpop.f32.mrf.mxu1  ;;  %v8330_v0 = vpack.c.bf16 %v4254_v29, %v4254_v29  ;;  %v7224_v29 = vld [vmem:[#allocation13 + $0x2e8] ss:$16 sps:$4 sm:$0xff]  }
 0x2af   :  { %5480 = vmatpush1.bf16.msra.mxu1 %v7197_v37  ;;  %v4025_v24 = vadd.f32 %v6449_v27, %v4024_v52  ;;  %v6457_v47 = vpop.f32.mrf.mxu0  ;;  %v7221_v27 = vld [vmem:[#allocation13 + $0x1e8] ss:$16 sps:$4 sm:$0xff]  }
 0x2b0   :  { %v4026_v35 = vpop.f32.mrf.mxu1  ;;  %5391 = vmatprep.mubr.bf16.mxu1 %v8330_v0  ;;  %5481 = vmatprep.subr.bf16.mxu1 %v7205_v7  ;;  %v6458_v28 = vadd.f32 %v6457_v47, %v6456_v4 }
 0x2b1   :  { %v4058_v10 = vadd.f32 %v4025_v24, %v8525_v59  ;;  %v6459_v49 = vpop.f32.mrf.mxu0  ;;  %v7229_v24 = vld [vmem:[#allocation13 + $0x1cc] ss:$16 sps:$4 sm:$0xff]  }
 0x2b2   :  { %v4027_v12 = vpop.f32.mrf.mxu1 }
 0x2b3   :  { %v4120_v3 = vadd.f32 %v8333_v23, %v4058_v10  ;;  %5482 = vmatpush1.bf16.msra.mxu1 %v7203_v22  ;;  %v4028_v56 = vadd.f32 %v6452_v14, %v4027_v12  ;;  %v6460_v20 = vpop.f32.mrf.mxu0  ;;  %v7232_v22 = vld [vmem:[#allocation13 + $0x2cc] ss:$16 sps:$4 sm:$0xff]  }
 0x2b4   :  { %v4029_v41 = vpop.f32.mrf.mxu1  ;;  %5483 = vmatprep.subr.bf16.mxu1 %v7211_v31  ;;  %v6461_v5 = vadd.f32 %v6460_v20, %v6459_v49  ;;  %v8528_v31 = vld [vmem:[#allocation43_spill] sm:$0xff] }
 0x2b5   :  { %v4063_v43 = vadd.f32 %v4028_v56, %v8526_v40  ;;  %v6462_v54 = vpop.f32.mrf.mxu0  ;;  %v4190_v42 = vmul.f32 0.2, %v4120_v3  ;;  %vm4155_vm13 = vcmp.gt.f32.partialorder %v4120_v3, 0.0  ;;  %v7230_v56 = vld [vmem:[#allocation13 + $0x2c8] ss:$16 sps:$4 sm:$0xff]   ;;  %v8529_v40 = vld [vmem:[#allocation32_spill] sm:$0xff] }
 0x2b6   :  { %5392 = vmatmul.mubr.bf16.gmra.mxu1 %v8339_v13  ;;  %v4032_v33 = vpop.f32.mrf.mxu1  ;;  %v7238_v41 = vld [vmem:[#allocation13 + $0x2ac] ss:$16 sps:$4 sm:$0xff]  }
 0x2b7   :  { %v4125_v44 = vadd.f32 %v8333_v23, %v4063_v43  ;;  %5484 = vmatpush1.bf16.msra.mxu1 %v7209_v53  ;;  %v4033_v1 = vadd.f32 %v6455_v2, %v4032_v33  ;;  %5503 = vmatprep.mubr.bf16.mxu1 %v8213_v45  ;;  %v6463_v38 = vpop.f32.mrf.mxu0  ;;  %v4225_v7 = vsel %vm4155_vm13, %v4120_v3, %v4190_v42  ;;  %v7227_v3 = vld [vmem:[#allocation13 + $0x1c8] ss:$16 sps:$4 sm:$0xff]   ;;  %v7235_v53 = vld [vmem:[#allocation13 + $0x1ac] ss:$16 sps:$4 sm:$0xff]  }
 0x2b8   :  { %v4034_v63 = vpop.f32.mrf.mxu1  ;;  %5485 = vmatprep.subr.bf16.mxu1 %v7217_v46  ;;  %v6464_v49 = vadd.f32 %v6463_v38, %v6462_v54 }
 0x2b9   :  { %vm4160_vm14 = vcmp.gt.f32.partialorder %v4125_v44, 0.0  ;;  %v4195_v6 = vmul.f32 0.2, %v4125_v44  ;;  %v4068_v15 = vadd.f32 %v4033_v1, %v8527_v32  ;;  %v6465_v17 = vpop.f32.mrf.mxu0  ;;  %v7244_v32 = vld [vmem:[#allocation13 + $0x28c] ss:$16 sps:$4 sm:$0xff]  }
 0x2ba   :  { %v4035_v37 = vpop.f32.mrf.mxu1 }
 0x2bb   :  { %v4230_v48 = vsel %vm4160_vm14, %v4125_v44, %v4195_v6  ;;  %v4130_v8 = vadd.f32 %v8333_v23, %v4068_v15  ;;  %5486 = vmatpush1.bf16.msra.mxu1 %v7215_v16  ;;  %v4036_v45 = vadd.f32 %v6458_v28, %v4035_v37  ;;  %v6466_v35 = vpop.f32.mrf.mxu0  ;;  %v7233_v28 = vld [vmem:[#allocation13 + $0x1a8] ss:$16 sps:$4 sm:$0xff]   ;;  %v7241_v6 = vld [vmem:[#allocation13 + $0x18c] ss:$16 sps:$4 sm:$0xff]  }
 0x2bc   :  { %v8347_v52 = vpack.c.bf16 %v4230_v48, %v4225_v7  ;;  %v4037_v4 = vpop.f32.mrf.mxu1  ;;  %5487 = vmatprep.subr.bf16.mxu1 %v7223_v9  ;;  %v6467_v42 = vadd.f32 %v6466_v35, %v6465_v17  ;;  %v7236_v16 = vld [vmem:[#allocation13 + $0x2a8] ss:$16 sps:$4 sm:$0xff]  }
 0x2bd   :  { %v4073_v47 = vadd.f32 %v4036_v45, %v8528_v31  ;;  %v4200_v14 = vmul.f32 0.2, %v4130_v8  ;;  %v6468_v10 = vpop.f32.mrf.mxu0  ;;  %vm4165_vm15 = vcmp.gt.f32.partialorder %v4130_v8, 0.0  ;;  %v8530_v15 = vld [vmem:[#allocation33_spill] sm:$0xff] }
 0x2be   :  { %v4040_v59 = vpop.f32.mrf.mxu1  ;;  %5433 = vmatmul.mubr.bf16.vlgmr.msra.gmra.mxu0 %v8347_v52  ;;  %v7242_v45 = vld [vmem:[#allocation13 + $0x288] ss:$16 sps:$4 sm:$0xff]  }
 0x2bf   :  { %v4135_v21 = vadd.f32 %v8333_v23, %v4073_v47  ;;  %5488 = vmatpush2.bf16.msra.mxu1 %v7221_v27  ;;  %v4041_v12 = vadd.f32 %v6461_v5, %v4040_v59  ;;  %5543 = vmatpush1.bf16.msra.mxu0 %v7224_v29  ;;  %v6469_v46 = vpop.f32.mrf.mxu0  ;;  %v4235_v44 = vsel %vm4165_vm15, %v4130_v8, %v4200_v14  ;;  %v7239_v8 = vld [vmem:[#allocation13 + $0x188] ss:$16 sps:$4 sm:$0xff]   ;;  %v7247_v27 = vld [vmem:[#allocation13 + $0x16c] ss:$16 sps:$4 sm:$0xff]  }
 0x2c0   :  { %v4042_v2 = vpop.f32.mrf.mxu1  ;;  %5489 = vmatprep.subr.bf16.mxu1 %v7229_v24  ;;  %5544 = vmatprep.subr.bf16.mxu0 %v7232_v22  ;;  %v7250_v29 = vld [vmem:[#allocation13 + $0x26c] ss:$16 sps:$4 sm:$0xff]   ;;  %v8531_v22 = vld [vmem:[#allocation34_spill] sm:$0xff]  ;;  %v7245_v14 = vld [vmem:[#allocation13 + $0x168] ss:$16 sps:$4 sm:$0xff]  }
 0x2c1   :  { %vm4170_vm0 = vcmp.gt.f32.partialorder %v4135_v21, 0.0  ;;  %v4205_v20 = vmul.f32 0.2, %v4135_v21  ;;  %v4078_v43 = vadd.f32 %v4041_v12, %v8529_v40  ;;  %5442 = vmatprep.mubr.bf16.mxu0 %v8493_v57  ;;  %v7248_v59 = vld [vmem:[#allocation13 + $0x268] ss:$16 sps:$4 sm:$0xff]  }
 0x2c2   :  { %v4043_v33 = vpop.f32.mrf.mxu1  ;;  %v7262_v46 = vld [vmem:[#allocation13 + $0x22c] ss:$16 sps:$4 sm:$0xff]   ;;  %v7257_v40 = vld [vmem:[#allocation13 + $0x128] ss:$16 sps:$4 sm:$0xff]  }
 0x2c3   :  { %v4140_v54 = vadd.f32 %v8333_v23, %v4078_v43  ;;  %5490 = vmatpush2.bf16.msra.mxu1 %v7227_v3  ;;  %v4044_v1 = vadd.f32 %v6464_v49, %v4043_v33  ;;  %5545 = vmatpush1.bf16.msra.mxu0 %v7230_v56  ;;  %v4240_v63 = vsel %vm4170_vm0, %v4135_v21, %v4205_v20  ;;  %v7253_v49 = vld [vmem:[#allocation13 + $0x14c] ss:$16 sps:$4 sm:$0xff]   ;;  %v7260_v43 = vld [vmem:[#allocation13 + $0x228] ss:$16 sps:$4 sm:$0xff]  }
 0x2c4   :  { %v4045_v9 = vpop.f32.mrf.mxu1  ;;  %5491 = vmatprep.subr.bf16.mxu1 %v7235_v53  ;;  %5546 = vmatprep.subr.bf16.mxu0 %v7238_v41  ;;  %v8356_v38 = vpack.c.bf16 %v4240_v63, %v4235_v44  ;;  %v7256_v3 = vld [vmem:[#allocation13 + $0x24c] ss:$16 sps:$4 sm:$0xff]   ;;  %v7254_v53 = vld [vmem:[#allocation13 + $0x248] ss:$16 sps:$4 sm:$0xff]  }
 0x2c5   :  { %v4083_v37 = vadd.f32 %v4044_v1, %v8530_v15  ;;  %v4210_v17 = vmul.f32 0.2, %v4140_v54  ;;  %vm4175_vm1 = vcmp.gt.f32.partialorder %v4140_v54, 0.0  ;;  %v7259_v41 = vld [vmem:[#allocation13 + $0x12c] ss:$16 sps:$4 sm:$0xff]  }
 0x2c6   :  { %v4048_v5 = vpop.f32.mrf.mxu1  ;;  %5443 = vmatmul.mubr.bf16.gmra.mxu0 %v8356_v38  ;;  %v7268_v44 = vld [vmem:[#allocation13 + $0x20c] ss:$16 sps:$4 sm:$0xff]   ;;  %v7266_v1 = vld [vmem:[#allocation13 + $0x208] ss:$16 sps:$4 sm:$0xff]  }
 0x2c7   :  { %v4145_v7 = vadd.f32 %v8333_v23, %v4083_v37  ;;  %5492 = vmatpush2.bf16.msra.mxu1 %v7233_v28  ;;  %v4049_v48 = vadd.f32 %v6467_v42, %v4048_v5  ;;  %5547 = vmatpush1.bf16.msra.mxu0 %v7236_v16  ;;  %v4245_v10 = vsel %vm4175_vm1, %v4140_v54, %v4210_v17  ;;  %v7265_v42 = vld [vmem:[#allocation13 + $0x10c] ss:$16 sps:$4 sm:$0xff]   ;;  %v7263_v54 = vld [vmem:[#allocation13 + $0x108] ss:$16 sps:$4 sm:$0xff]  }
 0x2c8   :  { %5493 = vmatprep.subr.bf16.mxu1 %v7241_v6  ;;  %5548 = vmatprep.subr.bf16.mxu0 %v7244_v32  ;;  %v4050_v4 = vpop.f32.mrf.mxu1  ;;  %v7271_v28 = vld [vmem:[#allocation13 + $0x4ec] ss:$16 sps:$4 sm:$0xff]   ;;  %v7269_v63 = vld [vmem:[#allocation13 + $0x4e8] ss:$16 sps:$4 sm:$0xff]  }
 0x2c9   :  { %vm4180_vm2 = vcmp.gt.f32.partialorder %v4145_v7, 0.0  ;;  %v4215_v24 = vmul.f32 0.2, %v4145_v7  ;;  %v4088_v35 = vadd.f32 %v4049_v48, %v8531_v22  ;;  %5452 = vmatprep.mubr.bf16.mxu0 %v8493_v57  ;;  %v7274_v16 = vld [vmem:[#allocation13 + $0x3ec] ss:$16 sps:$4 sm:$0xff]  }
 0x2ca   :  { %v4051_v31 = vpop.f32.mrf.mxu1  ;;  %v7272_v9 = vld [vmem:[#allocation13 + $0x3e8] ss:$16 sps:$4 sm:$0xff]   ;;  %v7277_v6 = vld [vmem:[#allocation13 + $0x4cc] ss:$16 sps:$4 sm:$0xff]  }
 0x2cb   :  { %v4150_v47 = vadd.f32 %v8333_v23, %v4088_v35  ;;  %5494 = vmatpush2.bf16.msra.mxu1 %v7239_v8  ;;  %5549 = vmatpush1.bf16.msra.mxu0 %v7242_v45  ;;  %v4250_v21 = vsel %vm4180_vm2, %v4145_v7, %v4215_v24  ;;  %v7251_v23 = vld [vmem:[#allocation13 + $0x148] ss:$16 sps:$4 sm:$0xff]   ;;  %v7280_v32 = vld [vmem:[#allocation13 + $0x3cc] ss:$16 sps:$4 sm:$0xff]  }
 0x2cc   :  { %5495 = vmatprep.subr.bf16.mxu1 %v7247_v27  ;;  %5550 = vmatprep.subr.bf16.mxu0 %v7250_v29  ;;  %v8365_v12 = vpack.c.bf16 %v4250_v21, %v4245_v10  ;;  %v4052_v56 = vpop.f32.mrf.mxu1  ;;  %v7275_v15 = vld [vmem:[#allocation13 + $0x4c8] ss:$16 sps:$4 sm:$0xff]   ;;  %v7283_v37 = vld [vmem:[#allocation13 + $0x4ac] ss:$16 sps:$4 sm:$0xff]  }
 0x2cd   :  { %v4220_v2 = vmul.f32 0.2, %v4150_v47  ;;  %vm4185_vm3 = vcmp.gt.f32.partialorder %v4150_v47, 0.0  ;;  %v7286_v5 = vld [vmem:[#allocation13 + $0x3ac] ss:$16 sps:$4 sm:$0xff]  }
 0x2ce   :  { %5453 = vmatmul.mubr.bf16.gmra.mxu0 %v8365_v12  ;;  %v7281_v17 = vld [vmem:[#allocation13 + $0x4a8] ss:$16 sps:$4 sm:$0xff]   ;;  %v7289_v48 = vld [vmem:[#allocation13 + $0x48c] ss:$16 sps:$4 sm:$0xff]  }
 0x2cf   :  { %5496 = vmatpush2.bf16.msra.mxu1 %v7245_v14  ;;  %5551 = vmatpush1.bf16.msra.mxu0 %v7248_v59  ;;  %v4255_v20 = vsel %vm4185_vm3, %v4150_v47, %v4220_v2  ;;  %v7284_v7 = vld [vmem:[#allocation13 + $0x3a8] ss:$16 sps:$4 sm:$0xff]   ;;  %v7292_v8 = vld [vmem:[#allocation13 + $0x38c] ss:$16 sps:$4 sm:$0xff]  }
 0x2d0   :  { %5497 = vmatprep.subr.bf16.mxu1 %v7253_v49  ;;  %5552 = vmatprep.subr.bf16.mxu0 %v7256_v3  ;;  %v8369_v33 = vpack.c.bf16 %v4255_v20, %v4255_v20  ;;  %v7295_v45 = vld [vmem:[#allocation13 + $0x46c] ss:$16 sps:$4 sm:$0xff]   ;;  %v7293_v29 = vld [vmem:[#allocation13 + $0x468] ss:$16 sps:$4 sm:$0xff]  }
 0x2d1   :  { %5462 = vmatprep.mubr.bf16.mxu0 %v8493_v57  ;;  %v7298_v27 = vld [vmem:[#allocation13 + $0x36c] ss:$16 sps:$4 sm:$0xff]   ;;  %v7296_v4 = vld [vmem:[#allocation13 + $0x368] ss:$16 sps:$4 sm:$0xff]  }
 0x2d2   :  { %v7301_v24 = vld [vmem:[#allocation13 + $0x44c] ss:$16 sps:$4 sm:$0xff]   ;;  %v7305_v47 = vld [vmem:[#allocation13 + $0x428] ss:$16 sps:$4 sm:$0xff]  }
 0x2d3   :  { %5498 = vmatpush2.bf16.msra.mxu1 %v7251_v23  ;;  %5553 = vmatpush1.bf16.msra.mxu0 %v7254_v53  ;;  %v7304_v22 = vld [vmem:[#allocation13 + $0x34c] ss:$16 sps:$4 sm:$0xff]   ;;  %v7308_v14 = vld [vmem:[#allocation13 + $0x328] ss:$16 sps:$4 sm:$0xff]  }
 0x2d4   :  { %5499 = vmatprep.subr.bf16.mxu1 %v7259_v41  ;;  %5554 = vmatprep.subr.bf16.mxu0 %v7262_v46  ;;  %v7307_v35 = vld [vmem:[#allocation13 + $0x42c] ss:$16 sps:$4 sm:$0xff]  }
 0x2d5   :  { %v7310_v31 = vld [vmem:[#allocation13 + $0x32c] ss:$16 sps:$4 sm:$0xff]  }
 0x2d6   :  { %5463 = vmatmul.mubr.bf16.gmra.mxu0 %v8369_v33  ;;  %v7313_v59 = vld [vmem:[#allocation13 + $0x40c] ss:$16 sps:$4 sm:$0xff]  }
 0x2d7   :  { %5500 = vmatpush2.bf16.msra.mxu1 %v7257_v40  ;;  %5555 = vmatpush1.bf16.msra.mxu0 %v7260_v43  ;;  %v7316_v10 = vld [vmem:[#allocation13 + $0x30c] ss:$16 sps:$4 sm:$0xff]  }
 0x2d8   :  { %5574 = vmatprep.mubr.bf16.mxu0 %v8295_v25  ;;  %5501 = vmatprep.subr.bf16.mxu1 %v7265_v42  ;;  %v7278_v25 = vld [vmem:[#allocation13 + $0x3c8] ss:$16 sps:$4 sm:$0xff]  }
 0x2d9   :  { %5556 = vmatprep.subr.bf16.mxu0 %v7268_v44 }
 0x2db   :  { %5502 = vmatpush2.bf16.msra.mxu1 %v7263_v54  ;;  %5557 = vmatpush1.bf16.msra.mxu0 %v7266_v1  ;;  %v8408_v54 = vld [vmem:[%s8471_s8] sm:$0xf]  ;;  %s7502_s8 = smov [#allocation14]  }
 0x2dc   :  { %5613 = vmatprep.subr.bf16.mxu1 %v7271_v28  ;;  %5558 = vmatprep.subr.bf16.mxu0 %v7274_v16  ;;  %v8532_v16 = vsub.s32 0, %v8156_v36  ;;  %s5717_s15 = sshll.u32 %s7502_s8, 4  ;;  %s5718_s15 = int_to_ptr.vmem [resolvable:$true] %s5717_s15 }
 0x2dd   :  { %s7460_s19 = scalar_lea.vmem %s5718_s15, 3584  ;;  %p7465_p8 = scmp.lt.s32.totalorder %s5718_s15, %s5718_s15 }
 0x2de   :  { %5504 = vmatmul.mubr.bf16.vlgmr.msra.gmra.mxu1 %v8204_v39  ;;  %v7287_v39 = vld [vmem:[#allocation13 + $0x488] ss:$16 sps:$4 sm:$0xff]   ;;  %p7461_p7 = scmp.ne.s32.totalorder %s5718_s15, %s7460_s19  ;;  %p7466_p9 = scmp.lt.s32.totalorder %s7460_s19, %s7460_s19 }
 0x2df   :  { %5513 = vmatprep.mubr.bf16.mxu1 %v8234_v61  ;;  %5614 = vmatpush1.bf16.msra.mxu1 %v7269_v63  ;;  %v7290_v61 = vld [vmem:[#allocation13 + $0x388] ss:$16 sps:$4 sm:$0xff]   ;;  %v4441_v63 = vrot.slane %v8408_v54, %v8532_v16 }
 0x2e0   :  { %5559 = vmatpush2.bf16.msra.mxu0 %v7272_v9  ;;  %5615 = vmatprep.subr.bf16.mxu1 %v7277_v6  ;;  %v8533_v6 = vsub.s32 1, %v8156_v36  ;;  %p7467_p10 = por %p7466_p9, %p7465_p8 }
 0x2e1   :  { %5560 = vmatprep.subr.bf16.mxu0 %v7280_v32 }
 0x2e2   :  { %v4445_v32 = vrot.slane %v8408_v54, %v8533_v6  ;;  %p7468_p11 = pnand %p7467_p10, %p7461_p7 }
 0x2e3   :  { %5616 = vmatpush1.bf16.msra.mxu1 %v7275_v15 }
 0x2e4   :  { %5561 = vmatpush2.bf16.msra.mxu0 %v7278_v25  ;;  %5617 = vmatprep.subr.bf16.mxu1 %v7283_v37 }
 0x2e5   :  { %5562 = vmatprep.subr.bf16.mxu0 %v7286_v5 }
 0x2e6   :  { %5514 = vmatmul.mubr.bf16.gmra.mxu1 %v8225_v19  ;;  %v7299_v19 = vld [vmem:[#allocation13 + $0x448] ss:$16 sps:$4 sm:$0xff]  }
 0x2e7   :  { %5523 = vmatprep.mubr.bf16.mxu1 %v8247_v58  ;;  %5618 = vmatpush1.bf16.msra.mxu1 %v7281_v17  ;;  %v7302_v58 = vld [vmem:[#allocation13 + $0x348] ss:$16 sps:$4 sm:$0xff]  }
 0x2e8   :  { %5563 = vmatpush2.bf16.msra.mxu0 %v7284_v7  ;;  %5619 = vmatprep.subr.bf16.mxu1 %v7289_v48 }
 0x2e9   :  { %5564 = vmatprep.subr.bf16.mxu0 %v7292_v8 }
 0x2eb   :  { %5620 = vmatpush1.bf16.msra.mxu1 %v7287_v39 }
 0x2ec   :  { %5565 = vmatpush2.bf16.msra.mxu0 %v7290_v61  ;;  %5621 = vmatprep.subr.bf16.mxu1 %v7295_v45 }
 0x2ed   :  { %5566 = vmatprep.subr.bf16.mxu0 %v7298_v27 }
 0x2ee   :  { %5524 = vmatmul.mubr.bf16.gmra.mxu1 %v8243_v62  ;;  %v7311_v62 = vld [vmem:[#allocation13 + $0x408] ss:$16 sps:$4 sm:$0xff]  }
 0x2ef   :  { %5533 = vmatprep.mubr.bf16.mxu1 %v8251_v55  ;;  %5622 = vmatpush1.bf16.msra.mxu1 %v7293_v29  ;;  %v7314_v55 = vld [vmem:[#allocation13 + $0x308] ss:$16 sps:$4 sm:$0xff]  }
 0x2f0   :  { %5567 = vmatpush2.bf16.msra.mxu0 %v7296_v4  ;;  %5623 = vmatprep.subr.bf16.mxu1 %v7301_v24 }
 0x2f1   :  { %5568 = vmatprep.subr.bf16.mxu0 %v7304_v22 }
 0x2f3   :  { %5624 = vmatpush1.bf16.msra.mxu1 %v7299_v19 }
 0x2f4   :  { %5569 = vmatpush2.bf16.msra.mxu0 %v7302_v58  ;;  %5625 = vmatprep.subr.bf16.mxu1 %v7307_v35 }
 0x2f5   :  { %5570 = vmatprep.subr.bf16.mxu0 %v7310_v31 }
 0x2f6   :  { %5534 = vmatmul.mubr.bf16.gmra.mxu1 %v8255_v60 }
 0x2f7   :  { %5626 = vmatpush1.bf16.msra.mxu1 %v7305_v47  ;;  %5645 = vmatprep.mubr.bf16.mxu1 %v8493_v57 }
 0x2f8   :  { %5571 = vmatpush2.bf16.msra.mxu0 %v7308_v14  ;;  %5627 = vmatprep.subr.bf16.mxu1 %v7313_v59 }
 0x2f9   :  { %5572 = vmatprep.subr.bf16.mxu0 %v7316_v10 }
 0x2fb   :  { %5628 = vmatpush1.bf16.msra.mxu1 %v7311_v62 }
 0x2fc   :  { %5573 = vmatpush2.bf16.msra.mxu0 %v7314_v55 }
 0x2fe   :  { %5646 = vmatmul.mubr.bf16.vlgmr.msra.gmra.mxu1 %v8347_v52 }
 0x2ff   :  { %5575 = vmatmul.mubr.bf16.vlgmr.msra.gmra.mxu0 %v8287_v34  ;;  %5655 = vmatprep.mubr.bf16.mxu1 %v8493_v57 }
 0x300   :  { %5584 = vmatprep.mubr.bf16.mxu0 %v8313_v50 }
 0x306   :  { %5656 = vmatmul.mubr.bf16.gmra.mxu1 %v8356_v38 }
 0x307   :  { %5585 = vmatmul.mubr.bf16.gmra.mxu0 %v8306_v30  ;;  %5665 = vmatprep.mubr.bf16.mxu1 %v8493_v57 }
 0x308   :  { %5594 = vmatprep.mubr.bf16.mxu0 %v8325_v18 }
 0x30e   :  { %5666 = vmatmul.mubr.bf16.gmra.mxu1 %v8365_v12 }
 0x30f   :  { %5595 = vmatmul.mubr.bf16.gmra.mxu0 %v8321_v11  ;;  %5675 = vmatprep.mubr.bf16.mxu1 %v8493_v57 }
 0x310   :  { %5604 = vmatprep.mubr.bf16.mxu0 %v8330_v0 }
 0x316   :  { %5676 = vmatmul.mubr.bf16.gmra.mxu1 %v8369_v33 }
 0x317   :  { %5605 = vmatmul.mubr.bf16.gmra.mxu0 %v8339_v13 }
 0x331   :  { %v5292_v60 = vpop.f32.mrf.mxu0 }
 0x332   :  { %v5293_v25 = vadd.f32 %v5292_v60, %v4441_v63 }
 0x333   :  { %v5294_v34 = vpop.f32.mrf.mxu0 }
 0x334   :  { %v5295_v5 = vadd.f32 %v5294_v34, %v4445_v32 }
 0x335   :  { %v5296_v50 = vpop.f32.mrf.mxu0 }
 0x336   :  { %v5297_v48 = vadd.f32 %v5296_v50, %v4441_v63 }
 0x337   :  { %v5298_v30 = vpop.f32.mrf.mxu0 }
 0x338   :  { %v5299_v45 = vadd.f32 %v5298_v30, %v4445_v32 }
 0x339   :  { %v5302_v52 = vpop.f32.mrf.mxu0 }
 0x33a   :  { %v5303_v24 = vadd.f32 %v5302_v52, %v4441_v63 }
 0x33b   :  { %v5304_v38 = vpop.f32.mrf.mxu0 }
 0x33c   :  { %v5305_v35 = vadd.f32 %v5304_v38, %v4445_v32 }
 0x33d   :  { %v5306_v21 = vpop.f32.mrf.mxu0 }
 0x33e   :  { %v5307_v59 = vadd.f32 %v5306_v21, %v4441_v63 }
 0x33f   :  { %v5308_v18 = vpop.f32.mrf.mxu0 }
 0x340   :  { %v5309_v60 = vadd.f32 %v5308_v18, %v4445_v32 }
 0x341   :  { %v5312_v49 = vpop.f32.mrf.mxu0 }
 0x342   :  { %v5313_v52 = vadd.f32 %v5312_v49, %v4441_v63 }
 0x343   :  { %v8395_v12 = vpop.f32.mrf.mxu0 }
 0x344   :  { %v5315_v38 = vadd.f32 %v8395_v12, %v4445_v32 }
 0x345   :  { %v8397_v11 = vpop.f32.mrf.mxu0 }
 0x347   :  { %v8399_v57 = vpop.f32.mrf.mxu0 }
 0x349   :  { %v8401_v0 = vpop.f32.mrf.mxu0 }
 0x34a   :  { %v5323_v6 = vadd.f32 %v8401_v0, %v4441_v63 }
 0x34b   :  { %v8403_v3 = vpop.f32.mrf.mxu0 }
 0x34d   :  { %v5326_v13 = vpop.f32.mrf.mxu0 }
 0x34f   :  { %v5327_v56 = vpop.f32.mrf.mxu0 }
 0x35e   :  { %v5363_v2 = vpop.f32.mrf.mxu1 }
 0x35f   :  { %v5364_v17 = vadd.f32 %v5363_v2, %v5293_v25  ;;  %v5325_v25 = vadd.f32 %v8403_v3, %v4445_v32 }
 0x360   :  { %v5365_v23 = vpop.f32.mrf.mxu1 }
 0x361   :  { %v5366_v8 = vadd.f32 %v5365_v23, %v5295_v5 }
 0x362   :  { %v5367_v53 = vpop.f32.mrf.mxu1 }
 0x363   :  { %v5368_v27 = vadd.f32 %v5367_v53, %v5297_v48 }
 0x364   :  { %v5369_v41 = vpop.f32.mrf.mxu1 }
 0x365   :  { %v5370_v22 = vadd.f32 %v5369_v41, %v5299_v45  ;;  %v5317_v41 = vadd.f32 %v8397_v11, %v4441_v63 }
 0x366   :  { %v5373_v46 = vpop.f32.mrf.mxu1 }
 0x367   :  { %v5374_v31 = vadd.f32 %v5373_v46, %v5303_v24  ;;  %v8436_v24 = vrot.slane %v8408_v54, %v4101_v51 }
 0x368   :  { %v5375_v20 = vpop.f32.mrf.mxu1 }
 0x369   :  { %v5376_v10 = vadd.f32 %v5375_v20, %v5305_v35 }
 0x36a   :  { %v5377_v40 = vpop.f32.mrf.mxu1 }
 0x36b   :  { %v5378_v34 = vadd.f32 %v5377_v40, %v5307_v59  ;;  %v5319_v40 = vadd.f32 %v8399_v57, %v4445_v32 }
 0x36c   :  { %v5379_v43 = vpop.f32.mrf.mxu1 }
 0x36d   :  { %v5380_v13 = vadd.f32 %v5379_v43, %v5309_v60 }
 0x36e   :  { %v5383_v33 = vpop.f32.mrf.mxu1 }
 0x36f   :  { %v5384_v23 = vadd.f32 %v5383_v33, %v5313_v52 }
 0x370   :  { %v5385_v42 = vpop.f32.mrf.mxu1 }
 0x371   :  { %v5386_v46 = vadd.f32 %v5385_v42, %v5315_v38 }
 0x372   :  { %v5387_v44 = vpop.f32.mrf.mxu1 }
 0x373   :  { %v5388_v16 = vadd.f32 %v5387_v44, %v5317_v41 }
 0x374   :  { %v5389_v1 = vpop.f32.mrf.mxu1 }
 0x376   :  { %v8410_v28 = vpop.f32.mrf.mxu1 }
 0x377   :  { %v5394_v11 = vadd.f32 %v8410_v28, %v5323_v6 }
 0x378   :  { %v8415_v9 = vpop.f32.mrf.mxu1 }
 0x379   :  { %v5396_v5 = vadd.f32 %v8415_v9, %v5325_v25 }
 0x37a   :  { %v5397_v15 = vpop.f32.mrf.mxu1 }
 0x37b   :  { %v5390_v15 = vadd.f32 %v5389_v1, %v5319_v40 }
 0x37c   :  { %v5398_v37 = vpop.f32.mrf.mxu1 }
 0x37e   :  { %v5434_v7 = vpop.f32.mrf.mxu0 }
 0x37f   :  { %v5435_v39 = vadd.f32 %v5434_v7, %v5364_v17 }
 0x380   :  { %v5436_v61 = vpop.f32.mrf.mxu0 }
 0x381   :  { %5684 = vst [vmem:[#allocation14] sm:$0xff] %v5435_v39  ;;  %v5437_v29 = vadd.f32 %v5436_v61, %v5366_v8 }
 0x382   :  { %v5438_v4 = vpop.f32.mrf.mxu0 }
 0x383   :  { %5685 = vst [vmem:[#allocation14 + $0x8] sm:$0xff] %v5437_v29  ;;  %v5439_v19 = vadd.f32 %v5438_v4, %v5368_v27 }
 0x384   :  { %v5440_v58 = vpop.f32.mrf.mxu0 }
 0x385   :  { %5688 = vst [vmem:[#allocation14 + $0x20] sm:$0xff] %v5439_v19  ;;  %v5441_v47 = vadd.f32 %v5440_v58, %v5370_v22  ;;  %v8441_v19 = vrot.slane %v8408_v54, %v4105_v26 }
 0x386   :  { %v5444_v14 = vpop.f32.mrf.mxu0 }
 0x387   :  { %5689 = vst [vmem:[#allocation14 + $0x28] sm:$0xff] %v5441_v47  ;;  %v5445_v62 = vadd.f32 %v5444_v14, %v5374_v31 }
 0x388   :  { %v5446_v55 = vpop.f32.mrf.mxu0 }
 0x389   :  { %5692 = vst [vmem:[#allocation14 + $0x40] sm:$0xff] %v5445_v62  ;;  %v5447_v50 = vadd.f32 %v5446_v55, %v5376_v10 }
 0x38a   :  { %v5448_v30 = vpop.f32.mrf.mxu0 }
 0x38b   :  { %5693 = vst [vmem:[#allocation14 + $0x48] sm:$0xff] %v5447_v50  ;;  %v5449_v56 = vadd.f32 %v5448_v30, %v5378_v34 }
 0x38c   :  { %v5450_v2 = vpop.f32.mrf.mxu0 }
 0x38d   :  { %5696 = vst [vmem:[#allocation14 + $0x60] sm:$0xff] %v5449_v56  ;;  %v5451_v53 = vadd.f32 %v5450_v2, %v5380_v13 }
 0x38e   :  { %v5454_v21 = vpop.f32.mrf.mxu0 }
 0x38f   :  { %5697 = vst [vmem:[#allocation14 + $0x68] sm:$0xff] %v5451_v53  ;;  %v5455_v18 = vadd.f32 %v5454_v21, %v5384_v23 }
 0x390   :  { %v5456_v20 = vpop.f32.mrf.mxu0 }
 0x391   :  { %5700 = vst [vmem:[#allocation14 + $0x80] sm:$0xff] %v5455_v18  ;;  %v5457_v49 = vadd.f32 %v5456_v20, %v5386_v46 }
 0x392   :  { %v5458_v43 = vpop.f32.mrf.mxu0 }
 0x393   :  { %5701 = vst [vmem:[#allocation14 + $0x88] sm:$0xff] %v5457_v49  ;;  %v5459_v12 = vadd.f32 %v5458_v43, %v5388_v16 }
 0x394   :  { %v5460_v33 = vpop.f32.mrf.mxu0 }
 0x395   :  { %5704 = vst [vmem:[#allocation14 + $0xa0] sm:$0xff] %v5459_v12  ;;  %v5461_v42 = vadd.f32 %v5460_v33, %v5390_v15 }
 0x396   :  { %v5464_v37 = vpop.f32.mrf.mxu0 }
 0x397   :  { %5705 = vst [vmem:[#allocation14 + $0xa8] sm:$0xff] %v5461_v42  ;;  %v5465_v57 = vadd.f32 %v5464_v37, %v5394_v11 }
 0x398   :  { %v5466_v44 = vpop.f32.mrf.mxu0 }
 0x399   :  { %5708 = vst [vmem:[#allocation14 + $0xc0] sm:$0xff] %v5465_v57  ;;  %v5467_v17 = vadd.f32 %v5466_v44, %v5396_v5 }
 0x39a   :  { %v5468_v7 = vpop.f32.mrf.mxu0 }
 0x39b   :  { %5709 = vst [vmem:[#allocation14 + $0xc8] sm:$0xff] %v5467_v17 }
 0x39c   :  { %v5469_v0 = vpop.f32.mrf.mxu0 }
 0x39e   :  { %v5505_v1 = vpop.f32.mrf.mxu1 }
 0x39f   :  { %v5506_v35 = vadd.f32 %v5505_v1, %v8436_v24 }
 0x3a0   :  { %v5507_v63 = vpop.f32.mrf.mxu1 }
 0x3a1   :  { %v5508_v14 = vadd.f32 %v5507_v63, %v8441_v19 }
 0x3a2   :  { %v5509_v48 = vpop.f32.mrf.mxu1 }
 0x3a3   :  { %v5510_v55 = vadd.f32 %v5509_v48, %v8436_v24 }
 0x3a4   :  { %v5511_v8 = vpop.f32.mrf.mxu1 }
 0x3a5   :  { %v5512_v36 = vadd.f32 %v5511_v8, %v8441_v19 }
 0x3a6   :  { %v5515_v3 = vpop.f32.mrf.mxu1 }
 0x3a7   :  { %v5516_v13 = vadd.f32 %v5515_v3, %v8436_v24 }
 0x3a8   :  { %v5517_v32 = vpop.f32.mrf.mxu1 }
 0x3a9   :  { %v5518_v53 = vadd.f32 %v5517_v32, %v8441_v19 }
 0x3aa   :  { %v5519_v28 = vpop.f32.mrf.mxu1 }
 0x3ab   :  { %v5520_v20 = vadd.f32 %v5519_v28, %v8436_v24 }
 0x3ac   :  { %v5521_v39 = vpop.f32.mrf.mxu1 }
 0x3ad   :  { %v5522_v6 = vadd.f32 %v5521_v39, %v8441_v19 }
 0x3ae   :  { %v5525_v61 = vpop.f32.mrf.mxu1 }
 0x3af   :  { %v5526_v11 = vadd.f32 %v5525_v61, %v8436_v24 }
 0x3b0   :  { %v5527_v45 = vpop.f32.mrf.mxu1 }
 0x3b1   :  { %v5528_v44 = vadd.f32 %v5527_v45, %v8441_v19 }
 0x3b2   :  { %v5529_v27 = vpop.f32.mrf.mxu1 }
 0x3b3   :  { %v5530_v63 = vadd.f32 %v5529_v27, %v8436_v24 }
 0x3b4   :  { %v8427_v9 = vpop.f32.mrf.mxu1 }
 0x3b5   :  { %v5532_v28 = vadd.f32 %v8427_v9, %v8441_v19 }
 0x3b6   :  { %v8429_v29 = vpop.f32.mrf.mxu1 }
 0x3b8   :  { %v8431_v4 = vpop.f32.mrf.mxu1 }
 0x3ba   :  { %v5539_v22 = vpop.f32.mrf.mxu1 }
 0x3bc   :  { %v5540_v58 = vpop.f32.mrf.mxu1 }
 0x3bd   :  { %v5536_v58 = vadd.f32 %v8429_v29, %v8436_v24 }
 0x3be   :  { %v5647_v31 = vpop.f32.mrf.mxu1 }
 0x3bf   :  { %v5576_v47 = vpop.f32.mrf.mxu0 }
 0x3c0   :  { %v5577_v59 = vadd.f32 %v5576_v47, %v5506_v35  ;;  %v5649_v10 = vpop.f32.mrf.mxu1 }
 0x3c1   :  { %v5578_v62 = vpop.f32.mrf.mxu0 }
 0x3c2   :  { %v5648_v51 = vadd.f32 %v5647_v31, %v5577_v59  ;;  %v5579_v60 = vadd.f32 %v5578_v62, %v5508_v14  ;;  %v5651_v34 = vpop.f32.mrf.mxu1  ;;  %v5538_v14 = vadd.f32 %v8431_v4, %v8441_v19 }
 0x3c3   :  { %v5580_v50 = vpop.f32.mrf.mxu0 }
 0x3c4   :  { %5686 = vst [vmem:[#allocation14 + $0x10] sm:$0xff] %v5648_v51  ;;  %v5650_v26 = vadd.f32 %v5649_v10, %v5579_v60  ;;  %v5581_v54 = vadd.f32 %v5580_v50, %v5510_v55  ;;  %v5653_v30 = vpop.f32.mrf.mxu1 }
 0x3c5   :  { %v5582_v52 = vpop.f32.mrf.mxu0 }
 0x3c6   :  { %5687 = vst [vmem:[#allocation14 + $0x18] sm:$0xff] %v5650_v26  ;;  %v5652_v56 = vadd.f32 %v5651_v34, %v5581_v54  ;;  %v5583_v2 = vadd.f32 %v5582_v52, %v5512_v36  ;;  %v5657_v38 = vpop.f32.mrf.mxu1 }
 0x3c7   :  { %v5586_v23 = vpop.f32.mrf.mxu0 }
 0x3c8   :  { %5690 = vst [vmem:[#allocation14 + $0x30] sm:$0xff] %v5652_v56  ;;  %v5654_v21 = vadd.f32 %v5653_v30, %v5583_v2  ;;  %v5587_v41 = vadd.f32 %v5586_v23, %v5516_v13  ;;  %v5659_v46 = vpop.f32.mrf.mxu1 }
 0x3c9   :  { %v5588_v18 = vpop.f32.mrf.mxu0 }
 0x3ca   :  { %5691 = vst [vmem:[#allocation14 + $0x38] sm:$0xff] %v5654_v21  ;;  %v5658_v40 = vadd.f32 %v5657_v38, %v5587_v41  ;;  %v5589_v16 = vadd.f32 %v5588_v18, %v5518_v53  ;;  %v5661_v49 = vpop.f32.mrf.mxu1 }
 0x3cb   :  { %v5590_v43 = vpop.f32.mrf.mxu0 }
 0x3cc   :  { %5694 = vst [vmem:[#allocation14 + $0x50] sm:$0xff] %v5658_v40  ;;  %v5660_v15 = vadd.f32 %v5659_v46, %v5589_v16  ;;  %v5591_v12 = vadd.f32 %v5590_v43, %v5520_v20  ;;  %v5663_v33 = vpop.f32.mrf.mxu1 }
 0x3cd   :  { %v5592_v25 = vpop.f32.mrf.mxu0 }
 0x3ce   :  { %5695 = vst [vmem:[#allocation14 + $0x58] sm:$0xff] %v5660_v15  ;;  %v5662_v42 = vadd.f32 %v5661_v49, %v5591_v12  ;;  %v5593_v37 = vadd.f32 %v5592_v25, %v5522_v6  ;;  %v5667_v5 = vpop.f32.mrf.mxu1 }
 0x3cf   :  { %v5596_v57 = vpop.f32.mrf.mxu0 }
 0x3d0   :  { %5698 = vst [vmem:[#allocation14 + $0x70] sm:$0xff] %v5662_v42  ;;  %v5664_v17 = vadd.f32 %v5663_v33, %v5593_v37  ;;  %v5597_v7 = vadd.f32 %v5596_v57, %v5526_v11  ;;  %v5669_v0 = vpop.f32.mrf.mxu1 }
 0x3d1   :  { %v5598_v1 = vpop.f32.mrf.mxu0 }
 0x3d2   :  { %5699 = vst [vmem:[#allocation14 + $0x78] sm:$0xff] %v5664_v17  ;;  %v5668_v48 = vadd.f32 %v5667_v5, %v5597_v7  ;;  %v5599_v8 = vadd.f32 %v5598_v1, %v5528_v44  ;;  %v5671_v3 = vpop.f32.mrf.mxu1 }
 0x3d3   :  { %v5600_v32 = vpop.f32.mrf.mxu0 }
 0x3d4   :  { %5702 = vst [vmem:[#allocation14 + $0x90] sm:$0xff] %v5668_v48  ;;  %v5670_v39 = vadd.f32 %v5669_v0, %v5599_v8  ;;  %v5601_v61 = vadd.f32 %v5600_v32, %v5530_v63  ;;  %v5673_v22 = vpop.f32.mrf.mxu1 }
 0x3d5   :  { %v5602_v45 = vpop.f32.mrf.mxu0 }
 0x3d6   :  { %5703 = vst [vmem:[#allocation14 + $0x98] sm:$0xff] %v5670_v39  ;;  %v5672_v35 = vadd.f32 %v5671_v3, %v5601_v61  ;;  %v5603_v31 = vadd.f32 %v5602_v45, %v5532_v28  ;;  %v5677_v27 = vpop.f32.mrf.mxu1 }
 0x3d7   :  { %v5606_v47 = vpop.f32.mrf.mxu0 }
 0x3d8   :  { %5706 = vst [vmem:[#allocation14 + $0xb0] sm:$0xff] %v5672_v35  ;;  %v5674_v59 = vadd.f32 %v5673_v22, %v5603_v31  ;;  %v5607_v10 = vadd.f32 %v5606_v47, %v5536_v58  ;;  %v5679_v9 = vpop.f32.mrf.mxu1 }
 0x3d9   :  { %v5608_v62 = vpop.f32.mrf.mxu0 }
 0x3da   :  { %5707 = vst [vmem:[#allocation14 + $0xb8] sm:$0xff] %v5674_v59  ;;  %v5678_v55 = vadd.f32 %v5677_v27, %v5607_v10  ;;  %v5609_v51 = vadd.f32 %v5608_v62, %v5538_v14  ;;  %v5681_v60 = vpop.f32.mrf.mxu1 }
 0x3db   :  { %v5610_v29 = vpop.f32.mrf.mxu0 }
 0x3dc   :  { %5710 = vst [vmem:[#allocation14 + $0xd0] sm:$0xff] %v5678_v55  ;;  %v5680_v24 = vadd.f32 %v5679_v9, %v5609_v51  ;;  %v5682_v34 = vpop.f32.mrf.mxu1 }
 0x3dd   :  { %v5611_v50 = vpop.f32.mrf.mxu0 }
 0x3de   :  { %5711 = vst [vmem:[#allocation14 + $0xd8] sm:$0xff] %v5680_v24 }
 0x3df   :  { %7471 = shalt.err (!%p7468_p11)
}
 0x3e0   :  { %s7503_s20 = smov 512   ;;  %s7504_s1 = smov 32  }
 0x3e1   :  { %5723 = dma.vmem_to_hbm [thread:$0]  %s5718_s15, 3584, %s8472_s9, [#allocation4], %s7503_s20, %s7503_s20, %s7504_s1  }
 0x3e2   :  { %7488 = dma.done.wait [#allocation4], 3584  }
 0x3e3   :  { %7489 = vsyncadd [#allocation4], 4294963712 }
 0x3e4   :  { %5727 = vsyncpa [#allocation3], 1 }
 0x3e5   :  { %5728 = vsyncpa [#allocation6], 1 }
 0x3e6   :  { %5729 = vsyncpa [#allocation9], 1 }
 0x3e7   :  { %5730 = vsyncpa [#allocation12], 1 }
 0x3e8   :  { %5731 = vsyncpa [#allocation4], 1 }

</bundles_post_ra>
